<compile_context>
chip_gen: v7x
topology: tpu7x:2x2x1
jax: 0.10.0
libtpu: 0.0.40
codegen_flags: <defaults>
</compile_context>

<pallas_src>
import numpy as np
import jax
import jax.numpy as jnp
from jax.experimental import pallas as pl
from jax.experimental.pallas import tpu as pltpu

# ---------------------------- problem sizes ----------------------------
N_BATCH = 2
C_IN, H, W = 1, 28, 28
C_OUT = 8
KH = KW = 3
KK = KH * KW                        # 9 conv taps (C_IN = 1)
HP, WP = H // 2, W // 2             # 14 x 14 after 2x2 maxpool
CELL_W = 15                         # in-kernel pooled-cell row stride: t = i*15 + j
QP = 256                            # per-channel padded feature block (2 lane tiles)
Q_LANES = 384                       # padded phase-image width (225 real + slack, 3 tiles)
FC1_IN = C_OUT * HP * WP            # 1568 (PyTorch)
FC1_INP = C_OUT * QP                # 2048 (padded contraction dim used on-chip)
FC1_OUT = 32
N_CLASSES = 10

# packed fc-parameter buffer row offsets (all multiples of 8)
B1_ROW = FC1_INP                    # 2048
W2_ROW = B1_ROW + 8                 # 2056
B2_ROW = W2_ROW + FC1_OUT           # 2088
WPACK_ROWS = B2_ROW + 8             # 2096


# ------------------------- fused Pallas kernel -------------------------
def fused_forward_kernel(q_ref, scal_ref, wpack_ref, out_ref):
    """conv3x3 + bias + ReLU + maxpool2x2 + fc1 + ReLU + fc2, all in VMEM.

    q_ref     : (4, N, 384) f32  phase images of the zero-padded input:
                q[2a+b, n, u*15+v] = xpad[n, 2u+a, 2v+b]; lanes >= 225 are zero.
    scal_ref  : (80,)       f32  SMEM scalars: [0,72) conv weights (c*9+kh*3+kw),
                                 [72,80) conv biases.
    wpack_ref : (2096, 32)  f32  rows [0,2048) fc1 weight (row = c*256 + i*15 + j,
                                 padded rows exactly zero), row 2048 = fc1 bias,
                                 rows [2056,2088) = fc2 weight^T (cols>=10 zero),
                                 row 2088 = fc2 bias (padded).
    out_ref   : (N, 10)     f32  logits.
    """
    # ---- conv params as scalars (SMEM) ----
    cw = [scal_ref[i] for i in range(C_OUT * KK)]
    cb = [scal_ref[C_OUT * KK + c] for c in range(C_OUT)]

    # ---- in-kernel im2col: 16 lane-shifted windows of the 4 phase images ----
    # tap (kh,kw) of pool-phase (dh,dw) at pooled cell (i,j) lives in phase image
    # ((dh+kh)%2, (dw+kw)%2) at lane offset ((dh+kh)//2)*15 + (dw+kw)//2.
    win = {}
    for a in range(2):
        for b in range(2):
            base = q_ref[2 * a + b]                           # (N, 384)
            for qh in range(2):
                for qw in range(2):
                    s = qh * CELL_W + qw                      # 0, 1, 15, 16
                    win[(a, b, qh, qw)] = base[:, s:s + QP]   # (N, 256)

    # ---- conv (VPU MACs, both images per op) + maxpool + bias + ReLU ----
    pooled = []
    for c in range(C_OUT):
        mx = None
        for dh in range(2):
            for dw in range(2):
                y = None
                for kh in range(KH):
                    for kw in range(KW):
                        rh, rw = dh + kh, dw + kw
                        t = cw[c * KK + kh * KW + kw] * win[(rh % 2, rw % 2,
                                                             rh // 2, rw // 2)]
                        y = t if y is None else y + t
                mx = y if mx is None else jnp.maximum(mx, y)
        # bias-add and ReLU commute with max (monotone), so apply once after pooling.
        pooled.append(jnp.maximum(mx + cb[c], 0.0))           # (N, 256)

    # channels-major, lane-dense features; 128-aligned concat (no relayout).
    # Junk lanes (cell-grid padding / relu'd bias) meet exactly-zero fc1 weight rows.
    p = jnp.concatenate(pooled, axis=1)                       # (N, 2048)

    # ---- fc1 as ONE MXU contraction, then fc2 ----
    w1 = wpack_ref[0:FC1_INP, :]                              # (2048, 32)
    b1 = wpack_ref[B1_ROW:B1_ROW + 1, :]                      # (1, 32)
    w2 = wpack_ref[W2_ROW:W2_ROW + FC1_OUT, :]                # (32, 32), cols>=10 zero
    b2 = wpack_ref[B2_ROW:B2_ROW + 1, :]                      # (1, 32)

    h = jnp.maximum(jnp.dot(p, w1, preferred_element_type=jnp.float32) + b1, 0.0)
    logits = jnp.dot(h, w2, preferred_element_type=jnp.float32) + b2     # (N, 32)
    out_ref[...] = logits[:, :N_CLASSES]


# ------------------------------ wrapper ------------------------------
def mnist_classifier_forward(x, params):
    """x: (N,1,28,28) f32; params in PyTorch layouts (see main)."""
    conv_w, conv_b, fc1_w, fc1_b, fc2_w, fc2_b = params
    n = x.shape[0]

    # --- only wrapper-side data work: pad + stride-2 phase split of the image ---
    xp = jnp.pad(x[:, 0], ((0, 0), (1, 1), (1, 1)))                      # (N, 30, 30)
    q = xp.reshape(n, CELL_W, 2, CELL_W, 2).transpose(2, 4, 0, 1, 3)     # (2,2,N,15,15)
    q = q.reshape(4, n, CELL_W * CELL_W)                                 # (4, N, 225)
    q = jnp.pad(q, ((0, 0), (0, 0), (0, Q_LANES - CELL_W * CELL_W)))     # (4, N, 384)

    # --- conv params -> SMEM scalars (one tiny DMA) ---
    scal = jnp.concatenate([conv_w.reshape(C_OUT * KK),
                            conv_b.reshape(C_OUT)])                      # (80,)

    # --- fc params packed into ONE VMEM buffer (trace-time relayout) ---
    # fc1 row order must match the kernel's feature order: row = c*256 + i*15 + j,
    # with ALL padded rows exactly zero (kernel correctness invariant).
    w1 = fc1_w.reshape(FC1_OUT, C_OUT, HP, WP).transpose(1, 2, 3, 0)     # (8,14,14,32)
    w1 = jnp.pad(w1, ((0, 0), (0, 0), (0, CELL_W - WP), (0, 0)))         # (8,14,15,32)
    w1 = w1.reshape(C_OUT, HP * CELL_W, FC1_OUT)                         # (8,210,32)
    w1 = jnp.pad(w1, ((0, 0), (0, QP - HP * CELL_W), (0, 0)))            # (8,256,32)
    w1 = w1.reshape(FC1_INP, FC1_OUT)                                    # (2048,32)
    b1 = jnp.pad(fc1_b.reshape(1, FC1_OUT), ((0, 7), (0, 0)))            # (8,32)
    w2 = jnp.pad(fc2_w.T, ((0, 0), (0, FC1_OUT - N_CLASSES)))            # (32,32)
    b2 = jnp.pad(fc2_b.reshape(1, N_CLASSES),
                 ((0, 7), (0, FC1_OUT - N_CLASSES)))                     # (8,32)
    wpack = jnp.concatenate([w1, b1, w2, b2], axis=0)                    # (2096,32)
    assert wpack.shape == (WPACK_ROWS, FC1_OUT)

    vmem = pltpu.MemorySpace.VMEM
    smem = pltpu.MemorySpace.SMEM
    return pl.pallas_call(
        fused_forward_kernel,
        out_shape=jax.ShapeDtypeStruct((n, N_CLASSES), jnp.float32),
        in_specs=[pl.BlockSpec(memory_space=vmem),     # phase images
                  pl.BlockSpec(memory_space=smem),     # conv scalars
                  pl.BlockSpec(memory_space=vmem)],    # packed fc params
        out_specs=pl.BlockSpec(memory_space=vmem),
    )(q, scal, wpack)


# --------------------------- pure-JAX reference ---------------------------
def reference_forward(x, params):
    conv_w, conv_b, fc1_w, fc1_b, fc2_w, fc2_b = params
    hi = jax.lax.Precision.HIGHEST
    y = jax.lax.conv_general_dilated(
        x, conv_w, window_strides=(1, 1), padding=((1, 1), (1, 1)),
        dimension_numbers=("NCHW", "OIHW", "NCHW"), precision=hi)
    y = jnp.maximum(y + conv_b.reshape(1, C_OUT, 1, 1), 0.0)
    y = jax.lax.reduce_window(y, -jnp.inf, jax.lax.max,
                              (1, 1, 2, 2), (1, 1, 2, 2), "VALID")
    f = y.reshape(x.shape[0], -1)                       # NCHW flatten
    h = jnp.maximum(jnp.dot(f, fc1_w.T, precision=hi) + fc1_b, 0.0)
    return jnp.dot(h, fc2_w.T, precision=hi) + fc2_b


# --------------------------------- main ---------------------------------
if __name__ == "__main__":
    import math
    key = jax.random.PRNGKey(0)
    ks = jax.random.split(key, 7)

    # Deterministic synthetic parameters in PyTorch layouts.
    conv_w = jax.random.normal(ks[0], (C_OUT, C_IN, KH, KW), jnp.float32) / 3.0
    conv_b = jax.random.normal(ks[1], (C_OUT,), jnp.float32) * 0.1
    fc1_w = jax.random.normal(ks[2], (FC1_OUT, FC1_IN), jnp.float32) / math.sqrt(FC1_IN)
    fc1_b = jax.random.normal(ks[3], (FC1_OUT,), jnp.float32) * 0.1
    fc2_w = jax.random.normal(ks[4], (N_CLASSES, FC1_OUT), jnp.float32) / math.sqrt(FC1_OUT)
    fc2_b = jax.random.normal(ks[5], (N_CLASSES,), jnp.float32) * 0.1
    params = (conv_w, conv_b, fc1_w, fc1_b, fc2_w, fc2_b)

    x = jax.random.normal(ks[6], (N_BATCH, C_IN, H, W), jnp.float32)

    logits = jax.jit(mnist_classifier_forward)(x, params)
    logits = jax.block_until_ready(logits)

    ref = jax.block_until_ready(reference_forward(x, params))
    assert logits.shape == (N_BATCH, N_CLASSES)
    np.testing.assert_allclose(np.asarray(logits), np.asarray(ref),
                               atol=1e-3, rtol=1e-3)

    print("KERNEL_OK")
</pallas_src>

<mosaic_0001>
module attributes {stable_mosaic.version = 11 : i64} {
  func.func @fused_forward_kernel(%arg0: memref<4x2x384xf32, #tpu.memory_space<vmem>>, %arg1: memref<80xf32, #tpu.memory_space<smem>>, %arg2: memref<2096x32xf32, #tpu.memory_space<vmem>>, %arg3: memref<2x10xf32, #tpu.memory_space<vmem>>) attributes {dimension_semantics = [], scalar_prefetch = 0 : i64, scratch_operands = 0 : i64, tpu.core_type = #tpu.core_type<tc>} {
    %c0 = arith.constant 0 : index
    %0 = memref.load %arg1[%c0] : memref<80xf32, #tpu.memory_space<smem>>
    %c1 = arith.constant 1 : index
    %1 = memref.load %arg1[%c1] : memref<80xf32, #tpu.memory_space<smem>>
    %c2 = arith.constant 2 : index
    %2 = memref.load %arg1[%c2] : memref<80xf32, #tpu.memory_space<smem>>
    %c3 = arith.constant 3 : index
    %3 = memref.load %arg1[%c3] : memref<80xf32, #tpu.memory_space<smem>>
    %c4 = arith.constant 4 : index
    %4 = memref.load %arg1[%c4] : memref<80xf32, #tpu.memory_space<smem>>
    %c5 = arith.constant 5 : index
    %5 = memref.load %arg1[%c5] : memref<80xf32, #tpu.memory_space<smem>>
    %c6 = arith.constant 6 : index
    %6 = memref.load %arg1[%c6] : memref<80xf32, #tpu.memory_space<smem>>
    %c7 = arith.constant 7 : index
    %7 = memref.load %arg1[%c7] : memref<80xf32, #tpu.memory_space<smem>>
    %c8 = arith.constant 8 : index
    %8 = memref.load %arg1[%c8] : memref<80xf32, #tpu.memory_space<smem>>
    %c9 = arith.constant 9 : index
    %9 = memref.load %arg1[%c9] : memref<80xf32, #tpu.memory_space<smem>>
    %c10 = arith.constant 10 : index
    %10 = memref.load %arg1[%c10] : memref<80xf32, #tpu.memory_space<smem>>
    %c11 = arith.constant 11 : index
    %11 = memref.load %arg1[%c11] : memref<80xf32, #tpu.memory_space<smem>>
    %c12 = arith.constant 12 : index
    %12 = memref.load %arg1[%c12] : memref<80xf32, #tpu.memory_space<smem>>
    %c13 = arith.constant 13 : index
    %13 = memref.load %arg1[%c13] : memref<80xf32, #tpu.memory_space<smem>>
    %c14 = arith.constant 14 : index
    %14 = memref.load %arg1[%c14] : memref<80xf32, #tpu.memory_space<smem>>
    %c15 = arith.constant 15 : index
    %15 = memref.load %arg1[%c15] : memref<80xf32, #tpu.memory_space<smem>>
    %c16 = arith.constant 16 : index
    %16 = memref.load %arg1[%c16] : memref<80xf32, #tpu.memory_space<smem>>
    %c17 = arith.constant 17 : index
    %17 = memref.load %arg1[%c17] : memref<80xf32, #tpu.memory_space<smem>>
    %c18 = arith.constant 18 : index
    %18 = memref.load %arg1[%c18] : memref<80xf32, #tpu.memory_space<smem>>
    %c19 = arith.constant 19 : index
    %19 = memref.load %arg1[%c19] : memref<80xf32, #tpu.memory_space<smem>>
    %c20 = arith.constant 20 : index
    %20 = memref.load %arg1[%c20] : memref<80xf32, #tpu.memory_space<smem>>
    %c21 = arith.constant 21 : index
    %21 = memref.load %arg1[%c21] : memref<80xf32, #tpu.memory_space<smem>>
    %c22 = arith.constant 22 : index
    %22 = memref.load %arg1[%c22] : memref<80xf32, #tpu.memory_space<smem>>
    %c23 = arith.constant 23 : index
    %23 = memref.load %arg1[%c23] : memref<80xf32, #tpu.memory_space<smem>>
    %c24 = arith.constant 24 : index
    %24 = memref.load %arg1[%c24] : memref<80xf32, #tpu.memory_space<smem>>
    %c25 = arith.constant 25 : index
    %25 = memref.load %arg1[%c25] : memref<80xf32, #tpu.memory_space<smem>>
    %c26 = arith.constant 26 : index
    %26 = memref.load %arg1[%c26] : memref<80xf32, #tpu.memory_space<smem>>
    %c27 = arith.constant 27 : index
    %27 = memref.load %arg1[%c27] : memref<80xf32, #tpu.memory_space<smem>>
    %c28 = arith.constant 28 : index
    %28 = memref.load %arg1[%c28] : memref<80xf32, #tpu.memory_space<smem>>
    %c29 = arith.constant 29 : index
    %29 = memref.load %arg1[%c29] : memref<80xf32, #tpu.memory_space<smem>>
    %c30 = arith.constant 30 : index
    %30 = memref.load %arg1[%c30] : memref<80xf32, #tpu.memory_space<smem>>
    %c31 = arith.constant 31 : index
    %31 = memref.load %arg1[%c31] : memref<80xf32, #tpu.memory_space<smem>>
    %c32 = arith.constant 32 : index
    %32 = memref.load %arg1[%c32] : memref<80xf32, #tpu.memory_space<smem>>
    %c33 = arith.constant 33 : index
    %33 = memref.load %arg1[%c33] : memref<80xf32, #tpu.memory_space<smem>>
    %c34 = arith.constant 34 : index
    %34 = memref.load %arg1[%c34] : memref<80xf32, #tpu.memory_space<smem>>
    %c35 = arith.constant 35 : index
    %35 = memref.load %arg1[%c35] : memref<80xf32, #tpu.memory_space<smem>>
    %c36 = arith.constant 36 : index
    %36 = memref.load %arg1[%c36] : memref<80xf32, #tpu.memory_space<smem>>
    %c37 = arith.constant 37 : index
    %37 = memref.load %arg1[%c37] : memref<80xf32, #tpu.memory_space<smem>>
    %c38 = arith.constant 38 : index
    %38 = memref.load %arg1[%c38] : memref<80xf32, #tpu.memory_space<smem>>
    %c39 = arith.constant 39 : index
    %39 = memref.load %arg1[%c39] : memref<80xf32, #tpu.memory_space<smem>>
    %c40 = arith.constant 40 : index
    %40 = memref.load %arg1[%c40] : memref<80xf32, #tpu.memory_space<smem>>
    %c41 = arith.constant 41 : index
    %41 = memref.load %arg1[%c41] : memref<80xf32, #tpu.memory_space<smem>>
    %c42 = arith.constant 42 : index
    %42 = memref.load %arg1[%c42] : memref<80xf32, #tpu.memory_space<smem>>
    %c43 = arith.constant 43 : index
    %43 = memref.load %arg1[%c43] : memref<80xf32, #tpu.memory_space<smem>>
    %c44 = arith.constant 44 : index
    %44 = memref.load %arg1[%c44] : memref<80xf32, #tpu.memory_space<smem>>
    %c45 = arith.constant 45 : index
    %45 = memref.load %arg1[%c45] : memref<80xf32, #tpu.memory_space<smem>>
    %c46 = arith.constant 46 : index
    %46 = memref.load %arg1[%c46] : memref<80xf32, #tpu.memory_space<smem>>
    %c47 = arith.constant 47 : index
    %47 = memref.load %arg1[%c47] : memref<80xf32, #tpu.memory_space<smem>>
    %c48 = arith.constant 48 : index
    %48 = memref.load %arg1[%c48] : memref<80xf32, #tpu.memory_space<smem>>
    %c49 = arith.constant 49 : index
    %49 = memref.load %arg1[%c49] : memref<80xf32, #tpu.memory_space<smem>>
    %c50 = arith.constant 50 : index
    %50 = memref.load %arg1[%c50] : memref<80xf32, #tpu.memory_space<smem>>
    %c51 = arith.constant 51 : index
    %51 = memref.load %arg1[%c51] : memref<80xf32, #tpu.memory_space<smem>>
    %c52 = arith.constant 52 : index
    %52 = memref.load %arg1[%c52] : memref<80xf32, #tpu.memory_space<smem>>
    %c53 = arith.constant 53 : index
    %53 = memref.load %arg1[%c53] : memref<80xf32, #tpu.memory_space<smem>>
    %c54 = arith.constant 54 : index
    %54 = memref.load %arg1[%c54] : memref<80xf32, #tpu.memory_space<smem>>
    %c55 = arith.constant 55 : index
    %55 = memref.load %arg1[%c55] : memref<80xf32, #tpu.memory_space<smem>>
    %c56 = arith.constant 56 : index
    %56 = memref.load %arg1[%c56] : memref<80xf32, #tpu.memory_space<smem>>
    %c57 = arith.constant 57 : index
    %57 = memref.load %arg1[%c57] : memref<80xf32, #tpu.memory_space<smem>>
    %c58 = arith.constant 58 : index
    %58 = memref.load %arg1[%c58] : memref<80xf32, #tpu.memory_space<smem>>
    %c59 = arith.constant 59 : index
    %59 = memref.load %arg1[%c59] : memref<80xf32, #tpu.memory_space<smem>>
    %c60 = arith.constant 60 : index
    %60 = memref.load %arg1[%c60] : memref<80xf32, #tpu.memory_space<smem>>
    %c61 = arith.constant 61 : index
    %61 = memref.load %arg1[%c61] : memref<80xf32, #tpu.memory_space<smem>>
    %c62 = arith.constant 62 : index
    %62 = memref.load %arg1[%c62] : memref<80xf32, #tpu.memory_space<smem>>
    %c63 = arith.constant 63 : index
    %63 = memref.load %arg1[%c63] : memref<80xf32, #tpu.memory_space<smem>>
    %c64 = arith.constant 64 : index
    %64 = memref.load %arg1[%c64] : memref<80xf32, #tpu.memory_space<smem>>
    %c65 = arith.constant 65 : index
    %65 = memref.load %arg1[%c65] : memref<80xf32, #tpu.memory_space<smem>>
    %c66 = arith.constant 66 : index
    %66 = memref.load %arg1[%c66] : memref<80xf32, #tpu.memory_space<smem>>
    %c67 = arith.constant 67 : index
    %67 = memref.load %arg1[%c67] : memref<80xf32, #tpu.memory_space<smem>>
    %c68 = arith.constant 68 : index
    %68 = memref.load %arg1[%c68] : memref<80xf32, #tpu.memory_space<smem>>
    %c69 = arith.constant 69 : index
    %69 = memref.load %arg1[%c69] : memref<80xf32, #tpu.memory_space<smem>>
    %c70 = arith.constant 70 : index
    %70 = memref.load %arg1[%c70] : memref<80xf32, #tpu.memory_space<smem>>
    %c71 = arith.constant 71 : index
    %71 = memref.load %arg1[%c71] : memref<80xf32, #tpu.memory_space<smem>>
    %c72 = arith.constant 72 : index
    %72 = memref.load %arg1[%c72] : memref<80xf32, #tpu.memory_space<smem>>
    %c73 = arith.constant 73 : index
    %73 = memref.load %arg1[%c73] : memref<80xf32, #tpu.memory_space<smem>>
    %c74 = arith.constant 74 : index
    %74 = memref.load %arg1[%c74] : memref<80xf32, #tpu.memory_space<smem>>
    %c75 = arith.constant 75 : index
    %75 = memref.load %arg1[%c75] : memref<80xf32, #tpu.memory_space<smem>>
    %c76 = arith.constant 76 : index
    %76 = memref.load %arg1[%c76] : memref<80xf32, #tpu.memory_space<smem>>
    %c77 = arith.constant 77 : index
    %77 = memref.load %arg1[%c77] : memref<80xf32, #tpu.memory_space<smem>>
    %c78 = arith.constant 78 : index
    %78 = memref.load %arg1[%c78] : memref<80xf32, #tpu.memory_space<smem>>
    %c79 = arith.constant 79 : index
    %79 = memref.load %arg1[%c79] : memref<80xf32, #tpu.memory_space<smem>>
    %c0_0 = arith.constant 0 : index
    %c0_1 = arith.constant 0 : index
    %c0_2 = arith.constant 0 : index
    %80 = vector.load %arg0[%c0_0, %c0_1, %c0_2] : memref<4x2x384xf32, #tpu.memory_space<vmem>>, vector<1x2x384xf32>
    %81 = vector.shape_cast %80 : vector<1x2x384xf32> to vector<2x384xf32>
    %82 = vector.extract_strided_slice %81 {offsets = [0, 0], sizes = [2, 256], strides = [1, 1]} : vector<2x384xf32> to vector<2x256xf32>
    %83 = vector.extract_strided_slice %81 {offsets = [0, 1], sizes = [2, 256], strides = [1, 1]} : vector<2x384xf32> to vector<2x256xf32>
    %84 = vector.extract_strided_slice %81 {offsets = [0, 15], sizes = [2, 256], strides = [1, 1]} : vector<2x384xf32> to vector<2x256xf32>
    %85 = vector.extract_strided_slice %81 {offsets = [0, 16], sizes = [2, 256], strides = [1, 1]} : vector<2x384xf32> to vector<2x256xf32>
    %c1_3 = arith.constant 1 : index
    %c0_4 = arith.constant 0 : index
    %c0_5 = arith.constant 0 : index
    %86 = vector.load %arg0[%c1_3, %c0_4, %c0_5] : memref<4x2x384xf32, #tpu.memory_space<vmem>>, vector<1x2x384xf32>
    %87 = vector.shape_cast %86 : vector<1x2x384xf32> to vector<2x384xf32>
    %88 = vector.extract_strided_slice %87 {offsets = [0, 0], sizes = [2, 256], strides = [1, 1]} : vector<2x384xf32> to vector<2x256xf32>
    %89 = vector.extract_strided_slice %87 {offsets = [0, 1], sizes = [2, 256], strides = [1, 1]} : vector<2x384xf32> to vector<2x256xf32>
    %90 = vector.extract_strided_slice %87 {offsets = [0, 15], sizes = [2, 256], strides = [1, 1]} : vector<2x384xf32> to vector<2x256xf32>
    %91 = vector.extract_strided_slice %87 {offsets = [0, 16], sizes = [2, 256], strides = [1, 1]} : vector<2x384xf32> to vector<2x256xf32>
    %c2_6 = arith.constant 2 : index
    %c0_7 = arith.constant 0 : index
    %c0_8 = arith.constant 0 : index
    %92 = vector.load %arg0[%c2_6, %c0_7, %c0_8] : memref<4x2x384xf32, #tpu.memory_space<vmem>>, vector<1x2x384xf32>
    %93 = vector.shape_cast %92 : vector<1x2x384xf32> to vector<2x384xf32>
    %94 = vector.extract_strided_slice %93 {offsets = [0, 0], sizes = [2, 256], strides = [1, 1]} : vector<2x384xf32> to vector<2x256xf32>
    %95 = vector.extract_strided_slice %93 {offsets = [0, 1], sizes = [2, 256], strides = [1, 1]} : vector<2x384xf32> to vector<2x256xf32>
    %96 = vector.extract_strided_slice %93 {offsets = [0, 15], sizes = [2, 256], strides = [1, 1]} : vector<2x384xf32> to vector<2x256xf32>
    %97 = vector.extract_strided_slice %93 {offsets = [0, 16], sizes = [2, 256], strides = [1, 1]} : vector<2x384xf32> to vector<2x256xf32>
    %c3_9 = arith.constant 3 : index
    %c0_10 = arith.constant 0 : index
    %c0_11 = arith.constant 0 : index
    %98 = vector.load %arg0[%c3_9, %c0_10, %c0_11] : memref<4x2x384xf32, #tpu.memory_space<vmem>>, vector<1x2x384xf32>
    %99 = vector.shape_cast %98 : vector<1x2x384xf32> to vector<2x384xf32>
    %100 = vector.extract_strided_slice %99 {offsets = [0, 0], sizes = [2, 256], strides = [1, 1]} : vector<2x384xf32> to vector<2x256xf32>
    %101 = vector.extract_strided_slice %99 {offsets = [0, 1], sizes = [2, 256], strides = [1, 1]} : vector<2x384xf32> to vector<2x256xf32>
    %102 = vector.extract_strided_slice %99 {offsets = [0, 15], sizes = [2, 256], strides = [1, 1]} : vector<2x384xf32> to vector<2x256xf32>
    %103 = vector.extract_strided_slice %99 {offsets = [0, 16], sizes = [2, 256], strides = [1, 1]} : vector<2x384xf32> to vector<2x256xf32>
    %104 = vector.broadcast %0 : f32 to vector<2x256xf32>
    %105 = arith.mulf %104, %82 : vector<2x256xf32>
    %106 = vector.broadcast %1 : f32 to vector<2x256xf32>
    %107 = arith.mulf %106, %88 : vector<2x256xf32>
    %108 = arith.addf %105, %107 : vector<2x256xf32>
    %109 = vector.broadcast %2 : f32 to vector<2x256xf32>
    %110 = arith.mulf %109, %83 : vector<2x256xf32>
    %111 = arith.addf %108, %110 : vector<2x256xf32>
    %112 = vector.broadcast %3 : f32 to vector<2x256xf32>
    %113 = arith.mulf %112, %94 : vector<2x256xf32>
    %114 = arith.addf %111, %113 : vector<2x256xf32>
    %115 = vector.broadcast %4 : f32 to vector<2x256xf32>
    %116 = arith.mulf %115, %100 : vector<2x256xf32>
    %117 = arith.addf %114, %116 : vector<2x256xf32>
    %118 = vector.broadcast %5 : f32 to vector<2x256xf32>
    %119 = arith.mulf %118, %95 : vector<2x256xf32>
    %120 = arith.addf %117, %119 : vector<2x256xf32>
    %121 = vector.broadcast %6 : f32 to vector<2x256xf32>
    %122 = arith.mulf %121, %84 : vector<2x256xf32>
    %123 = arith.addf %120, %122 : vector<2x256xf32>
    %124 = vector.broadcast %7 : f32 to vector<2x256xf32>
    %125 = arith.mulf %124, %90 : vector<2x256xf32>
    %126 = arith.addf %123, %125 : vector<2x256xf32>
    %127 = vector.broadcast %8 : f32 to vector<2x256xf32>
    %128 = arith.mulf %127, %85 : vector<2x256xf32>
    %129 = arith.addf %126, %128 : vector<2x256xf32>
    %130 = vector.broadcast %0 : f32 to vector<2x256xf32>
    %131 = arith.mulf %130, %88 : vector<2x256xf32>
    %132 = vector.broadcast %1 : f32 to vector<2x256xf32>
    %133 = arith.mulf %132, %83 : vector<2x256xf32>
    %134 = arith.addf %131, %133 : vector<2x256xf32>
    %135 = vector.broadcast %2 : f32 to vector<2x256xf32>
    %136 = arith.mulf %135, %89 : vector<2x256xf32>
    %137 = arith.addf %134, %136 : vector<2x256xf32>
    %138 = vector.broadcast %3 : f32 to vector<2x256xf32>
    %139 = arith.mulf %138, %100 : vector<2x256xf32>
    %140 = arith.addf %137, %139 : vector<2x256xf32>
    %141 = vector.broadcast %4 : f32 to vector<2x256xf32>
    %142 = arith.mulf %141, %95 : vector<2x256xf32>
    %143 = arith.addf %140, %142 : vector<2x256xf32>
    %144 = vector.broadcast %5 : f32 to vector<2x256xf32>
    %145 = arith.mulf %144, %101 : vector<2x256xf32>
    %146 = arith.addf %143, %145 : vector<2x256xf32>
    %147 = vector.broadcast %6 : f32 to vector<2x256xf32>
    %148 = arith.mulf %147, %90 : vector<2x256xf32>
    %149 = arith.addf %146, %148 : vector<2x256xf32>
    %150 = vector.broadcast %7 : f32 to vector<2x256xf32>
    %151 = arith.mulf %150, %85 : vector<2x256xf32>
    %152 = arith.addf %149, %151 : vector<2x256xf32>
    %153 = vector.broadcast %8 : f32 to vector<2x256xf32>
    %154 = arith.mulf %153, %91 : vector<2x256xf32>
    %155 = arith.addf %152, %154 : vector<2x256xf32>
    %156 = arith.maximumf %129, %155 : vector<2x256xf32>
    %157 = vector.broadcast %0 : f32 to vector<2x256xf32>
    %158 = arith.mulf %157, %94 : vector<2x256xf32>
    %159 = vector.broadcast %1 : f32 to vector<2x256xf32>
    %160 = arith.mulf %159, %100 : vector<2x256xf32>
    %161 = arith.addf %158, %160 : vector<2x256xf32>
    %162 = vector.broadcast %2 : f32 to vector<2x256xf32>
    %163 = arith.mulf %162, %95 : vector<2x256xf32>
    %164 = arith.addf %161, %163 : vector<2x256xf32>
    %165 = vector.broadcast %3 : f32 to vector<2x256xf32>
    %166 = arith.mulf %165, %84 : vector<2x256xf32>
    %167 = arith.addf %164, %166 : vector<2x256xf32>
    %168 = vector.broadcast %4 : f32 to vector<2x256xf32>
    %169 = arith.mulf %168, %90 : vector<2x256xf32>
    %170 = arith.addf %167, %169 : vector<2x256xf32>
    %171 = vector.broadcast %5 : f32 to vector<2x256xf32>
    %172 = arith.mulf %171, %85 : vector<2x256xf32>
    %173 = arith.addf %170, %172 : vector<2x256xf32>
    %174 = vector.broadcast %6 : f32 to vector<2x256xf32>
    %175 = arith.mulf %174, %96 : vector<2x256xf32>
    %176 = arith.addf %173, %175 : vector<2x256xf32>
    %177 = vector.broadcast %7 : f32 to vector<2x256xf32>
    %178 = arith.mulf %177, %102 : vector<2x256xf32>
    %179 = arith.addf %176, %178 : vector<2x256xf32>
    %180 = vector.broadcast %8 : f32 to vector<2x256xf32>
    %181 = arith.mulf %180, %97 : vector<2x256xf32>
    %182 = arith.addf %179, %181 : vector<2x256xf32>
    %183 = arith.maximumf %156, %182 : vector<2x256xf32>
    %184 = vector.broadcast %0 : f32 to vector<2x256xf32>
    %185 = arith.mulf %184, %100 : vector<2x256xf32>
    %186 = vector.broadcast %1 : f32 to vector<2x256xf32>
    %187 = arith.mulf %186, %95 : vector<2x256xf32>
    %188 = arith.addf %185, %187 : vector<2x256xf32>
    %189 = vector.broadcast %2 : f32 to vector<2x256xf32>
    %190 = arith.mulf %189, %101 : vector<2x256xf32>
    %191 = arith.addf %188, %190 : vector<2x256xf32>
    %192 = vector.broadcast %3 : f32 to vector<2x256xf32>
    %193 = arith.mulf %192, %90 : vector<2x256xf32>
    %194 = arith.addf %191, %193 : vector<2x256xf32>
    %195 = vector.broadcast %4 : f32 to vector<2x256xf32>
    %196 = arith.mulf %195, %85 : vector<2x256xf32>
    %197 = arith.addf %194, %196 : vector<2x256xf32>
    %198 = vector.broadcast %5 : f32 to vector<2x256xf32>
    %199 = arith.mulf %198, %91 : vector<2x256xf32>
    %200 = arith.addf %197, %199 : vector<2x256xf32>
    %201 = vector.broadcast %6 : f32 to vector<2x256xf32>
    %202 = arith.mulf %201, %102 : vector<2x256xf32>
    %203 = arith.addf %200, %202 : vector<2x256xf32>
    %204 = vector.broadcast %7 : f32 to vector<2x256xf32>
    %205 = arith.mulf %204, %97 : vector<2x256xf32>
    %206 = arith.addf %203, %205 : vector<2x256xf32>
    %207 = vector.broadcast %8 : f32 to vector<2x256xf32>
    %208 = arith.mulf %207, %103 : vector<2x256xf32>
    %209 = arith.addf %206, %208 : vector<2x256xf32>
    %210 = arith.maximumf %183, %209 : vector<2x256xf32>
    %211 = vector.broadcast %72 : f32 to vector<2x256xf32>
    %212 = arith.addf %210, %211 : vector<2x256xf32>
    %cst = arith.constant 0.000000e+00 : f32
    %213 = vector.broadcast %cst : f32 to vector<2x256xf32>
    %214 = arith.maximumf %212, %213 : vector<2x256xf32>
    %215 = vector.broadcast %9 : f32 to vector<2x256xf32>
    %216 = arith.mulf %215, %82 : vector<2x256xf32>
    %217 = vector.broadcast %10 : f32 to vector<2x256xf32>
    %218 = arith.mulf %217, %88 : vector<2x256xf32>
    %219 = arith.addf %216, %218 : vector<2x256xf32>
    %220 = vector.broadcast %11 : f32 to vector<2x256xf32>
    %221 = arith.mulf %220, %83 : vector<2x256xf32>
    %222 = arith.addf %219, %221 : vector<2x256xf32>
    %223 = vector.broadcast %12 : f32 to vector<2x256xf32>
    %224 = arith.mulf %223, %94 : vector<2x256xf32>
    %225 = arith.addf %222, %224 : vector<2x256xf32>
    %226 = vector.broadcast %13 : f32 to vector<2x256xf32>
    %227 = arith.mulf %226, %100 : vector<2x256xf32>
    %228 = arith.addf %225, %227 : vector<2x256xf32>
    %229 = vector.broadcast %14 : f32 to vector<2x256xf32>
    %230 = arith.mulf %229, %95 : vector<2x256xf32>
    %231 = arith.addf %228, %230 : vector<2x256xf32>
    %232 = vector.broadcast %15 : f32 to vector<2x256xf32>
    %233 = arith.mulf %232, %84 : vector<2x256xf32>
    %234 = arith.addf %231, %233 : vector<2x256xf32>
    %235 = vector.broadcast %16 : f32 to vector<2x256xf32>
    %236 = arith.mulf %235, %90 : vector<2x256xf32>
    %237 = arith.addf %234, %236 : vector<2x256xf32>
    %238 = vector.broadcast %17 : f32 to vector<2x256xf32>
    %239 = arith.mulf %238, %85 : vector<2x256xf32>
    %240 = arith.addf %237, %239 : vector<2x256xf32>
    %241 = vector.broadcast %9 : f32 to vector<2x256xf32>
    %242 = arith.mulf %241, %88 : vector<2x256xf32>
    %243 = vector.broadcast %10 : f32 to vector<2x256xf32>
    %244 = arith.mulf %243, %83 : vector<2x256xf32>
    %245 = arith.addf %242, %244 : vector<2x256xf32>
    %246 = vector.broadcast %11 : f32 to vector<2x256xf32>
    %247 = arith.mulf %246, %89 : vector<2x256xf32>
    %248 = arith.addf %245, %247 : vector<2x256xf32>
    %249 = vector.broadcast %12 : f32 to vector<2x256xf32>
    %250 = arith.mulf %249, %100 : vector<2x256xf32>
    %251 = arith.addf %248, %250 : vector<2x256xf32>
    %252 = vector.broadcast %13 : f32 to vector<2x256xf32>
    %253 = arith.mulf %252, %95 : vector<2x256xf32>
    %254 = arith.addf %251, %253 : vector<2x256xf32>
    %255 = vector.broadcast %14 : f32 to vector<2x256xf32>
    %256 = arith.mulf %255, %101 : vector<2x256xf32>
    %257 = arith.addf %254, %256 : vector<2x256xf32>
    %258 = vector.broadcast %15 : f32 to vector<2x256xf32>
    %259 = arith.mulf %258, %90 : vector<2x256xf32>
    %260 = arith.addf %257, %259 : vector<2x256xf32>
    %261 = vector.broadcast %16 : f32 to vector<2x256xf32>
    %262 = arith.mulf %261, %85 : vector<2x256xf32>
    %263 = arith.addf %260, %262 : vector<2x256xf32>
    %264 = vector.broadcast %17 : f32 to vector<2x256xf32>
    %265 = arith.mulf %264, %91 : vector<2x256xf32>
    %266 = arith.addf %263, %265 : vector<2x256xf32>
    %267 = arith.maximumf %240, %266 : vector<2x256xf32>
    %268 = vector.broadcast %9 : f32 to vector<2x256xf32>
    %269 = arith.mulf %268, %94 : vector<2x256xf32>
    %270 = vector.broadcast %10 : f32 to vector<2x256xf32>
    %271 = arith.mulf %270, %100 : vector<2x256xf32>
    %272 = arith.addf %269, %271 : vector<2x256xf32>
    %273 = vector.broadcast %11 : f32 to vector<2x256xf32>
    %274 = arith.mulf %273, %95 : vector<2x256xf32>
    %275 = arith.addf %272, %274 : vector<2x256xf32>
    %276 = vector.broadcast %12 : f32 to vector<2x256xf32>
    %277 = arith.mulf %276, %84 : vector<2x256xf32>
    %278 = arith.addf %275, %277 : vector<2x256xf32>
    %279 = vector.broadcast %13 : f32 to vector<2x256xf32>
    %280 = arith.mulf %279, %90 : vector<2x256xf32>
    %281 = arith.addf %278, %280 : vector<2x256xf32>
    %282 = vector.broadcast %14 : f32 to vector<2x256xf32>
    %283 = arith.mulf %282, %85 : vector<2x256xf32>
    %284 = arith.addf %281, %283 : vector<2x256xf32>
    %285 = vector.broadcast %15 : f32 to vector<2x256xf32>
    %286 = arith.mulf %285, %96 : vector<2x256xf32>
    %287 = arith.addf %284, %286 : vector<2x256xf32>
    %288 = vector.broadcast %16 : f32 to vector<2x256xf32>
    %289 = arith.mulf %288, %102 : vector<2x256xf32>
    %290 = arith.addf %287, %289 : vector<2x256xf32>
    %291 = vector.broadcast %17 : f32 to vector<2x256xf32>
    %292 = arith.mulf %291, %97 : vector<2x256xf32>
    %293 = arith.addf %290, %292 : vector<2x256xf32>
    %294 = arith.maximumf %267, %293 : vector<2x256xf32>
    %295 = vector.broadcast %9 : f32 to vector<2x256xf32>
    %296 = arith.mulf %295, %100 : vector<2x256xf32>
    %297 = vector.broadcast %10 : f32 to vector<2x256xf32>
    %298 = arith.mulf %297, %95 : vector<2x256xf32>
    %299 = arith.addf %296, %298 : vector<2x256xf32>
    %300 = vector.broadcast %11 : f32 to vector<2x256xf32>
    %301 = arith.mulf %300, %101 : vector<2x256xf32>
    %302 = arith.addf %299, %301 : vector<2x256xf32>
    %303 = vector.broadcast %12 : f32 to vector<2x256xf32>
    %304 = arith.mulf %303, %90 : vector<2x256xf32>
    %305 = arith.addf %302, %304 : vector<2x256xf32>
    %306 = vector.broadcast %13 : f32 to vector<2x256xf32>
    %307 = arith.mulf %306, %85 : vector<2x256xf32>
    %308 = arith.addf %305, %307 : vector<2x256xf32>
    %309 = vector.broadcast %14 : f32 to vector<2x256xf32>
    %310 = arith.mulf %309, %91 : vector<2x256xf32>
    %311 = arith.addf %308, %310 : vector<2x256xf32>
    %312 = vector.broadcast %15 : f32 to vector<2x256xf32>
    %313 = arith.mulf %312, %102 : vector<2x256xf32>
    %314 = arith.addf %311, %313 : vector<2x256xf32>
    %315 = vector.broadcast %16 : f32 to vector<2x256xf32>
    %316 = arith.mulf %315, %97 : vector<2x256xf32>
    %317 = arith.addf %314, %316 : vector<2x256xf32>
    %318 = vector.broadcast %17 : f32 to vector<2x256xf32>
    %319 = arith.mulf %318, %103 : vector<2x256xf32>
    %320 = arith.addf %317, %319 : vector<2x256xf32>
    %321 = arith.maximumf %294, %320 : vector<2x256xf32>
    %322 = vector.broadcast %73 : f32 to vector<2x256xf32>
    %323 = arith.addf %321, %322 : vector<2x256xf32>
    %cst_12 = arith.constant 0.000000e+00 : f32
    %324 = vector.broadcast %cst_12 : f32 to vector<2x256xf32>
    %325 = arith.maximumf %323, %324 : vector<2x256xf32>
    %326 = vector.broadcast %18 : f32 to vector<2x256xf32>
    %327 = arith.mulf %326, %82 : vector<2x256xf32>
    %328 = vector.broadcast %19 : f32 to vector<2x256xf32>
    %329 = arith.mulf %328, %88 : vector<2x256xf32>
    %330 = arith.addf %327, %329 : vector<2x256xf32>
    %331 = vector.broadcast %20 : f32 to vector<2x256xf32>
    %332 = arith.mulf %331, %83 : vector<2x256xf32>
    %333 = arith.addf %330, %332 : vector<2x256xf32>
    %334 = vector.broadcast %21 : f32 to vector<2x256xf32>
    %335 = arith.mulf %334, %94 : vector<2x256xf32>
    %336 = arith.addf %333, %335 : vector<2x256xf32>
    %337 = vector.broadcast %22 : f32 to vector<2x256xf32>
    %338 = arith.mulf %337, %100 : vector<2x256xf32>
    %339 = arith.addf %336, %338 : vector<2x256xf32>
    %340 = vector.broadcast %23 : f32 to vector<2x256xf32>
    %341 = arith.mulf %340, %95 : vector<2x256xf32>
    %342 = arith.addf %339, %341 : vector<2x256xf32>
    %343 = vector.broadcast %24 : f32 to vector<2x256xf32>
    %344 = arith.mulf %343, %84 : vector<2x256xf32>
    %345 = arith.addf %342, %344 : vector<2x256xf32>
    %346 = vector.broadcast %25 : f32 to vector<2x256xf32>
    %347 = arith.mulf %346, %90 : vector<2x256xf32>
    %348 = arith.addf %345, %347 : vector<2x256xf32>
    %349 = vector.broadcast %26 : f32 to vector<2x256xf32>
    %350 = arith.mulf %349, %85 : vector<2x256xf32>
    %351 = arith.addf %348, %350 : vector<2x256xf32>
    %352 = vector.broadcast %18 : f32 to vector<2x256xf32>
    %353 = arith.mulf %352, %88 : vector<2x256xf32>
    %354 = vector.broadcast %19 : f32 to vector<2x256xf32>
    %355 = arith.mulf %354, %83 : vector<2x256xf32>
    %356 = arith.addf %353, %355 : vector<2x256xf32>
    %357 = vector.broadcast %20 : f32 to vector<2x256xf32>
    %358 = arith.mulf %357, %89 : vector<2x256xf32>
    %359 = arith.addf %356, %358 : vector<2x256xf32>
    %360 = vector.broadcast %21 : f32 to vector<2x256xf32>
    %361 = arith.mulf %360, %100 : vector<2x256xf32>
    %362 = arith.addf %359, %361 : vector<2x256xf32>
    %363 = vector.broadcast %22 : f32 to vector<2x256xf32>
    %364 = arith.mulf %363, %95 : vector<2x256xf32>
    %365 = arith.addf %362, %364 : vector<2x256xf32>
    %366 = vector.broadcast %23 : f32 to vector<2x256xf32>
    %367 = arith.mulf %366, %101 : vector<2x256xf32>
    %368 = arith.addf %365, %367 : vector<2x256xf32>
    %369 = vector.broadcast %24 : f32 to vector<2x256xf32>
    %370 = arith.mulf %369, %90 : vector<2x256xf32>
    %371 = arith.addf %368, %370 : vector<2x256xf32>
    %372 = vector.broadcast %25 : f32 to vector<2x256xf32>
    %373 = arith.mulf %372, %85 : vector<2x256xf32>
    %374 = arith.addf %371, %373 : vector<2x256xf32>
    %375 = vector.broadcast %26 : f32 to vector<2x256xf32>
    %376 = arith.mulf %375, %91 : vector<2x256xf32>
    %377 = arith.addf %374, %376 : vector<2x256xf32>
    %378 = arith.maximumf %351, %377 : vector<2x256xf32>
    %379 = vector.broadcast %18 : f32 to vector<2x256xf32>
    %380 = arith.mulf %379, %94 : vector<2x256xf32>
    %381 = vector.broadcast %19 : f32 to vector<2x256xf32>
    %382 = arith.mulf %381, %100 : vector<2x256xf32>
    %383 = arith.addf %380, %382 : vector<2x256xf32>
    %384 = vector.broadcast %20 : f32 to vector<2x256xf32>
    %385 = arith.mulf %384, %95 : vector<2x256xf32>
    %386 = arith.addf %383, %385 : vector<2x256xf32>
    %387 = vector.broadcast %21 : f32 to vector<2x256xf32>
    %388 = arith.mulf %387, %84 : vector<2x256xf32>
    %389 = arith.addf %386, %388 : vector<2x256xf32>
    %390 = vector.broadcast %22 : f32 to vector<2x256xf32>
    %391 = arith.mulf %390, %90 : vector<2x256xf32>
    %392 = arith.addf %389, %391 : vector<2x256xf32>
    %393 = vector.broadcast %23 : f32 to vector<2x256xf32>
    %394 = arith.mulf %393, %85 : vector<2x256xf32>
    %395 = arith.addf %392, %394 : vector<2x256xf32>
    %396 = vector.broadcast %24 : f32 to vector<2x256xf32>
    %397 = arith.mulf %396, %96 : vector<2x256xf32>
    %398 = arith.addf %395, %397 : vector<2x256xf32>
    %399 = vector.broadcast %25 : f32 to vector<2x256xf32>
    %400 = arith.mulf %399, %102 : vector<2x256xf32>
    %401 = arith.addf %398, %400 : vector<2x256xf32>
    %402 = vector.broadcast %26 : f32 to vector<2x256xf32>
    %403 = arith.mulf %402, %97 : vector<2x256xf32>
    %404 = arith.addf %401, %403 : vector<2x256xf32>
    %405 = arith.maximumf %378, %404 : vector<2x256xf32>
    %406 = vector.broadcast %18 : f32 to vector<2x256xf32>
    %407 = arith.mulf %406, %100 : vector<2x256xf32>
    %408 = vector.broadcast %19 : f32 to vector<2x256xf32>
    %409 = arith.mulf %408, %95 : vector<2x256xf32>
    %410 = arith.addf %407, %409 : vector<2x256xf32>
    %411 = vector.broadcast %20 : f32 to vector<2x256xf32>
    %412 = arith.mulf %411, %101 : vector<2x256xf32>
    %413 = arith.addf %410, %412 : vector<2x256xf32>
    %414 = vector.broadcast %21 : f32 to vector<2x256xf32>
    %415 = arith.mulf %414, %90 : vector<2x256xf32>
    %416 = arith.addf %413, %415 : vector<2x256xf32>
    %417 = vector.broadcast %22 : f32 to vector<2x256xf32>
    %418 = arith.mulf %417, %85 : vector<2x256xf32>
    %419 = arith.addf %416, %418 : vector<2x256xf32>
    %420 = vector.broadcast %23 : f32 to vector<2x256xf32>
    %421 = arith.mulf %420, %91 : vector<2x256xf32>
    %422 = arith.addf %419, %421 : vector<2x256xf32>
    %423 = vector.broadcast %24 : f32 to vector<2x256xf32>
    %424 = arith.mulf %423, %102 : vector<2x256xf32>
    %425 = arith.addf %422, %424 : vector<2x256xf32>
    %426 = vector.broadcast %25 : f32 to vector<2x256xf32>
    %427 = arith.mulf %426, %97 : vector<2x256xf32>
    %428 = arith.addf %425, %427 : vector<2x256xf32>
    %429 = vector.broadcast %26 : f32 to vector<2x256xf32>
    %430 = arith.mulf %429, %103 : vector<2x256xf32>
    %431 = arith.addf %428, %430 : vector<2x256xf32>
    %432 = arith.maximumf %405, %431 : vector<2x256xf32>
    %433 = vector.broadcast %74 : f32 to vector<2x256xf32>
    %434 = arith.addf %432, %433 : vector<2x256xf32>
    %cst_13 = arith.constant 0.000000e+00 : f32
    %435 = vector.broadcast %cst_13 : f32 to vector<2x256xf32>
    %436 = arith.maximumf %434, %435 : vector<2x256xf32>
    %437 = vector.broadcast %27 : f32 to vector<2x256xf32>
    %438 = arith.mulf %437, %82 : vector<2x256xf32>
    %439 = vector.broadcast %28 : f32 to vector<2x256xf32>
    %440 = arith.mulf %439, %88 : vector<2x256xf32>
    %441 = arith.addf %438, %440 : vector<2x256xf32>
    %442 = vector.broadcast %29 : f32 to vector<2x256xf32>
    %443 = arith.mulf %442, %83 : vector<2x256xf32>
    %444 = arith.addf %441, %443 : vector<2x256xf32>
    %445 = vector.broadcast %30 : f32 to vector<2x256xf32>
    %446 = arith.mulf %445, %94 : vector<2x256xf32>
    %447 = arith.addf %444, %446 : vector<2x256xf32>
    %448 = vector.broadcast %31 : f32 to vector<2x256xf32>
    %449 = arith.mulf %448, %100 : vector<2x256xf32>
    %450 = arith.addf %447, %449 : vector<2x256xf32>
    %451 = vector.broadcast %32 : f32 to vector<2x256xf32>
    %452 = arith.mulf %451, %95 : vector<2x256xf32>
    %453 = arith.addf %450, %452 : vector<2x256xf32>
    %454 = vector.broadcast %33 : f32 to vector<2x256xf32>
    %455 = arith.mulf %454, %84 : vector<2x256xf32>
    %456 = arith.addf %453, %455 : vector<2x256xf32>
    %457 = vector.broadcast %34 : f32 to vector<2x256xf32>
    %458 = arith.mulf %457, %90 : vector<2x256xf32>
    %459 = arith.addf %456, %458 : vector<2x256xf32>
    %460 = vector.broadcast %35 : f32 to vector<2x256xf32>
    %461 = arith.mulf %460, %85 : vector<2x256xf32>
    %462 = arith.addf %459, %461 : vector<2x256xf32>
    %463 = vector.broadcast %27 : f32 to vector<2x256xf32>
    %464 = arith.mulf %463, %88 : vector<2x256xf32>
    %465 = vector.broadcast %28 : f32 to vector<2x256xf32>
    %466 = arith.mulf %465, %83 : vector<2x256xf32>
    %467 = arith.addf %464, %466 : vector<2x256xf32>
    %468 = vector.broadcast %29 : f32 to vector<2x256xf32>
    %469 = arith.mulf %468, %89 : vector<2x256xf32>
    %470 = arith.addf %467, %469 : vector<2x256xf32>
    %471 = vector.broadcast %30 : f32 to vector<2x256xf32>
    %472 = arith.mulf %471, %100 : vector<2x256xf32>
    %473 = arith.addf %470, %472 : vector<2x256xf32>
    %474 = vector.broadcast %31 : f32 to vector<2x256xf32>
    %475 = arith.mulf %474, %95 : vector<2x256xf32>
    %476 = arith.addf %473, %475 : vector<2x256xf32>
    %477 = vector.broadcast %32 : f32 to vector<2x256xf32>
    %478 = arith.mulf %477, %101 : vector<2x256xf32>
    %479 = arith.addf %476, %478 : vector<2x256xf32>
    %480 = vector.broadcast %33 : f32 to vector<2x256xf32>
    %481 = arith.mulf %480, %90 : vector<2x256xf32>
    %482 = arith.addf %479, %481 : vector<2x256xf32>
    %483 = vector.broadcast %34 : f32 to vector<2x256xf32>
    %484 = arith.mulf %483, %85 : vector<2x256xf32>
    %485 = arith.addf %482, %484 : vector<2x256xf32>
    %486 = vector.broadcast %35 : f32 to vector<2x256xf32>
    %487 = arith.mulf %486, %91 : vector<2x256xf32>
    %488 = arith.addf %485, %487 : vector<2x256xf32>
    %489 = arith.maximumf %462, %488 : vector<2x256xf32>
    %490 = vector.broadcast %27 : f32 to vector<2x256xf32>
    %491 = arith.mulf %490, %94 : vector<2x256xf32>
    %492 = vector.broadcast %28 : f32 to vector<2x256xf32>
    %493 = arith.mulf %492, %100 : vector<2x256xf32>
    %494 = arith.addf %491, %493 : vector<2x256xf32>
    %495 = vector.broadcast %29 : f32 to vector<2x256xf32>
    %496 = arith.mulf %495, %95 : vector<2x256xf32>
    %497 = arith.addf %494, %496 : vector<2x256xf32>
    %498 = vector.broadcast %30 : f32 to vector<2x256xf32>
    %499 = arith.mulf %498, %84 : vector<2x256xf32>
    %500 = arith.addf %497, %499 : vector<2x256xf32>
    %501 = vector.broadcast %31 : f32 to vector<2x256xf32>
    %502 = arith.mulf %501, %90 : vector<2x256xf32>
    %503 = arith.addf %500, %502 : vector<2x256xf32>
    %504 = vector.broadcast %32 : f32 to vector<2x256xf32>
    %505 = arith.mulf %504, %85 : vector<2x256xf32>
    %506 = arith.addf %503, %505 : vector<2x256xf32>
    %507 = vector.broadcast %33 : f32 to vector<2x256xf32>
    %508 = arith.mulf %507, %96 : vector<2x256xf32>
    %509 = arith.addf %506, %508 : vector<2x256xf32>
    %510 = vector.broadcast %34 : f32 to vector<2x256xf32>
    %511 = arith.mulf %510, %102 : vector<2x256xf32>
    %512 = arith.addf %509, %511 : vector<2x256xf32>
    %513 = vector.broadcast %35 : f32 to vector<2x256xf32>
    %514 = arith.mulf %513, %97 : vector<2x256xf32>
    %515 = arith.addf %512, %514 : vector<2x256xf32>
    %516 = arith.maximumf %489, %515 : vector<2x256xf32>
    %517 = vector.broadcast %27 : f32 to vector<2x256xf32>
    %518 = arith.mulf %517, %100 : vector<2x256xf32>
    %519 = vector.broadcast %28 : f32 to vector<2x256xf32>
    %520 = arith.mulf %519, %95 : vector<2x256xf32>
    %521 = arith.addf %518, %520 : vector<2x256xf32>
    %522 = vector.broadcast %29 : f32 to vector<2x256xf32>
    %523 = arith.mulf %522, %101 : vector<2x256xf32>
    %524 = arith.addf %521, %523 : vector<2x256xf32>
    %525 = vector.broadcast %30 : f32 to vector<2x256xf32>
    %526 = arith.mulf %525, %90 : vector<2x256xf32>
    %527 = arith.addf %524, %526 : vector<2x256xf32>
    %528 = vector.broadcast %31 : f32 to vector<2x256xf32>
    %529 = arith.mulf %528, %85 : vector<2x256xf32>
    %530 = arith.addf %527, %529 : vector<2x256xf32>
    %531 = vector.broadcast %32 : f32 to vector<2x256xf32>
    %532 = arith.mulf %531, %91 : vector<2x256xf32>
    %533 = arith.addf %530, %532 : vector<2x256xf32>
    %534 = vector.broadcast %33 : f32 to vector<2x256xf32>
    %535 = arith.mulf %534, %102 : vector<2x256xf32>
    %536 = arith.addf %533, %535 : vector<2x256xf32>
    %537 = vector.broadcast %34 : f32 to vector<2x256xf32>
    %538 = arith.mulf %537, %97 : vector<2x256xf32>
    %539 = arith.addf %536, %538 : vector<2x256xf32>
    %540 = vector.broadcast %35 : f32 to vector<2x256xf32>
    %541 = arith.mulf %540, %103 : vector<2x256xf32>
    %542 = arith.addf %539, %541 : vector<2x256xf32>
    %543 = arith.maximumf %516, %542 : vector<2x256xf32>
    %544 = vector.broadcast %75 : f32 to vector<2x256xf32>
    %545 = arith.addf %543, %544 : vector<2x256xf32>
    %cst_14 = arith.constant 0.000000e+00 : f32
    %546 = vector.broadcast %cst_14 : f32 to vector<2x256xf32>
    %547 = arith.maximumf %545, %546 : vector<2x256xf32>
    %548 = vector.broadcast %36 : f32 to vector<2x256xf32>
    %549 = arith.mulf %548, %82 : vector<2x256xf32>
    %550 = vector.broadcast %37 : f32 to vector<2x256xf32>
    %551 = arith.mulf %550, %88 : vector<2x256xf32>
    %552 = arith.addf %549, %551 : vector<2x256xf32>
    %553 = vector.broadcast %38 : f32 to vector<2x256xf32>
    %554 = arith.mulf %553, %83 : vector<2x256xf32>
    %555 = arith.addf %552, %554 : vector<2x256xf32>
    %556 = vector.broadcast %39 : f32 to vector<2x256xf32>
    %557 = arith.mulf %556, %94 : vector<2x256xf32>
    %558 = arith.addf %555, %557 : vector<2x256xf32>
    %559 = vector.broadcast %40 : f32 to vector<2x256xf32>
    %560 = arith.mulf %559, %100 : vector<2x256xf32>
    %561 = arith.addf %558, %560 : vector<2x256xf32>
    %562 = vector.broadcast %41 : f32 to vector<2x256xf32>
    %563 = arith.mulf %562, %95 : vector<2x256xf32>
    %564 = arith.addf %561, %563 : vector<2x256xf32>
    %565 = vector.broadcast %42 : f32 to vector<2x256xf32>
    %566 = arith.mulf %565, %84 : vector<2x256xf32>
    %567 = arith.addf %564, %566 : vector<2x256xf32>
    %568 = vector.broadcast %43 : f32 to vector<2x256xf32>
    %569 = arith.mulf %568, %90 : vector<2x256xf32>
    %570 = arith.addf %567, %569 : vector<2x256xf32>
    %571 = vector.broadcast %44 : f32 to vector<2x256xf32>
    %572 = arith.mulf %571, %85 : vector<2x256xf32>
    %573 = arith.addf %570, %572 : vector<2x256xf32>
    %574 = vector.broadcast %36 : f32 to vector<2x256xf32>
    %575 = arith.mulf %574, %88 : vector<2x256xf32>
    %576 = vector.broadcast %37 : f32 to vector<2x256xf32>
    %577 = arith.mulf %576, %83 : vector<2x256xf32>
    %578 = arith.addf %575, %577 : vector<2x256xf32>
    %579 = vector.broadcast %38 : f32 to vector<2x256xf32>
    %580 = arith.mulf %579, %89 : vector<2x256xf32>
    %581 = arith.addf %578, %580 : vector<2x256xf32>
    %582 = vector.broadcast %39 : f32 to vector<2x256xf32>
    %583 = arith.mulf %582, %100 : vector<2x256xf32>
    %584 = arith.addf %581, %583 : vector<2x256xf32>
    %585 = vector.broadcast %40 : f32 to vector<2x256xf32>
    %586 = arith.mulf %585, %95 : vector<2x256xf32>
    %587 = arith.addf %584, %586 : vector<2x256xf32>
    %588 = vector.broadcast %41 : f32 to vector<2x256xf32>
    %589 = arith.mulf %588, %101 : vector<2x256xf32>
    %590 = arith.addf %587, %589 : vector<2x256xf32>
    %591 = vector.broadcast %42 : f32 to vector<2x256xf32>
    %592 = arith.mulf %591, %90 : vector<2x256xf32>
    %593 = arith.addf %590, %592 : vector<2x256xf32>
    %594 = vector.broadcast %43 : f32 to vector<2x256xf32>
    %595 = arith.mulf %594, %85 : vector<2x256xf32>
    %596 = arith.addf %593, %595 : vector<2x256xf32>
    %597 = vector.broadcast %44 : f32 to vector<2x256xf32>
    %598 = arith.mulf %597, %91 : vector<2x256xf32>
    %599 = arith.addf %596, %598 : vector<2x256xf32>
    %600 = arith.maximumf %573, %599 : vector<2x256xf32>
    %601 = vector.broadcast %36 : f32 to vector<2x256xf32>
    %602 = arith.mulf %601, %94 : vector<2x256xf32>
    %603 = vector.broadcast %37 : f32 to vector<2x256xf32>
    %604 = arith.mulf %603, %100 : vector<2x256xf32>
    %605 = arith.addf %602, %604 : vector<2x256xf32>
    %606 = vector.broadcast %38 : f32 to vector<2x256xf32>
    %607 = arith.mulf %606, %95 : vector<2x256xf32>
    %608 = arith.addf %605, %607 : vector<2x256xf32>
    %609 = vector.broadcast %39 : f32 to vector<2x256xf32>
    %610 = arith.mulf %609, %84 : vector<2x256xf32>
    %611 = arith.addf %608, %610 : vector<2x256xf32>
    %612 = vector.broadcast %40 : f32 to vector<2x256xf32>
    %613 = arith.mulf %612, %90 : vector<2x256xf32>
    %614 = arith.addf %611, %613 : vector<2x256xf32>
    %615 = vector.broadcast %41 : f32 to vector<2x256xf32>
    %616 = arith.mulf %615, %85 : vector<2x256xf32>
    %617 = arith.addf %614, %616 : vector<2x256xf32>
    %618 = vector.broadcast %42 : f32 to vector<2x256xf32>
    %619 = arith.mulf %618, %96 : vector<2x256xf32>
    %620 = arith.addf %617, %619 : vector<2x256xf32>
    %621 = vector.broadcast %43 : f32 to vector<2x256xf32>
    %622 = arith.mulf %621, %102 : vector<2x256xf32>
    %623 = arith.addf %620, %622 : vector<2x256xf32>
    %624 = vector.broadcast %44 : f32 to vector<2x256xf32>
    %625 = arith.mulf %624, %97 : vector<2x256xf32>
    %626 = arith.addf %623, %625 : vector<2x256xf32>
    %627 = arith.maximumf %600, %626 : vector<2x256xf32>
    %628 = vector.broadcast %36 : f32 to vector<2x256xf32>
    %629 = arith.mulf %628, %100 : vector<2x256xf32>
    %630 = vector.broadcast %37 : f32 to vector<2x256xf32>
    %631 = arith.mulf %630, %95 : vector<2x256xf32>
    %632 = arith.addf %629, %631 : vector<2x256xf32>
    %633 = vector.broadcast %38 : f32 to vector<2x256xf32>
    %634 = arith.mulf %633, %101 : vector<2x256xf32>
    %635 = arith.addf %632, %634 : vector<2x256xf32>
    %636 = vector.broadcast %39 : f32 to vector<2x256xf32>
    %637 = arith.mulf %636, %90 : vector<2x256xf32>
    %638 = arith.addf %635, %637 : vector<2x256xf32>
    %639 = vector.broadcast %40 : f32 to vector<2x256xf32>
    %640 = arith.mulf %639, %85 : vector<2x256xf32>
    %641 = arith.addf %638, %640 : vector<2x256xf32>
    %642 = vector.broadcast %41 : f32 to vector<2x256xf32>
    %643 = arith.mulf %642, %91 : vector<2x256xf32>
    %644 = arith.addf %641, %643 : vector<2x256xf32>
    %645 = vector.broadcast %42 : f32 to vector<2x256xf32>
    %646 = arith.mulf %645, %102 : vector<2x256xf32>
    %647 = arith.addf %644, %646 : vector<2x256xf32>
    %648 = vector.broadcast %43 : f32 to vector<2x256xf32>
    %649 = arith.mulf %648, %97 : vector<2x256xf32>
    %650 = arith.addf %647, %649 : vector<2x256xf32>
    %651 = vector.broadcast %44 : f32 to vector<2x256xf32>
    %652 = arith.mulf %651, %103 : vector<2x256xf32>
    %653 = arith.addf %650, %652 : vector<2x256xf32>
    %654 = arith.maximumf %627, %653 : vector<2x256xf32>
    %655 = vector.broadcast %76 : f32 to vector<2x256xf32>
    %656 = arith.addf %654, %655 : vector<2x256xf32>
    %cst_15 = arith.constant 0.000000e+00 : f32
    %657 = vector.broadcast %cst_15 : f32 to vector<2x256xf32>
    %658 = arith.maximumf %656, %657 : vector<2x256xf32>
    %659 = vector.broadcast %45 : f32 to vector<2x256xf32>
    %660 = arith.mulf %659, %82 : vector<2x256xf32>
    %661 = vector.broadcast %46 : f32 to vector<2x256xf32>
    %662 = arith.mulf %661, %88 : vector<2x256xf32>
    %663 = arith.addf %660, %662 : vector<2x256xf32>
    %664 = vector.broadcast %47 : f32 to vector<2x256xf32>
    %665 = arith.mulf %664, %83 : vector<2x256xf32>
    %666 = arith.addf %663, %665 : vector<2x256xf32>
    %667 = vector.broadcast %48 : f32 to vector<2x256xf32>
    %668 = arith.mulf %667, %94 : vector<2x256xf32>
    %669 = arith.addf %666, %668 : vector<2x256xf32>
    %670 = vector.broadcast %49 : f32 to vector<2x256xf32>
    %671 = arith.mulf %670, %100 : vector<2x256xf32>
    %672 = arith.addf %669, %671 : vector<2x256xf32>
    %673 = vector.broadcast %50 : f32 to vector<2x256xf32>
    %674 = arith.mulf %673, %95 : vector<2x256xf32>
    %675 = arith.addf %672, %674 : vector<2x256xf32>
    %676 = vector.broadcast %51 : f32 to vector<2x256xf32>
    %677 = arith.mulf %676, %84 : vector<2x256xf32>
    %678 = arith.addf %675, %677 : vector<2x256xf32>
    %679 = vector.broadcast %52 : f32 to vector<2x256xf32>
    %680 = arith.mulf %679, %90 : vector<2x256xf32>
    %681 = arith.addf %678, %680 : vector<2x256xf32>
    %682 = vector.broadcast %53 : f32 to vector<2x256xf32>
    %683 = arith.mulf %682, %85 : vector<2x256xf32>
    %684 = arith.addf %681, %683 : vector<2x256xf32>
    %685 = vector.broadcast %45 : f32 to vector<2x256xf32>
    %686 = arith.mulf %685, %88 : vector<2x256xf32>
    %687 = vector.broadcast %46 : f32 to vector<2x256xf32>
    %688 = arith.mulf %687, %83 : vector<2x256xf32>
    %689 = arith.addf %686, %688 : vector<2x256xf32>
    %690 = vector.broadcast %47 : f32 to vector<2x256xf32>
    %691 = arith.mulf %690, %89 : vector<2x256xf32>
    %692 = arith.addf %689, %691 : vector<2x256xf32>
    %693 = vector.broadcast %48 : f32 to vector<2x256xf32>
    %694 = arith.mulf %693, %100 : vector<2x256xf32>
    %695 = arith.addf %692, %694 : vector<2x256xf32>
    %696 = vector.broadcast %49 : f32 to vector<2x256xf32>
    %697 = arith.mulf %696, %95 : vector<2x256xf32>
    %698 = arith.addf %695, %697 : vector<2x256xf32>
    %699 = vector.broadcast %50 : f32 to vector<2x256xf32>
    %700 = arith.mulf %699, %101 : vector<2x256xf32>
    %701 = arith.addf %698, %700 : vector<2x256xf32>
    %702 = vector.broadcast %51 : f32 to vector<2x256xf32>
    %703 = arith.mulf %702, %90 : vector<2x256xf32>
    %704 = arith.addf %701, %703 : vector<2x256xf32>
    %705 = vector.broadcast %52 : f32 to vector<2x256xf32>
    %706 = arith.mulf %705, %85 : vector<2x256xf32>
    %707 = arith.addf %704, %706 : vector<2x256xf32>
    %708 = vector.broadcast %53 : f32 to vector<2x256xf32>
    %709 = arith.mulf %708, %91 : vector<2x256xf32>
    %710 = arith.addf %707, %709 : vector<2x256xf32>
    %711 = arith.maximumf %684, %710 : vector<2x256xf32>
    %712 = vector.broadcast %45 : f32 to vector<2x256xf32>
    %713 = arith.mulf %712, %94 : vector<2x256xf32>
    %714 = vector.broadcast %46 : f32 to vector<2x256xf32>
    %715 = arith.mulf %714, %100 : vector<2x256xf32>
    %716 = arith.addf %713, %715 : vector<2x256xf32>
    %717 = vector.broadcast %47 : f32 to vector<2x256xf32>
    %718 = arith.mulf %717, %95 : vector<2x256xf32>
    %719 = arith.addf %716, %718 : vector<2x256xf32>
    %720 = vector.broadcast %48 : f32 to vector<2x256xf32>
    %721 = arith.mulf %720, %84 : vector<2x256xf32>
    %722 = arith.addf %719, %721 : vector<2x256xf32>
    %723 = vector.broadcast %49 : f32 to vector<2x256xf32>
    %724 = arith.mulf %723, %90 : vector<2x256xf32>
    %725 = arith.addf %722, %724 : vector<2x256xf32>
    %726 = vector.broadcast %50 : f32 to vector<2x256xf32>
    %727 = arith.mulf %726, %85 : vector<2x256xf32>
    %728 = arith.addf %725, %727 : vector<2x256xf32>
    %729 = vector.broadcast %51 : f32 to vector<2x256xf32>
    %730 = arith.mulf %729, %96 : vector<2x256xf32>
    %731 = arith.addf %728, %730 : vector<2x256xf32>
    %732 = vector.broadcast %52 : f32 to vector<2x256xf32>
    %733 = arith.mulf %732, %102 : vector<2x256xf32>
    %734 = arith.addf %731, %733 : vector<2x256xf32>
    %735 = vector.broadcast %53 : f32 to vector<2x256xf32>
    %736 = arith.mulf %735, %97 : vector<2x256xf32>
    %737 = arith.addf %734, %736 : vector<2x256xf32>
    %738 = arith.maximumf %711, %737 : vector<2x256xf32>
    %739 = vector.broadcast %45 : f32 to vector<2x256xf32>
    %740 = arith.mulf %739, %100 : vector<2x256xf32>
    %741 = vector.broadcast %46 : f32 to vector<2x256xf32>
    %742 = arith.mulf %741, %95 : vector<2x256xf32>
    %743 = arith.addf %740, %742 : vector<2x256xf32>
    %744 = vector.broadcast %47 : f32 to vector<2x256xf32>
    %745 = arith.mulf %744, %101 : vector<2x256xf32>
    %746 = arith.addf %743, %745 : vector<2x256xf32>
    %747 = vector.broadcast %48 : f32 to vector<2x256xf32>
    %748 = arith.mulf %747, %90 : vector<2x256xf32>
    %749 = arith.addf %746, %748 : vector<2x256xf32>
    %750 = vector.broadcast %49 : f32 to vector<2x256xf32>
    %751 = arith.mulf %750, %85 : vector<2x256xf32>
    %752 = arith.addf %749, %751 : vector<2x256xf32>
    %753 = vector.broadcast %50 : f32 to vector<2x256xf32>
    %754 = arith.mulf %753, %91 : vector<2x256xf32>
    %755 = arith.addf %752, %754 : vector<2x256xf32>
    %756 = vector.broadcast %51 : f32 to vector<2x256xf32>
    %757 = arith.mulf %756, %102 : vector<2x256xf32>
    %758 = arith.addf %755, %757 : vector<2x256xf32>
    %759 = vector.broadcast %52 : f32 to vector<2x256xf32>
    %760 = arith.mulf %759, %97 : vector<2x256xf32>
    %761 = arith.addf %758, %760 : vector<2x256xf32>
    %762 = vector.broadcast %53 : f32 to vector<2x256xf32>
    %763 = arith.mulf %762, %103 : vector<2x256xf32>
    %764 = arith.addf %761, %763 : vector<2x256xf32>
    %765 = arith.maximumf %738, %764 : vector<2x256xf32>
    %766 = vector.broadcast %77 : f32 to vector<2x256xf32>
    %767 = arith.addf %765, %766 : vector<2x256xf32>
    %cst_16 = arith.constant 0.000000e+00 : f32
    %768 = vector.broadcast %cst_16 : f32 to vector<2x256xf32>
    %769 = arith.maximumf %767, %768 : vector<2x256xf32>
    %770 = vector.broadcast %54 : f32 to vector<2x256xf32>
    %771 = arith.mulf %770, %82 : vector<2x256xf32>
    %772 = vector.broadcast %55 : f32 to vector<2x256xf32>
    %773 = arith.mulf %772, %88 : vector<2x256xf32>
    %774 = arith.addf %771, %773 : vector<2x256xf32>
    %775 = vector.broadcast %56 : f32 to vector<2x256xf32>
    %776 = arith.mulf %775, %83 : vector<2x256xf32>
    %777 = arith.addf %774, %776 : vector<2x256xf32>
    %778 = vector.broadcast %57 : f32 to vector<2x256xf32>
    %779 = arith.mulf %778, %94 : vector<2x256xf32>
    %780 = arith.addf %777, %779 : vector<2x256xf32>
    %781 = vector.broadcast %58 : f32 to vector<2x256xf32>
    %782 = arith.mulf %781, %100 : vector<2x256xf32>
    %783 = arith.addf %780, %782 : vector<2x256xf32>
    %784 = vector.broadcast %59 : f32 to vector<2x256xf32>
    %785 = arith.mulf %784, %95 : vector<2x256xf32>
    %786 = arith.addf %783, %785 : vector<2x256xf32>
    %787 = vector.broadcast %60 : f32 to vector<2x256xf32>
    %788 = arith.mulf %787, %84 : vector<2x256xf32>
    %789 = arith.addf %786, %788 : vector<2x256xf32>
    %790 = vector.broadcast %61 : f32 to vector<2x256xf32>
    %791 = arith.mulf %790, %90 : vector<2x256xf32>
    %792 = arith.addf %789, %791 : vector<2x256xf32>
    %793 = vector.broadcast %62 : f32 to vector<2x256xf32>
    %794 = arith.mulf %793, %85 : vector<2x256xf32>
    %795 = arith.addf %792, %794 : vector<2x256xf32>
    %796 = vector.broadcast %54 : f32 to vector<2x256xf32>
    %797 = arith.mulf %796, %88 : vector<2x256xf32>
    %798 = vector.broadcast %55 : f32 to vector<2x256xf32>
    %799 = arith.mulf %798, %83 : vector<2x256xf32>
    %800 = arith.addf %797, %799 : vector<2x256xf32>
    %801 = vector.broadcast %56 : f32 to vector<2x256xf32>
    %802 = arith.mulf %801, %89 : vector<2x256xf32>
    %803 = arith.addf %800, %802 : vector<2x256xf32>
    %804 = vector.broadcast %57 : f32 to vector<2x256xf32>
    %805 = arith.mulf %804, %100 : vector<2x256xf32>
    %806 = arith.addf %803, %805 : vector<2x256xf32>
    %807 = vector.broadcast %58 : f32 to vector<2x256xf32>
    %808 = arith.mulf %807, %95 : vector<2x256xf32>
    %809 = arith.addf %806, %808 : vector<2x256xf32>
    %810 = vector.broadcast %59 : f32 to vector<2x256xf32>
    %811 = arith.mulf %810, %101 : vector<2x256xf32>
    %812 = arith.addf %809, %811 : vector<2x256xf32>
    %813 = vector.broadcast %60 : f32 to vector<2x256xf32>
    %814 = arith.mulf %813, %90 : vector<2x256xf32>
    %815 = arith.addf %812, %814 : vector<2x256xf32>
    %816 = vector.broadcast %61 : f32 to vector<2x256xf32>
    %817 = arith.mulf %816, %85 : vector<2x256xf32>
    %818 = arith.addf %815, %817 : vector<2x256xf32>
    %819 = vector.broadcast %62 : f32 to vector<2x256xf32>
    %820 = arith.mulf %819, %91 : vector<2x256xf32>
    %821 = arith.addf %818, %820 : vector<2x256xf32>
    %822 = arith.maximumf %795, %821 : vector<2x256xf32>
    %823 = vector.broadcast %54 : f32 to vector<2x256xf32>
    %824 = arith.mulf %823, %94 : vector<2x256xf32>
    %825 = vector.broadcast %55 : f32 to vector<2x256xf32>
    %826 = arith.mulf %825, %100 : vector<2x256xf32>
    %827 = arith.addf %824, %826 : vector<2x256xf32>
    %828 = vector.broadcast %56 : f32 to vector<2x256xf32>
    %829 = arith.mulf %828, %95 : vector<2x256xf32>
    %830 = arith.addf %827, %829 : vector<2x256xf32>
    %831 = vector.broadcast %57 : f32 to vector<2x256xf32>
    %832 = arith.mulf %831, %84 : vector<2x256xf32>
    %833 = arith.addf %830, %832 : vector<2x256xf32>
    %834 = vector.broadcast %58 : f32 to vector<2x256xf32>
    %835 = arith.mulf %834, %90 : vector<2x256xf32>
    %836 = arith.addf %833, %835 : vector<2x256xf32>
    %837 = vector.broadcast %59 : f32 to vector<2x256xf32>
    %838 = arith.mulf %837, %85 : vector<2x256xf32>
    %839 = arith.addf %836, %838 : vector<2x256xf32>
    %840 = vector.broadcast %60 : f32 to vector<2x256xf32>
    %841 = arith.mulf %840, %96 : vector<2x256xf32>
    %842 = arith.addf %839, %841 : vector<2x256xf32>
    %843 = vector.broadcast %61 : f32 to vector<2x256xf32>
    %844 = arith.mulf %843, %102 : vector<2x256xf32>
    %845 = arith.addf %842, %844 : vector<2x256xf32>
    %846 = vector.broadcast %62 : f32 to vector<2x256xf32>
    %847 = arith.mulf %846, %97 : vector<2x256xf32>
    %848 = arith.addf %845, %847 : vector<2x256xf32>
    %849 = arith.maximumf %822, %848 : vector<2x256xf32>
    %850 = vector.broadcast %54 : f32 to vector<2x256xf32>
    %851 = arith.mulf %850, %100 : vector<2x256xf32>
    %852 = vector.broadcast %55 : f32 to vector<2x256xf32>
    %853 = arith.mulf %852, %95 : vector<2x256xf32>
    %854 = arith.addf %851, %853 : vector<2x256xf32>
    %855 = vector.broadcast %56 : f32 to vector<2x256xf32>
    %856 = arith.mulf %855, %101 : vector<2x256xf32>
    %857 = arith.addf %854, %856 : vector<2x256xf32>
    %858 = vector.broadcast %57 : f32 to vector<2x256xf32>
    %859 = arith.mulf %858, %90 : vector<2x256xf32>
    %860 = arith.addf %857, %859 : vector<2x256xf32>
    %861 = vector.broadcast %58 : f32 to vector<2x256xf32>
    %862 = arith.mulf %861, %85 : vector<2x256xf32>
    %863 = arith.addf %860, %862 : vector<2x256xf32>
    %864 = vector.broadcast %59 : f32 to vector<2x256xf32>
    %865 = arith.mulf %864, %91 : vector<2x256xf32>
    %866 = arith.addf %863, %865 : vector<2x256xf32>
    %867 = vector.broadcast %60 : f32 to vector<2x256xf32>
    %868 = arith.mulf %867, %102 : vector<2x256xf32>
    %869 = arith.addf %866, %868 : vector<2x256xf32>
    %870 = vector.broadcast %61 : f32 to vector<2x256xf32>
    %871 = arith.mulf %870, %97 : vector<2x256xf32>
    %872 = arith.addf %869, %871 : vector<2x256xf32>
    %873 = vector.broadcast %62 : f32 to vector<2x256xf32>
    %874 = arith.mulf %873, %103 : vector<2x256xf32>
    %875 = arith.addf %872, %874 : vector<2x256xf32>
    %876 = arith.maximumf %849, %875 : vector<2x256xf32>
    %877 = vector.broadcast %78 : f32 to vector<2x256xf32>
    %878 = arith.addf %876, %877 : vector<2x256xf32>
    %cst_17 = arith.constant 0.000000e+00 : f32
    %879 = vector.broadcast %cst_17 : f32 to vector<2x256xf32>
    %880 = arith.maximumf %878, %879 : vector<2x256xf32>
    %881 = vector.broadcast %63 : f32 to vector<2x256xf32>
    %882 = arith.mulf %881, %82 : vector<2x256xf32>
    %883 = vector.broadcast %64 : f32 to vector<2x256xf32>
    %884 = arith.mulf %883, %88 : vector<2x256xf32>
    %885 = arith.addf %882, %884 : vector<2x256xf32>
    %886 = vector.broadcast %65 : f32 to vector<2x256xf32>
    %887 = arith.mulf %886, %83 : vector<2x256xf32>
    %888 = arith.addf %885, %887 : vector<2x256xf32>
    %889 = vector.broadcast %66 : f32 to vector<2x256xf32>
    %890 = arith.mulf %889, %94 : vector<2x256xf32>
    %891 = arith.addf %888, %890 : vector<2x256xf32>
    %892 = vector.broadcast %67 : f32 to vector<2x256xf32>
    %893 = arith.mulf %892, %100 : vector<2x256xf32>
    %894 = arith.addf %891, %893 : vector<2x256xf32>
    %895 = vector.broadcast %68 : f32 to vector<2x256xf32>
    %896 = arith.mulf %895, %95 : vector<2x256xf32>
    %897 = arith.addf %894, %896 : vector<2x256xf32>
    %898 = vector.broadcast %69 : f32 to vector<2x256xf32>
    %899 = arith.mulf %898, %84 : vector<2x256xf32>
    %900 = arith.addf %897, %899 : vector<2x256xf32>
    %901 = vector.broadcast %70 : f32 to vector<2x256xf32>
    %902 = arith.mulf %901, %90 : vector<2x256xf32>
    %903 = arith.addf %900, %902 : vector<2x256xf32>
    %904 = vector.broadcast %71 : f32 to vector<2x256xf32>
    %905 = arith.mulf %904, %85 : vector<2x256xf32>
    %906 = arith.addf %903, %905 : vector<2x256xf32>
    %907 = vector.broadcast %63 : f32 to vector<2x256xf32>
    %908 = arith.mulf %907, %88 : vector<2x256xf32>
    %909 = vector.broadcast %64 : f32 to vector<2x256xf32>
    %910 = arith.mulf %909, %83 : vector<2x256xf32>
    %911 = arith.addf %908, %910 : vector<2x256xf32>
    %912 = vector.broadcast %65 : f32 to vector<2x256xf32>
    %913 = arith.mulf %912, %89 : vector<2x256xf32>
    %914 = arith.addf %911, %913 : vector<2x256xf32>
    %915 = vector.broadcast %66 : f32 to vector<2x256xf32>
    %916 = arith.mulf %915, %100 : vector<2x256xf32>
    %917 = arith.addf %914, %916 : vector<2x256xf32>
    %918 = vector.broadcast %67 : f32 to vector<2x256xf32>
    %919 = arith.mulf %918, %95 : vector<2x256xf32>
    %920 = arith.addf %917, %919 : vector<2x256xf32>
    %921 = vector.broadcast %68 : f32 to vector<2x256xf32>
    %922 = arith.mulf %921, %101 : vector<2x256xf32>
    %923 = arith.addf %920, %922 : vector<2x256xf32>
    %924 = vector.broadcast %69 : f32 to vector<2x256xf32>
    %925 = arith.mulf %924, %90 : vector<2x256xf32>
    %926 = arith.addf %923, %925 : vector<2x256xf32>
    %927 = vector.broadcast %70 : f32 to vector<2x256xf32>
    %928 = arith.mulf %927, %85 : vector<2x256xf32>
    %929 = arith.addf %926, %928 : vector<2x256xf32>
    %930 = vector.broadcast %71 : f32 to vector<2x256xf32>
    %931 = arith.mulf %930, %91 : vector<2x256xf32>
    %932 = arith.addf %929, %931 : vector<2x256xf32>
    %933 = arith.maximumf %906, %932 : vector<2x256xf32>
    %934 = vector.broadcast %63 : f32 to vector<2x256xf32>
    %935 = arith.mulf %934, %94 : vector<2x256xf32>
    %936 = vector.broadcast %64 : f32 to vector<2x256xf32>
    %937 = arith.mulf %936, %100 : vector<2x256xf32>
    %938 = arith.addf %935, %937 : vector<2x256xf32>
    %939 = vector.broadcast %65 : f32 to vector<2x256xf32>
    %940 = arith.mulf %939, %95 : vector<2x256xf32>
    %941 = arith.addf %938, %940 : vector<2x256xf32>
    %942 = vector.broadcast %66 : f32 to vector<2x256xf32>
    %943 = arith.mulf %942, %84 : vector<2x256xf32>
    %944 = arith.addf %941, %943 : vector<2x256xf32>
    %945 = vector.broadcast %67 : f32 to vector<2x256xf32>
    %946 = arith.mulf %945, %90 : vector<2x256xf32>
    %947 = arith.addf %944, %946 : vector<2x256xf32>
    %948 = vector.broadcast %68 : f32 to vector<2x256xf32>
    %949 = arith.mulf %948, %85 : vector<2x256xf32>
    %950 = arith.addf %947, %949 : vector<2x256xf32>
    %951 = vector.broadcast %69 : f32 to vector<2x256xf32>
    %952 = arith.mulf %951, %96 : vector<2x256xf32>
    %953 = arith.addf %950, %952 : vector<2x256xf32>
    %954 = vector.broadcast %70 : f32 to vector<2x256xf32>
    %955 = arith.mulf %954, %102 : vector<2x256xf32>
    %956 = arith.addf %953, %955 : vector<2x256xf32>
    %957 = vector.broadcast %71 : f32 to vector<2x256xf32>
    %958 = arith.mulf %957, %97 : vector<2x256xf32>
    %959 = arith.addf %956, %958 : vector<2x256xf32>
    %960 = arith.maximumf %933, %959 : vector<2x256xf32>
    %961 = vector.broadcast %63 : f32 to vector<2x256xf32>
    %962 = arith.mulf %961, %100 : vector<2x256xf32>
    %963 = vector.broadcast %64 : f32 to vector<2x256xf32>
    %964 = arith.mulf %963, %95 : vector<2x256xf32>
    %965 = arith.addf %962, %964 : vector<2x256xf32>
    %966 = vector.broadcast %65 : f32 to vector<2x256xf32>
    %967 = arith.mulf %966, %101 : vector<2x256xf32>
    %968 = arith.addf %965, %967 : vector<2x256xf32>
    %969 = vector.broadcast %66 : f32 to vector<2x256xf32>
    %970 = arith.mulf %969, %90 : vector<2x256xf32>
    %971 = arith.addf %968, %970 : vector<2x256xf32>
    %972 = vector.broadcast %67 : f32 to vector<2x256xf32>
    %973 = arith.mulf %972, %85 : vector<2x256xf32>
    %974 = arith.addf %971, %973 : vector<2x256xf32>
    %975 = vector.broadcast %68 : f32 to vector<2x256xf32>
    %976 = arith.mulf %975, %91 : vector<2x256xf32>
    %977 = arith.addf %974, %976 : vector<2x256xf32>
    %978 = vector.broadcast %69 : f32 to vector<2x256xf32>
    %979 = arith.mulf %978, %102 : vector<2x256xf32>
    %980 = arith.addf %977, %979 : vector<2x256xf32>
    %981 = vector.broadcast %70 : f32 to vector<2x256xf32>
    %982 = arith.mulf %981, %97 : vector<2x256xf32>
    %983 = arith.addf %980, %982 : vector<2x256xf32>
    %984 = vector.broadcast %71 : f32 to vector<2x256xf32>
    %985 = arith.mulf %984, %103 : vector<2x256xf32>
    %986 = arith.addf %983, %985 : vector<2x256xf32>
    %987 = arith.maximumf %960, %986 : vector<2x256xf32>
    %988 = vector.broadcast %79 : f32 to vector<2x256xf32>
    %989 = arith.addf %987, %988 : vector<2x256xf32>
    %cst_18 = arith.constant 0.000000e+00 : f32
    %990 = vector.broadcast %cst_18 : f32 to vector<2x256xf32>
    %991 = arith.maximumf %989, %990 : vector<2x256xf32>
    %992 = tpu.concatenate %214, %325, %436, %547, %658, %769, %880, %991 in 1 : vector<2x256xf32>, vector<2x256xf32>, vector<2x256xf32>, vector<2x256xf32>, vector<2x256xf32>, vector<2x256xf32>, vector<2x256xf32>, vector<2x256xf32> -> vector<2x2048xf32>
    %c0_19 = arith.constant 0 : index
    %c0_20 = arith.constant 0 : index
    %993 = vector.load %arg2[%c0_19, %c0_20] : memref<2096x32xf32, #tpu.memory_space<vmem>>, vector<2048x32xf32>
    %c2048 = arith.constant 2048 : index
    %c0_21 = arith.constant 0 : index
    %994 = vector.load %arg2[%c2048, %c0_21] : memref<2096x32xf32, #tpu.memory_space<vmem>>, vector<1x32xf32>
    %c2056 = arith.constant 2056 : index
    %c0_22 = arith.constant 0 : index
    %995 = vector.load %arg2[%c2056, %c0_22] : memref<2096x32xf32, #tpu.memory_space<vmem>>, vector<32x32xf32>
    %c2088 = arith.constant 2088 : index
    %c0_23 = arith.constant 0 : index
    %996 = vector.load %arg2[%c2088, %c0_23] : memref<2096x32xf32, #tpu.memory_space<vmem>>, vector<1x32xf32>
    %cst_24 = arith.constant dense<0.000000e+00> : vector<2x32xf32>
    %997 = tpu.matmul %992, %993, %cst_24 {dimension_numbers = #tpu.dot_dimension_numbers<[1], [0], [0], [1], [0, 0, 1, 1], [], []>} : vector<2x2048xf32>, vector<2048x32xf32>, vector<2x32xf32> -> vector<2x32xf32>
    %998 = vector.broadcast %994 : vector<1x32xf32> to vector<2x32xf32>
    %999 = arith.addf %997, %998 : vector<2x32xf32>
    %cst_25 = arith.constant 0.000000e+00 : f32
    %1000 = vector.broadcast %cst_25 : f32 to vector<2x32xf32>
    %1001 = arith.maximumf %999, %1000 : vector<2x32xf32>
    %cst_26 = arith.constant dense<0.000000e+00> : vector<2x32xf32>
    %1002 = tpu.matmul %1001, %995, %cst_26 {dimension_numbers = #tpu.dot_dimension_numbers<[1], [0], [0], [1], [0, 0, 1, 1], [], []>} : vector<2x32xf32>, vector<32x32xf32>, vector<2x32xf32> -> vector<2x32xf32>
    %1003 = vector.broadcast %996 : vector<1x32xf32> to vector<2x32xf32>
    %1004 = arith.addf %1002, %1003 : vector<2x32xf32>
    %1005 = vector.extract_strided_slice %1004 {offsets = [0, 0], sizes = [2, 10], strides = [1, 1]} : vector<2x32xf32> to vector<2x10xf32>
    %c0_27 = arith.constant 0 : index
    %c0_28 = arith.constant 0 : index
    %1006 = vector.load %arg3[%c0_27, %c0_28] : memref<2x10xf32, #tpu.memory_space<vmem>>, vector<2x10xf32>
    tpu.vector_store %arg3[%c0_27, %c0_28], %1005 {strides = array<i32>} : memref<2x10xf32, #tpu.memory_space<vmem>>, vector<2x10xf32>,
    return
  }
}

</mosaic_0001>

<bundles_post_ra>
// kernel: mnist_classifier_forward.1
= control target key start
LH: loop header
LB: loop body
LE: loop exit
PB: predicated region body
PF: predicated region fallthrough
CT: control target
= control target key end

     0   :  { %8 = vsyncpa [#allocation4], 0  ;;  %s6779_s0 = inlined_call_operand.vmem [shape: f32[4,2,384], index: 0, kind: input, shape index: {}]   ;;  %s6780_s1 = inlined_call_operand.vmem [shape: f32[80], index: 1, kind: input, shape index: {}]   ;;  %s6781_s2 = inlined_call_operand.vmem [shape: f32[2096,32], index: 2, kind: input, shape index: {}]   ;;  %s6782_s3 = inlined_call_operand.hbm [shape: f32[2,10], index: 3, kind: output, shape index: {}]  }
   0x1   :  { %9 = vsyncpa [#allocation3], 0  ;;  %s18_s14 = sshll.u32 %s6780_s1, 4  ;;  %s19_s14 = int_to_ptr.vmem [resolvable:$true] %s18_s14 }
   0x2   :  { %s3752_s15 = scalar_lea.vmem %s19_s14, 16  ;;  %p3757_p1 = scmp.lt.s32.totalorder %s19_s14, %s19_s14 }
   0x3   :  { %p3753_p0 = scmp.ne.s32.totalorder %s19_s14, %s3752_s15  ;;  %p3758_p2 = scmp.lt.s32.totalorder %s3752_s15, %s3752_s15 }
   0x5   :  { %p3759_p3 = por %p3758_p2, %p3757_p1 }
   0x7   :  { %p3760_p4 = pnand %p3759_p3, %p3753_p0 }
   0x9   :  { %3763 = shalt.err (!%p3760_p4)
}
   0xa   :  { %s3790_s16 = smov [#allocation2]  }
   0xb   :  { %21 = dma.vmem_to_smem %s19_s14, 16, %s3790_s16, [#allocation4]  }
   0xc   :  { %3786 = dma.done.wait [#allocation4], 16  }
   0xd   :  { %3787 = vsyncadd [#allocation4], 4294967280 }
   0xe   :  { %27 = sfence }
   0xf   :  { %s3089_s17 = sld [smem:[#allocation2 + $0x2]]  ;;  %s3088_s18 = sld [smem:[#allocation2 + $0x1]]  ;;  %v3825_v0 = vld [vmem:[%s6779_s0 + $0x6] sm:$0x3f]  ;;  %v3830_v1 = vld [vmem:[%s6779_s0] sm:$0x3f] }
  0x10   :  { %s3097_s19 = sld [smem:[#allocation2 + $0xa]]  ;;  %s3098_s23 = sld [smem:[#allocation2 + $0xb]]  ;;  %v3847_v9 = vld [vmem:[%s6779_s0 + $0xc] sm:$0x3f]  ;;  %v3871_v19 = vld [vmem:[%s6779_s0 + $0x12] sm:$0x3f] }
  0x11   :  { %s3791_s24 = smov 127   ;;  %s3090_s27 = sld [smem:[#allocation2 + $0x3]]  ;;  %v2182_v56 = vld [vmem:[%s6781_s2 + $0x80] sm:$0xff]  ;;  %v2183_v57 = vld [vmem:[%s6781_s2 + $0x88] sm:$0xff]  ;;  %vm126_vm0 = vcmask 1039360   ;;  %vm151_vm1 = vcmask 924672  }
  0x12   :  { %s3091_s28 = sld [smem:[#allocation2 + $0x4]]  ;;  %s3092_s29 = sld [smem:[#allocation2 + $0x5]]  ;;  %v3469_v58 = vpack.c.bf16 %v2183_v57, %v2182_v56  ;;  %v2166_v59 = vld [vmem:[%s6781_s2] sm:$0xff]  ;;  %v2167_v60 = vld [vmem:[%s6781_s2 + $0x8] sm:$0xff]  ;;  %vm170_vm2 = vcmask 916480   ;;  %vm3796_vm3 = vmmov 0  }
  0x13   :  { %s3792_s5 = smov 113   ;;  %s3100_s6 = sld [smem:[#allocation2 + $0xd]]  ;;  %v3471_v61 = vpack.c.bf16 %v2167_v60, %v2166_v59  ;;  %v2191_v57 = vld [vmem:[%s6781_s2 + $0xc8] sm:$0xff]  ;;  %v2174_v59 = vld [vmem:[%s6781_s2 + $0x40] sm:$0xff]  ;;  %vm2997_vm4 = vcmask 261120   ;;  %vm3071_vm5 = vcmask 74752  }
  0x14   :  { %s3099_s7 = sld [smem:[#allocation2 + $0xc]]  ;;  %s3093_s8 = sld [smem:[#allocation2 + $0x6]]  ;;  %3470 = vmatprep.subr.bf16.mxu0 %v3469_v58  ;;  %v2175_v60 = vld [vmem:[%s6781_s2 + $0x48] sm:$0xff] }
  0x15   :  { %v120_v2 = vstv %s3089_s17  ;;  %v3833_v4 = vstv %s3088_s18  ;;  %s3101_s9 = sld [smem:[#allocation2 + $0xe]]  ;;  %s3094_s10 = sld [smem:[#allocation2 + $0x7]]  ;;  %3472 = vmatpush3.bf16.msra.mxu0 %v3471_v61  ;;  %v3487_v61 = vpack.c.bf16 %v2175_v60, %v2174_v59 }
  0x16   :  { %v183_v3 = vmul.f32 %v3825_v0, %v120_v2  ;;  %v3835_v5 = vstv %s3097_s19  ;;  %v175_v6 = vmul.f32 %v3833_v4, %v3830_v1  ;;  %v121_v8 = vmul.f32 %v120_v2, %v3830_v1  ;;  %s3793_s11 = smov 112   ;;  %s3102_s12 = sld [smem:[#allocation2 + $0xf]] }
  0x17   :  { %v420_v7 = vmul.f32 %v3835_v5, %v3830_v1  ;;  %v295_v10 = vmul.f32 %v3847_v9, %v3833_v4  ;;  %v237_v11 = vmul.f32 %v3847_v9, %v120_v2  ;;  %v368_v12 = vstv %s3098_s23  ;;  %s3095_s13 = sld [smem:[#allocation2 + $0x8]]  ;;  %s4133_s30 = sld [smem:[#allocation2 + $0x14]] }
  0x18   :  { %185 = vrot.lane.b32.xlu1 %v183_v3, %s3791_s24  ;;  %177 = vrot.lane.b32.xlu0 %v175_v6, %s3791_s24  ;;  %v428_v13 = vmul.f32 %v3825_v0, %v368_v12  ;;  %v369_v14 = vmul.f32 %v368_v12, %v3830_v1  ;;  %v3858_v15 = vstv %s3090_s27  ;;  %v3860_v16 = vstv %s3091_s28  ;;  %s3103_s14 = sld [smem:[#allocation2 + $0x10]]  ;;  %s4167_s22 = sld [smem:[#allocation2 + $0x1c]] }
  0x19   :  { %v245_v17 = vmul.f32 %v3858_v15, %v3830_v1  ;;  %v193_v18 = vmul.f32 %v3847_v9, %v3860_v16  ;;  %v482_v20 = vmul.f32 %v3847_v9, %v368_v12  ;;  %v303_v21 = vmul.f32 %v3871_v19, %v120_v2  ;;  %v2184_v3 = vld [vmem:[%s6781_s2 + $0x90] sm:$0xff]  ;;  %v2185_v6 = vld [vmem:[%s6781_s2 + $0x98] sm:$0xff]  ;;  %s3116_s23 = sld [smem:[#allocation2 + $0x1d]]  ;;  %s28_s25 = sld [smem:[#allocation2]] }
  0x1a   :  { %v136_v22 = vstv %s3092_s29  ;;  %v540_v24 = vmul.f32 %v3847_v9, %v3835_v5  ;;  %v253_v25 = vmul.f32 %v3825_v0, %v3860_v16  ;;  %v3887_v27 = vstv %s3100_s6  ;;  %s3108_s26 = sld [smem:[#allocation2 + $0x15]]  ;;  %s3109_s27 = sld [smem:[#allocation2 + $0x16]] }
  0x1b   :  { %v137_v23 = vmul.f32 %v3847_v9, %v136_v22  ;;  %v201_v26 = vmul.f32 %v3871_v19, %v136_v22  ;;  %v438_v28 = vmul.f32 %v3847_v9, %v3887_v27  ;;  %v311_v29 = vmul.f32 %v3825_v0, %v3858_v15  ;;  %s3110_s28 = sld [smem:[#allocation2 + $0x17]]  ;;  %s3111_s4 = sld [smem:[#allocation2 + $0x18]] }
  0x1c   :  { %422 = vrot.lane.b32.xlu1 %v420_v7, %s3791_s24  ;;  %123 = vrot.lane.b32.xlu0 %v121_v8, %s3791_s24  ;;  %v3895_v30 = vstv %s3099_s7  ;;  %v548_v31 = vmul.f32 %v3871_v19, %v368_v12  ;;  %v145_v33 = vstv %s3093_s8  ;;  %v319_v36 = vmul.f32 %v3860_v16, %v3830_v1  ;;  %s4141_s8 = sld [smem:[#allocation2 + $0x13]]  ;;  %s3118_s29 = sld [smem:[#allocation2 + $0x1f]] }
  0x1d   :  { %v490_v32 = vmul.f32 %v3895_v30, %v3830_v1  ;;  %v209_v34 = vmul.f32 %v3825_v0, %v145_v33  ;;  %v146_v35 = vmul.f32 %v145_v33, %v3830_v1  ;;  %v261_v37 = vmul.f32 %v136_v22, %v3830_v1  ;;  %v2168_v8 = vld [vmem:[%s6781_s2 + $0x10] sm:$0xff]  ;;  %v2214_v12 = vld [vmem:[%s6781_s2 + $0x180] sm:$0xff]  ;;  %s3119_s6 = sld [smem:[#allocation2 + $0x20]]  ;;  %s3112_s7 = sld [smem:[#allocation2 + $0x19]] }
  0x1e   :  { %v3911_v38 = vstv %s3101_s9  ;;  %v556_v41 = vmul.f32 %v3825_v0, %v3895_v30  ;;  %v498_v42 = vmul.f32 %v3825_v0, %v3887_v27  ;;  %v3925_v43 = vstv %s3094_s10  ;;  %s3120_s9 = sld [smem:[#allocation2 + $0x21]]  ;;  %s3113_s10 = sld [smem:[#allocation2 + $0x1a]] }
  0x1f   :  { %v446_v39 = vmul.f32 %v3871_v19, %v3911_v38  ;;  %v384_v40 = vmul.f32 %v3847_v9, %v3911_v38  ;;  %v217_v44 = vmul.f32 %v3925_v43, %v3830_v1  ;;  %v156_v45 = vmul.f32 %v3825_v0, %v3925_v43  ;;  %s4464_s15 = sld [smem:[#allocation2 + $0x26]]  ;;  %s4473_s16 = sld [smem:[#allocation2 + $0x25]] }
  0x20   :  { %297 = vrot.lane.b32.xlu1 %v295_v10, %s3791_s24  ;;  %239 = vrot.lane.b32.xlu0 %v237_v11, %s3791_s24  ;;  %v327_v46 = vmul.f32 %v3825_v0, %v136_v22  ;;  %v269_v47 = vmul.f32 %v3847_v9, %v145_v33  ;;  %v3937_v48 = vstv %s3102_s12  ;;  %v564_v51 = vmul.f32 %v3887_v27, %v3830_v1  ;;  %v2169_v10 = vld [vmem:[%s6781_s2 + $0x18] sm:$0xff]  ;;  %s3121_s12 = sld [smem:[#allocation2 + $0x22]]  ;;  %s3114_s18 = sld [smem:[#allocation2 + $0x1b]] }
  0x21   :  { %v454_v49 = vmul.f32 %v3825_v0, %v3937_v48  ;;  %v393_v50 = vmul.f32 %v3937_v48, %v3830_v1  ;;  %v506_v52 = vmul.f32 %v3911_v38, %v3830_v1  ;;  %v3951_v53 = vstv %s3095_s13  ;;  %s4411_s13 = sld [smem:[#allocation2 + $0x23]]  ;;  %s4945_s20 = sld [smem:[#allocation2 + $0x2a]] }
  0x22   :  { %v225_v54 = vmul.f32 %v3825_v0, %v3951_v53  ;;  %v165_v55 = vmul.f32 %v3951_v53, %v3830_v1  ;;  %v335_v62 = vmul.f32 %v3871_v19, %v145_v33  ;;  %v277_v63 = vmul.f32 %v3871_v19, %v3925_v43  ;;  %s3138_s19 = sld [smem:[#allocation2 + $0x33]]  ;;  %s5196_s21 = sld [smem:[#allocation2 + $0x38]] }
  0x23   :  { %v3976_v2 = vstv %s3103_s14  ;;  %v3473_v7 = vpack.c.bf16 %v2185_v6, %v2184_v3  ;;  %v3475_v11 = vpack.c.bf16 %v2169_v10, %v2168_v8  ;;  %s4008_s14 = sld [smem:[#allocation2 + $0x11]]  ;;  %v572_v33 = vmul.f32 %v3825_v0, %v3911_v38  ;;  %v2188_v38 = vld [vmem:[%s6781_s2 + $0xb0] sm:$0xff]  ;;  %v2205_v8 = vld [vmem:[%s6781_s2 + $0x138] sm:$0xff]  ;;  %s5224_s1 = sld [smem:[#allocation2 + $0x37]] }
  0x24   :  { %430 = vrot.lane.b32.xlu1 %v428_v13, %s3791_s24  ;;  %371 = vrot.lane.b32.xlu0 %v369_v14, %s3791_s24  ;;  %v2215_v13 = vld [vmem:[%s6781_s2 + $0x188] sm:$0xff]  ;;  %v462_v14 = vmul.f32 %v3976_v2, %v3830_v1  ;;  %v4200_v59 = vstv %s4133_s30  ;;  %s4568_s30 = sld [smem:[#allocation2 + $0x2e]] }
  0x25   :  { %3474 = vmatprep.subr.bf16.mxu0 %v3473_v7  ;;  %v2204_v7 = vld [vmem:[%s6781_s2 + $0x130] sm:$0xff]  ;;  %v4203_v60 = vstv %s4141_s8  ;;  %s5139_s8 = sld [smem:[#allocation2 + $0x34]] }
  0x26   :  { %3476 = vmatpush3.bf16.msra.mxu0 %v3475_v11  ;;  %v3515_v11 = vpack.c.bf16 %v2205_v8, %v2204_v7  ;;  %6838 = vst [vmem:[#allocation8_spill] sm:$0xff] %v4203_v60  ;;  %v665_v7 = vmul.f32 %v4203_v60, %v3830_v1  ;;  %v4224_v8 = vstv %s4167_s22  ;;  %s3096_s22 = sld [smem:[#allocation2 + $0x9]] }
  0x27   :  { %6839 = vst [vmem:[#allocation9_spill] sm:$0xff] %v4224_v8 }
  0x28   :  { %247 = vrot.lane.b32.xlu1 %v245_v17, %s3792_s5  ;;  %195 = vrot.lane.b32.xlu0 %v193_v18, %s3791_s24  ;;  %v3501_v17 = vpack.c.bf16 %v2215_v13, %v2214_v12  ;;  %v2198_v18 = vld [vmem:[%s6781_s2 + $0x100] sm:$0xff]  ;;  %v2192_v12 = vld [vmem:[%s6781_s2 + $0xd0] sm:$0xff] }
  0x29   :  { %v2193_v13 = vld [vmem:[%s6781_s2 + $0xd8] sm:$0xff] }
  0x2a   :  { %3502 = vmatprep.subr.bf16.mxu1 %v3501_v17  ;;  %v2176_v17 = vld [vmem:[%s6781_s2 + $0x50] sm:$0xff] }
  0x2c   :  { %484 = vrot.lane.b32.xlu1 %v482_v20, %s3791_s24  ;;  %305 = vrot.lane.b32.xlu0 %v303_v21, %s3791_s24  ;;  %v2199_v20 = vld [vmem:[%s6781_s2 + $0x108] sm:$0xff]  ;;  %v402_v21 = vmul.f32 %v3825_v0, %v3976_v2 }
  0x2d   :  { %v3503_v22 = vpack.c.bf16 %v2199_v20, %v2198_v18  ;;  %v2177_v18 = vld [vmem:[%s6781_s2 + $0x58] sm:$0xff] }
  0x2e   :  { %v3491_v20 = vpack.c.bf16 %v2177_v18, %v2176_v17  ;;  %v4238_v17 = vstv %s3116_s23  ;;  %s3156_s23 = sld [smem:[#allocation2 + $0x45]] }
  0x2f   :  { %3504 = vmatpush3.bf16.msra.mxu1 %v3503_v22  ;;  %v2223_v22 = vld [vmem:[%s6781_s2 + $0x1c8] sm:$0xff] }
  0x30   :  { %139 = vrot.lane.b32.xlu1 %v137_v23, %s3791_s24  ;;  %542 = vrot.lane.b32.xlu0 %v540_v24, %s3791_s24  ;;  %v2186_v23 = vld [vmem:[%s6781_s2 + $0xa0] sm:$0xff]  ;;  %v2187_v24 = vld [vmem:[%s6781_s2 + $0xa8] sm:$0xff] }
  0x34   :  { %255 = vrot.lane.b32.xlu1 %v253_v25, %s3792_s5  ;;  %203 = vrot.lane.b32.xlu0 %v201_v26, %s3791_s24  ;;  %v3477_v25 = vpack.c.bf16 %v2187_v24, %v2186_v23  ;;  %v2170_v26 = vld [vmem:[%s6781_s2 + $0x20] sm:$0xff]  ;;  %v580_v23 = vmul.f32 %v3871_v19, %v3937_v48 }
  0x36   :  { %3478 = vmatprep.subr.bf16.mxu0 %v3477_v25  ;;  %v2206_v25 = vld [vmem:[%s6781_s2 + $0x140] sm:$0xff] }
  0x38   :  { %440 = vrot.lane.b32.xlu1 %v438_v28, %s3791_s24  ;;  %313 = vrot.lane.b32.xlu0 %v311_v29, %s3792_s5  ;;  %v2171_v28 = vld [vmem:[%s6781_s2 + $0x28] sm:$0xff] }
  0x39   :  { %v3479_v29 = vpack.c.bf16 %v2171_v28, %v2170_v26  ;;  %v2207_v26 = vld [vmem:[%s6781_s2 + $0x148] sm:$0xff]  ;;  %v522_v28 = vmul.f32 %v3871_v19, %v3976_v2 }
  0x3b   :  { %3480 = vmatpush3.bf16.msra.mxu0 %v3479_v29  ;;  %v3519_v29 = vpack.c.bf16 %v2207_v26, %v2206_v25  ;;  %v859_v25 = vmul.f32 %v4238_v17, %v3830_v1  ;;  %v4256_v26 = vstv %s3108_s26  ;;  %s5740_s26 = sld [smem:[#allocation2 + $0x3c]] }
  0x3c   :  { %550 = vrot.lane.b32.xlu1 %v548_v31, %s3791_s24  ;;  %492 = vrot.lane.b32.xlu0 %v490_v32, %s3792_s5  ;;  %v2216_v31 = vld [vmem:[%s6781_s2 + $0x190] sm:$0xff]  ;;  %v2217_v32 = vld [vmem:[%s6781_s2 + $0x198] sm:$0xff]  ;;  %6840 = vst [vmem:[#allocation10_spill] sm:$0xff] %v4256_v26 }
  0x40   :  { %211 = vrot.lane.b32.xlu1 %v209_v34, %s3792_s5  ;;  %148 = vrot.lane.b32.xlu0 %v146_v35, %s3792_s5  ;;  %v3505_v34 = vpack.c.bf16 %v2217_v32, %v2216_v31  ;;  %v2200_v35 = vld [vmem:[%s6781_s2 + $0x110] sm:$0xff]  ;;  %v2195_v31 = vld [vmem:[%s6781_s2 + $0xe8] sm:$0xff] }
  0x42   :  { %3506 = vmatprep.subr.bf16.mxu1 %v3505_v34  ;;  %v2179_v34 = vld [vmem:[%s6781_s2 + $0x68] sm:$0xff] }
  0x44   :  { %321 = vrot.lane.b32.xlu1 %v319_v36, %s3793_s11  ;;  %263 = vrot.lane.b32.xlu0 %v261_v37, %s3793_s11  ;;  %v2201_v36 = vld [vmem:[%s6781_s2 + $0x118] sm:$0xff]  ;;  %v514_v37 = vmul.f32 %v3847_v9, %v3937_v48  ;;  %v2194_v48 = vld [vmem:[%s6781_s2 + $0xe0] sm:$0xff] }
  0x45   :  { %v3493_v32 = vpack.c.bf16 %v2195_v31, %v2194_v48 }
  0x48   :  { %448 = vrot.lane.b32.xlu1 %v446_v39, %s3791_s24  ;;  %386 = vrot.lane.b32.xlu0 %v384_v40, %s3791_s24  ;;  %v3507_v39 = vpack.c.bf16 %v2201_v36, %v2200_v35  ;;  %v2189_v40 = vld [vmem:[%s6781_s2 + $0xb8] sm:$0xff]  ;;  %v2224_v36 = vld [vmem:[%s6781_s2 + $0x1d0] sm:$0xff] }
  0x4a   :  { %3508 = vmatpush3.bf16.msra.mxu1 %v3507_v39 }
  0x4c   :  { %558 = vrot.lane.b32.xlu1 %v556_v41, %s3792_s5  ;;  %500 = vrot.lane.b32.xlu0 %v498_v42, %s3792_s5  ;;  %v3481_v41 = vpack.c.bf16 %v2189_v40, %v2188_v38  ;;  %v2172_v42 = vld [vmem:[%s6781_s2 + $0x30] sm:$0xff] }
  0x4d   :  { %v2208_v40 = vld [vmem:[%s6781_s2 + $0x150] sm:$0xff] }
  0x4e   :  { %3482 = vmatprep.subr.bf16.mxu0 %v3481_v41  ;;  %v2209_v41 = vld [vmem:[%s6781_s2 + $0x158] sm:$0xff] }
  0x50   :  { %219 = vrot.lane.b32.xlu1 %v217_v44, %s3793_s11  ;;  %158 = vrot.lane.b32.xlu0 %v156_v45, %s3792_s5  ;;  %v2173_v44 = vld [vmem:[%s6781_s2 + $0x38] sm:$0xff] }
  0x51   :  { %v3483_v45 = vpack.c.bf16 %v2173_v44, %v2172_v42  ;;  %v351_v42 = vmul.f32 %v3871_v19, %v3951_v53  ;;  %v2196_v44 = vld [vmem:[%s6781_s2 + $0xf0] sm:$0xff] }
  0x53   :  { %3484 = vmatpush3.bf16.msra.mxu0 %v3483_v45  ;;  %v2197_v45 = vld [vmem:[%s6781_s2 + $0xf8] sm:$0xff] }
  0x54   :  { %329 = vrot.lane.b32.xlu1 %v327_v46, %s3793_s11  ;;  %271 = vrot.lane.b32.xlu0 %v269_v47, %s3792_s5  ;;  %v2218_v46 = vld [vmem:[%s6781_s2 + $0x1a0] sm:$0xff]  ;;  %v2219_v47 = vld [vmem:[%s6781_s2 + $0x1a8] sm:$0xff] }
  0x58   :  { %456 = vrot.lane.b32.xlu1 %v454_v49, %s3792_s5  ;;  %395 = vrot.lane.b32.xlu0 %v393_v50, %s3792_s5  ;;  %v343_v49 = vmul.f32 %v3847_v9, %v3925_v43  ;;  %v3509_v50 = vpack.c.bf16 %v2219_v47, %v2218_v46  ;;  %v2190_v43 = vld [vmem:[%s6781_s2 + $0xc0] sm:$0xff]  ;;  %v3523_v46 = vpack.c.bf16 %v2209_v41, %v2208_v40 }
  0x59   :  { %v3485_v58 = vpack.c.bf16 %v2191_v57, %v2190_v43  ;;  %v3497_v47 = vpack.c.bf16 %v2197_v45, %v2196_v44  ;;  %v2210_v43 = vld [vmem:[%s6781_s2 + $0x160] sm:$0xff]  ;;  %v2211_v57 = vld [vmem:[%s6781_s2 + $0x168] sm:$0xff]  ;;  %v134_v44 = vmul.f32 %v3871_v19, %v3860_v16  ;;  %v972_v45 = vmul.f32 %v3847_v9, %v4238_v17 }
  0x5a   :  { %3510 = vmatprep.subr.bf16.mxu1 %v3509_v50 }
  0x5b   :  { %3486 = vmatprep.subr.bf16.mxu0 %v3485_v58  ;;  %v588_v58 = vmul.f32 %v3847_v9, %v3976_v2  ;;  %v614_v2 = vmul.f32 %v4200_v59, %v3830_v1 }
  0x5c   :  { %566 = vrot.lane.b32.xlu1 %v564_v51, %s3793_s11  ;;  %508 = vrot.lane.b32.xlu0 %v506_v52, %s3793_s11  ;;  %v2202_v51 = vld [vmem:[%s6781_s2 + $0x120] sm:$0xff]  ;;  %v2203_v52 = vld [vmem:[%s6781_s2 + $0x128] sm:$0xff] }
  0x5d   :  { %v3511_v56 = vpack.c.bf16 %v2203_v52, %v2202_v51  ;;  %3488 = vmatpush3.bf16.msra.mxu0 %v3487_v61  ;;  %v2226_v51 = vld [vmem:[%s6781_s2 + $0x1e0] sm:$0xff]  ;;  %v2227_v52 = vld [vmem:[%s6781_s2 + $0x1e8] sm:$0xff]  ;;  %v2228_v61 = vld [vmem:[%s6781_s2 + $0x1f0] sm:$0xff] }
  0x5f   :  { %3512 = vmatpush3.bf16.msra.mxu1 %v3511_v56  ;;  %v3525_v56 = vpack.c.bf16 %v2227_v52, %v2226_v51 }
  0x60   :  { %227 = vrot.lane.b32.xlu1 %v225_v54, %s3793_s11  ;;  %167 = vrot.lane.b32.xlu0 %v165_v55, %s3793_s11  ;;  %v285_v54 = vmul.f32 %v3847_v9, %v3951_v53  ;;  %v4071_v55 = vstv %s4008_s14  ;;  %v2181_v53 = vld [vmem:[%s6781_s2 + $0x78] sm:$0xff]  ;;  %s3117_s14 = sld [smem:[#allocation2 + $0x1e]] }
  0x61   :  { %v470_v3 = vmul.f32 %v3825_v0, %v4071_v55  ;;  %v411_v10 = vmul.f32 %v4071_v55, %v3830_v1  ;;  %v530_v39 = vmul.f32 %v3847_v9, %v4071_v55 }
  0x64   :  { %337 = vrot.lane.b32.xlu1 %v335_v62, %s3792_s5  ;;  %279 = vrot.lane.b32.xlu0 %v277_v63, %s3792_s5  ;;  %v2220_v62 = vld [vmem:[%s6781_s2 + $0x1b0] sm:$0xff]  ;;  %v2221_v63 = vld [vmem:[%s6781_s2 + $0x1b8] sm:$0xff] }
  0x65   :  { %v3513_v6 = vpack.c.bf16 %v2221_v63, %v2220_v62  ;;  %v2229_v62 = vld [vmem:[%s6781_s2 + $0x1f8] sm:$0xff] }
  0x66   :  { %v3529_v63 = vpack.c.bf16 %v2229_v62, %v2228_v61  ;;  %v381_v61 = vmul.f32 %v3871_v19, %v3887_v27 }
  0x67   :  { %3514 = vmatprep.subr.bf16.mxu1 %v3513_v6  ;;  %v2213_v6 = vld [vmem:[%s6781_s2 + $0x178] sm:$0xff] }
  0x68   :  { %464 = vrot.lane.b32.xlu1 %v462_v14, %s3793_s11  ;;  %404 = vrot.lane.b32.xlu0 %v402_v21, %s3792_s5  ;;  %v3489_v14 = vpack.c.bf16 %v2193_v13, %v2192_v12  ;;  %v2222_v21 = vld [vmem:[%s6781_s2 + $0x1c0] sm:$0xff]  ;;  %v673_v12 = vmul.f32 %v3825_v0, %v4200_v59  ;;  %v785_v13 = vmul.f32 %v3847_v9, %v4203_v60 }
  0x69   :  { %3516 = vmatpush3.bf16.msra.mxu1 %v3515_v11  ;;  %v3517_v24 = vpack.c.bf16 %v2223_v22, %v2222_v21  ;;  %v910_v11 = vmul.f32 %v4224_v8, %v3830_v1 }
  0x6a   :  { %3490 = vmatprep.subr.bf16.mxu0 %v3489_v14  ;;  %v727_v14 = vmul.f32 %v3847_v9, %v4200_v59 }
  0x6b   :  { %3492 = vmatpush3.bf16.msra.mxu0 %v3491_v20  ;;  %3518 = vmatprep.subr.bf16.mxu1 %v3517_v24  ;;  %v4242_v20 = vstv %s28_s25  ;;  %v918_v24 = vmul.f32 %v3825_v0, %v4238_v17  ;;  %s3132_s25 = sld [smem:[#allocation2 + $0x2d]] }
  0x6c   :  { %574 = vrot.lane.b32.xlu1 %v572_v33, %s3793_s11  ;;  %516 = vrot.lane.b32.xlu0 %v514_v37, %s3792_s5  ;;  %v2178_v33 = vld [vmem:[%s6781_s2 + $0x60] sm:$0xff]  ;;  %v2225_v37 = vld [vmem:[%s6781_s2 + $0x1d8] sm:$0xff]  ;;  %v116_v22 = vmul.f32 %v4242_v20, %v3830_v1 }
  0x6d   :  { %3520 = vmatpush3.bf16.msra.mxu1 %v3519_v29  ;;  %v3495_v35 = vpack.c.bf16 %v2179_v34, %v2178_v33  ;;  %3494 = vmatprep.subr.bf16.mxu0 %v3493_v32  ;;  %v3521_v38 = vpack.c.bf16 %v2225_v37, %v2224_v36  ;;  %v4260_v29 = vstv %s3109_s27  ;;  %v735_v33 = vmul.f32 %v4256_v26, %v3830_v1  ;;  %s4727_s27 = sld [smem:[#allocation2 + $0x48]] }
  0x6e   :  { %6841 = vst [vmem:[#allocation11_spill] sm:$0xff] %v4260_v29  ;;  %v131_v34 = vmul.f32 %v3847_v9, %v3858_v15  ;;  %v4270_v36 = vstv %s3096_s22  ;;  %v743_v62 = vmul.f32 %v3825_v0, %v4260_v29  ;;  %s4742_s22 = sld [smem:[#allocation2 + $0x2f]] }
  0x6f   :  { %3496 = vmatpush3.bf16.msra.mxu0 %v3495_v35  ;;  %3522 = vmatprep.subr.bf16.mxu1 %v3521_v38  ;;  %v683_v35 = vmul.f32 %v3847_v9, %v4260_v29  ;;  %v364_v41 = vmul.f32 %v4270_v36, %v3830_v1 }
  0x70   :  { %345 = vrot.lane.b32.xlu1 %v343_v49, %s3793_s11  ;;  %287 = vrot.lane.b32.xlu0 %v285_v54, %s3793_s11  ;;  %v2180_v49 = vld [vmem:[%s6781_s2 + $0x70] sm:$0xff]  ;;  %v596_v54 = vmul.f32 %v3871_v19, %v4071_v55  ;;  %v3527_v55 = vpack.c.bf16 %v2211_v57, %v2210_v43  ;;  %v1030_v43 = vmul.f32 %v3847_v9, %v4224_v8  ;;  %v2247_v8 = vld [vmem:[%s6781_s2 + $0x288] sm:$0xff] }
  0x71   :  { %v3499_v50 = vpack.c.bf16 %v2181_v53, %v2180_v49  ;;  %3524 = vmatpush3.bf16.msra.mxu1 %v3523_v46  ;;  %3498 = vmatprep.subr.bf16.mxu0 %v3497_v47  ;;  %v793_v47 = vmul.f32 %v3871_v19, %v4200_v59  ;;  %v4289_v49 = vstv %s3110_s28  ;;  %s5992_s28 = sld [smem:[#allocation2 + $0x47]] }
  0x72   :  { %3526 = vmatprep.subr.bf16.mxu1 %v3525_v56  ;;  %v378_v56 = vmul.f32 %v3847_v9, %v3895_v30 }
  0x73   :  { %3500 = vmatpush3.bf16.msra.mxu0 %v3499_v50 }
  0x74   :  { %472 = vrot.lane.b32.xlu1 %v470_v3, %s3793_s11  ;;  %413 = vrot.lane.b32.xlu0 %v411_v10, %s3793_s11  ;;  %v2212_v3 = vld [vmem:[%s6781_s2 + $0x170] sm:$0xff] }
  0x75   :  { %3528 = vmatpush3.bf16.msra.mxu1 %v3527_v55  ;;  %v3531_v10 = vpack.c.bf16 %v2213_v6, %v2212_v3  ;;  %v4316_v3 = vstv %s3118_s29  ;;  %s4914_s29 = sld [smem:[#allocation2 + $0x30]] }
  0x76   :  { %3530 = vmatprep.subr.bf16.mxu1 %v3529_v63  ;;  %v691_v63 = vmul.f32 %v3871_v19, %v4289_v49  ;;  %6842 = vst [vmem:[#allocation12_spill] sm:$0xff] %v4316_v3  ;;  %v928_v27 = vmul.f32 %v3847_v9, %v4316_v3 }
  0x78   :  { %582 = vrot.lane.b32.xlu1 %v580_v23, %s3792_s5  ;;  %524 = vrot.lane.b32.xlu0 %v522_v28, %s3792_s5  ;;  %v118_v23 = vmul.f32 %v3825_v0, %v3833_v4 }
  0x79   :  { %3532 = vmatpush3.bf16.msra.mxu1 %v3531_v10 }
  0x7a   :  { %v119_v31 = vadd.f32 %v118_v23, %v116_v22  ;;  %v1038_v22 = vmul.f32 %v3871_v19, %v4238_v17 }
  0x7c   :  { %532 = vrot.lane.b32.xlu1 %v530_v39, %s3793_s11  ;;  %353 = vrot.lane.b32.xlu0 %v351_v42, %s3793_s11  ;;  %v366_v42 = vmul.f32 %v3825_v0, %v3835_v5 }
  0x7e   :  { %v367_v50 = vadd.f32 %v366_v42, %v364_v41 }
  0x80   :  { %598 = vrot.lane.b32.xlu1 %v596_v54, %s3793_s11  ;;  %590 = vrot.lane.b32.xlu0 %v588_v58, %s3793_s11  ;;  %v629_v54 = vmul.f32 %v3847_v9, %v4289_v49 }
  0x84   :  { %616 = vrot.lane.b32.xlu1 %v614_v2, %s3791_s24  ;;  %667 = vrot.lane.b32.xlu0 %v665_v7, %s3791_s24 }
  0x88   :  { %912 = vrot.lane.b32.xlu1 %v910_v11, %s3791_s24  ;;  %675 = vrot.lane.b32.xlu0 %v673_v12, %s3791_s24  ;;  %v801_v11 = vmul.f32 %v3825_v0, %v4256_v26 }
  0x8a   :  { %v4240_v18 = vpop.permute.xlu1 %185  ;;  %v4244_v21 = vpop.permute.xlu0 %177 }
  0x8c   :  { %787 = vrot.lane.b32.xlu1 %v785_v13, %s3791_s24  ;;  %729 = vrot.lane.b32.xlu0 %v727_v14, %s3791_s24  ;;  %v4332_v13 = vstv %s3117_s14  ;;  %s4762_s14 = sld [smem:[#allocation2 + $0x27]] }
  0x8d   :  { %6844 = vst [vmem:[#allocation14_spill] sm:$0xff] %v4332_v13  ;;  %v980_v23 = vmul.f32 %v4332_v13, %v3830_v1 }
  0x8e   :  { %v4258_v28 = vpop.permute.xlu1 %422  ;;  %v124_v48 = vpop.permute.xlu0 %123 }
  0x8f   :  { %v125_v32 = vrot.slane %v124_v48, 2 }
  0x90   :  { %920 = vrot.lane.b32.xlu1 %v918_v24, %s3791_s24  ;;  %861 = vrot.lane.b32.xlu0 %v859_v25, %s3791_s24  ;;  %v4342_v24 = vstv %s3111_s4  ;;  %s4767_s4 = sld [smem:[#allocation2 + $0x28]] }
  0x91   :  { %v127_v37 = vsel %vm126_vm0, %v124_v48, %v125_v32  ;;  %v638_v17 = vmul.f32 %v4342_v24, %v3830_v1 }
  0x92   :  { %v4273_v39 = vpop.permute.xlu1 %297  ;;  %v129_v38 = vadd.f32 %v127_v37, %v119_v31  ;;  %v4275_v40 = vpop.permute.xlu0 %239  ;;  %v699_v31 = vmul.f32 %v3825_v0, %v4342_v24  ;;  %v4364_v37 = vstv %s3119_s6  ;;  %s4769_s6 = sld [smem:[#allocation2 + $0x49]] }
  0x93   :  { %v936_v42 = vmul.f32 %v3871_v19, %v4364_v37 }
  0x94   :  { %737 = vrot.lane.b32.xlu1 %v735_v33, %s3792_s5  ;;  %v132_v46 = vadd.f32 %v131_v34, %v129_v38  ;;  %685 = vrot.lane.b32.xlu0 %v683_v35, %s3791_s24  ;;  %v809_v34 = vmul.f32 %v4260_v29, %v3830_v1  ;;  %v751_v35 = vmul.f32 %v4289_v49, %v3830_v1 }
  0x96   :  { %v4291_v53 = vpop.permute.xlu1 %430  ;;  %v372_v51 = vpop.permute.xlu0 %371  ;;  %v4293_v52 = vadd.f32 %v134_v44, %v132_v46  ;;  %v874_v44 = vmul.f32 %v3847_v9, %v4364_v37 }
  0x97   :  { %v373_v16 = vrot.slane %v372_v51, 2 }
  0x98   :  { %974 = vrot.lane.b32.xlu1 %v972_v45, %s3791_s24  ;;  %795 = vrot.lane.b32.xlu0 %v793_v47, %s3791_s24  ;;  %v1046_v47 = vmul.f32 %v3825_v0, %v4332_v13 }
  0x99   :  { %v374_v57 = vsel %vm126_vm0, %v372_v51, %v373_v16  ;;  %v4386_v51 = vstv %s3112_s7  ;;  %s4870_s7 = sld [smem:[#allocation2 + $0x31]] }
  0x9a   :  { %v4304_v58 = vpop.permute.xlu1 %247  ;;  %v376_v59 = vadd.f32 %v374_v57, %v367_v50  ;;  %v4306_v55 = vpop.permute.xlu0 %195  ;;  %v988_v50 = vmul.f32 %v3825_v0, %v4316_v3 }
  0x9c   :  { %631 = vrot.lane.b32.xlu1 %v629_v54, %s3791_s24  ;;  %v379_v2 = vadd.f32 %v378_v56, %v376_v59  ;;  %1032 = vrot.lane.b32.xlu0 %v1030_v43, %s3791_s24  ;;  %v707_v56 = vmul.f32 %v4386_v51, %v3830_v1  ;;  %v647_v43 = vmul.f32 %v3825_v0, %v4386_v51 }
  0x9e   :  { %v4318_v6 = vpop.permute.xlu1 %484  ;;  %v4320_v7 = vpop.permute.xlu0 %305  ;;  %v4322_v10 = vadd.f32 %v381_v61, %v379_v2  ;;  %v817_v61 = vmul.f32 %v3825_v0, %v4289_v49  ;;  %v759_v2 = vmul.f32 %v3847_v9, %v4342_v24 }
  0xa0   :  { %6843 = vst [vmem:[#allocation13_spill] sm:$0xff] %v4322_v10  ;;  %745 = vrot.lane.b32.xlu1 %v743_v62, %s3792_s5  ;;  %693 = vrot.lane.b32.xlu0 %v691_v63, %s3791_s24  ;;  %v179_v62 = vrot.slane %v4244_v21, 2  ;;  %v882_v63 = vstv %s3120_s9 }
  0xa2   :  { %v4330_v12 = vpop.permute.xlu1 %139  ;;  %v4334_v14 = vpop.permute.xlu0 %542 }
  0xa4   :  { %930 = vrot.lane.b32.xlu1 %v928_v27, %s3791_s24  ;;  %803 = vrot.lane.b32.xlu0 %v801_v11, %s3792_s5  ;;  %v235_v11 = vmul.f32 %v3871_v19, %v3833_v4  ;;  %v480_v4 = vmul.f32 %v3871_v19, %v3835_v5  ;;  %v655_v5 = vstv %s3113_s10  ;;  %s4804_s10 = sld [smem:[#allocation2 + $0x29]] }
  0xa6   :  { %v4344_v25 = vpop.permute.xlu1 %255  ;;  %v4346_v48 = vpop.permute.xlu0 %203 }
  0xa7   :  { %v205_v26 = vrot.slane %v4346_v48, 2 }
  0xa8   :  { %1040 = vrot.lane.b32.xlu1 %v1038_v22, %s3791_s24  ;;  %982 = vrot.lane.b32.xlu0 %v980_v23, %s3792_s5  ;;  %v234_v22 = vmul.f32 %v3847_v9, %v4242_v20  ;;  %v174_v23 = vmul.f32 %v3825_v0, %v4242_v20 }
  0xaa   :  { %v4354_v32 = vpop.permute.xlu1 %440  ;;  %v4356_v33 = vpop.permute.xlu0 %313 }
  0xac   :  { %701 = vrot.lane.b32.xlu1 %v699_v31, %s3792_s5  ;;  %640 = vrot.lane.b32.xlu0 %v638_v17, %s3792_s5  ;;  %v944_v31 = vmul.f32 %v3825_v0, %v882_v63  ;;  %v180_v17 = vsel %vm126_vm0, %v4244_v21, %v179_v62  ;;  %v4440_v21 = vmul.f32 %v3871_v19, %v4242_v20 }
  0xad   :  { %v1054_v62 = vmul.f32 %v4316_v3, %v3830_v1  ;;  %v4455_v20 = vmul.f32 %v3871_v19, %v4270_v36 }
  0xae   :  { %v4366_v38 = vpop.permute.xlu1 %550  ;;  %v4368_v41 = vpop.permute.xlu0 %492 }
  0xb0   :  { %811 = vrot.lane.b32.xlu1 %v809_v34, %s3793_s11  ;;  %753 = vrot.lane.b32.xlu0 %v751_v35, %s3793_s11  ;;  %v479_v34 = vmul.f32 %v3847_v9, %v4270_v36  ;;  %v883_v35 = vmul.f32 %v882_v63, %v3830_v1 }
  0xb2   :  { %v4376_v45 = vpop.permute.xlu1 %211  ;;  %v4378_v46 = vpop.permute.xlu0 %148  ;;  %v4451_v13 = vadd.f32 %v480_v4, %v479_v34  ;;  %v197_v34 = vrot.slane %v4306_v55, 2 }
  0xb4   :  { %938 = vrot.lane.b32.xlu1 %v936_v42, %s3791_s24  ;;  %876 = vrot.lane.b32.xlu0 %v874_v44, %s3791_s24  ;;  %v4433_v42 = vmul.f32 %v3825_v0, %v4270_v36  ;;  %v825_v36 = vmul.f32 %v3871_v19, %v4342_v24  ;;  %v198_v10 = vsel %vm126_vm0, %v4306_v55, %v197_v34 }
  0xb5   :  { %v206_v55 = vsel %vm126_vm0, %v4346_v48, %v205_v26  ;;  %v432_v48 = vrot.slane %v4291_v53, 2 }
  0xb6   :  { %v4388_v16 = vpop.permute.xlu1 %321  ;;  %v4390_v54 = vpop.permute.xlu0 %263 }
  0xb7   :  { %6845 = vst [vmem:[#allocation15_spill] sm:$0xff] %v4388_v16 }
  0xb8   :  { %1048 = vrot.lane.b32.xlu1 %v1046_v47, %s3792_s5  ;;  %990 = vrot.lane.b32.xlu0 %v988_v50, %s3792_s5  ;;  %v187_v47 = vrot.slane %v4240_v18, 2  ;;  %v4442_v50 = vadd.f32 %v235_v11, %v234_v22  ;;  %v4459_v11 = vmul.f32 %v3871_v19, %v3895_v30 }
  0xba   :  { %v4398_v57 = vpop.permute.xlu1 %448  ;;  %v4400_v59 = vpop.permute.xlu0 %386  ;;  %v188_v30 = vsel %vm126_vm0, %v4240_v18, %v187_v47  ;;  %v4491_v18 = vmul.f32 %v3825_v0, %v4364_v37  ;;  %v4494_v47 = vmul.f32 %v3847_v9, %v882_v63 }
  0xbc   :  { %709 = vrot.lane.b32.xlu1 %v707_v56, %s3793_s11  ;;  %649 = vrot.lane.b32.xlu0 %v647_v43, %s3792_s5  ;;  %v182_v43 = vadd.f32 %v180_v17, %v174_v23  ;;  %v715_v23 = vmul.f32 %v3825_v0, %v655_v5  ;;  %v900_v17 = vstv %s4411_s13  ;;  %s5542_s13 = sld [smem:[#allocation2 + $0x41]] }
  0xbe   :  { %v4409_v27 = vpop.permute.xlu1 %558  ;;  %v4417_v49 = vpop.permute.xlu0 %500  ;;  %v190_v29 = vadd.f32 %v188_v30, %v182_v43  ;;  %v4500_v43 = vmul.f32 %v3847_v9, %v4386_v51  ;;  %v4506_v30 = vmul.f32 %v3825_v0, %v900_v17 }
  0xbf   :  { %6846 = vst [vmem:[#allocation16_spill] sm:$0xff] %v4409_v27  ;;  %6847 = vst [vmem:[#allocation17_spill] sm:$0xff] %v4417_v49  ;;  %v424_v27 = vrot.slane %v4258_v28, 2 }
  0xc0   :  { %819 = vrot.lane.b32.xlu1 %v817_v61, %s3793_s11  ;;  %761 = vrot.lane.b32.xlu0 %v759_v2, %s3792_s5  ;;  %v191_v61 = vmul.f32 %v3871_v19, %v3858_v15  ;;  %v891_v2 = vstv %s3121_s12  ;;  %v996_v15 = vmul.f32 %v4364_v37, %v3830_v1  ;;  %6849 = vst [vmem:[#allocation19_spill] sm:$0xff] %v4506_v30  ;;  %v2246_v37 = vld [vmem:[%s6781_s2 + $0x280] sm:$0xff]  ;;  %v213_v30 = vrot.slane %v4376_v45, 2  ;;  %s5534_s12 = sld [smem:[#allocation2 + $0x4a]] }
  0xc1   :  { %v4483_v3 = vmul.f32 %v891_v2, %v3830_v1  ;;  %v4487_v24 = vmul.f32 %v3825_v0, %v891_v2  ;;  %v3533_v0 = vpack.c.bf16 %v2247_v8, %v2246_v37  ;;  %v4530_v49 = vmul.f32 %v3871_v19, %v891_v2 }
  0xc2   :  { %v4435_v44 = vpop.permute.xlu1 %219  ;;  %v4444_v56 = vpop.permute.xlu0 %158  ;;  %v4535_v8 = vmul.f32 %v3847_v9, %v900_v17  ;;  %v425_v26 = vsel %vm126_vm0, %v4258_v28, %v424_v27  ;;  %v2279_v28 = vld [vmem:[%s6781_s2 + $0x388] sm:$0xff] }
  0xc3   :  { %3534 = vmatprep.subr.bf16.mxu0 %v3533_v0  ;;  %v221_v34 = vrot.slane %v4435_v44, 2  ;;  %v4556_v0 = vstv %s4473_s16  ;;  %s6300_s16 = sld [smem:[#allocation2 + $0x36]] }
  0xc4   :  { %946 = vrot.lane.b32.xlu1 %v944_v31, %s3792_s5  ;;  %885 = vrot.lane.b32.xlu0 %v883_v35, %s3792_s5  ;;  %v656_v31 = vmul.f32 %v655_v5, %v3830_v1  ;;  %v767_v35 = vmul.f32 %v3871_v19, %v4386_v51  ;;  %v4518_v51 = vmul.f32 %v900_v17, %v3830_v1 }
  0xc5   :  { %6853 = vst [vmem:[#allocation23_spill] sm:$0xff] %v4556_v0 }
  0xc6   :  { %v4466_v22 = vpop.permute.xlu1 %329  ;;  %v4478_v4 = vpop.permute.xlu0 %271  ;;  %6851 = vst [vmem:[#allocation21_spill] sm:$0xff] %v4518_v51  ;;  %v150_v51 = vrot.slane %v4378_v46, 2 }
  0xc7   :  { %6848 = vst [vmem:[#allocation18_spill] sm:$0xff] %v4466_v22  ;;  %v4521_v22 = vmul.f32 %v3871_v19, %v882_v63  ;;  %v4538_v63 = vmul.f32 %v3871_v19, %v655_v5 }
  0xc8   :  { %1056 = vrot.lane.b32.xlu1 %v1054_v62, %s3793_s11  ;;  %998 = vrot.lane.b32.xlu0 %v996_v15, %s3793_s11  ;;  %v4503_v62 = vmul.f32 %v3847_v9, %v655_v5  ;;  %v141_v15 = vrot.slane %v4330_v12, 2  ;;  %v160_v5 = vrot.slane %v4444_v56, 2  ;;  %v152_v27 = vsel %vm151_vm1, %v4378_v46, %v150_v51  ;;  %v4591_v46 = vld [vmem:[%s6779_s0] sm:$0x3f] }
  0xc9   :  { %6852 = vst [vmem:[#allocation22_spill] sm:$0xff] %v4538_v63 }
  0xca   :  { %v4515_v60 = vpop.permute.xlu1 %456  ;;  %v4527_v16 = vpop.permute.xlu0 %395  ;;  %v142_v37 = vsel %vm126_vm0, %v4330_v12, %v141_v15 }
  0xcb   :  { %6850 = vst [vmem:[#allocation20_spill] sm:$0xff] %v4515_v60  ;;  %v192_v60 = vadd.f32 %v191_v61, %v190_v29  ;;  %v4545_v29 = vmul.f32 %v3871_v19, %v900_v17  ;;  %v4548_v61 = vstv %s4464_s15  ;;  %v214_v19 = vsel %vm151_vm1, %v4376_v45, %v213_v30  ;;  %s3105_s15 = sld [smem:[#allocation2 + $0x12]] }
  0xcc   :  { %717 = vrot.lane.b32.xlu1 %v715_v23, %s3793_s11  ;;  %658 = vrot.lane.b32.xlu0 %v656_v31, %s3793_s11  ;;  %v144_v17 = vadd.f32 %v142_v37, %v4293_v52  ;;  %v222_v30 = vsel %vm170_vm2, %v4435_v44, %v221_v34  ;;  %v161_v52 = vsel %vm151_vm1, %v4444_v56, %v160_v5  ;;  %v299_v44 = vrot.slane %v4273_v39, 2 }
  0xcd   :  { %v200_v23 = vadd.f32 %v198_v10, %v192_v60  ;;  %v4566_v60 = vmul.f32 %v3847_v9, %v891_v2  ;;  %v2278_v10 = vld [vmem:[%s6781_s2 + $0x380] sm:$0xff]  ;;  %v4581_v9 = vmul.f32 %v4548_v61, %v3830_v1  ;;  %v241_v2 = vrot.slane %v4275_v40, 2 }
  0xce   :  { %v4553_v63 = vpop.permute.xlu1 %566  ;;  %v4563_v31 = vpop.permute.xlu0 %508  ;;  %v3565_v45 = vpack.c.bf16 %v2279_v28, %v2278_v10  ;;  %v427_v1 = vadd.f32 %v425_v26, %v4433_v42  ;;  %v249_v37 = vrot.slane %v4304_v58, 2  ;;  %v486_v10 = vrot.slane %v4318_v6, 2 }
  0xcf   :  { %v208_v12 = vadd.f32 %v206_v55, %v200_v23  ;;  %v154_v55 = vadd.f32 %v152_v27, %v144_v17  ;;  %v242_v56 = vsel %vm126_vm0, %v4275_v40, %v241_v2  ;;  %v307_v5 = vrot.slane %v4320_v7, 2 }
  0xd0   :  { %827 = vrot.lane.b32.xlu1 %v825_v36, %s3792_s5  ;;  %769 = vrot.lane.b32.xlu0 %v767_v35, %s3792_s5  ;;  %v4595_v36 = vmul.f32 %v4591_v46, %v4556_v0  ;;  %v433_v35 = vsel %vm126_vm0, %v4291_v53, %v432_v48  ;;  %v300_v40 = vsel %vm126_vm0, %v4273_v39, %v299_v44 }
  0xd1   :  { %v216_v15 = vadd.f32 %v214_v19, %v208_v12  ;;  %3566 = vmatprep.subr.bf16.mxu1 %v3565_v45  ;;  %v163_v26 = vadd.f32 %v161_v52, %v154_v55  ;;  %v435_v48 = vadd.f32 %v433_v35, %v427_v1  ;;  %v544_v19 = vrot.slane %v4334_v14, 2 }
  0xd2   :  { %v228_v51 = vpop.permute.xlu1 %227  ;;  %v168_v23 = vpop.permute.xlu0 %167  ;;  %v487_v1 = vsel %vm126_vm0, %v4318_v6, %v486_v10  ;;  %v3794_v52 = vmov 1983009808   ;;  %v308_v44 = vsel %vm126_vm0, %v4320_v7, %v307_v5  ;;  %v315_v35 = vrot.slane %v4356_v33, 2 }
  0xd3   :  { %v229_v34 = vrot.slane %v228_v51, 2  ;;  %v224_v28 = vadd.f32 %v222_v30, %v216_v15  ;;  %v169_v42 = vrot.slane %v168_v23, 2  ;;  %v4625_v30 = vstv %s4568_s30  ;;  %s5132_s30 = sld [smem:[#allocation2 + $0x2c]] }
  0xd4   :  { %954 = vrot.lane.b32.xlu1 %v4483_v3, %s3793_s11  ;;  %894 = vrot.lane.b32.xlu0 %v4487_v24, %s3792_s5  ;;  %v257_v3 = vrot.slane %v4344_v25, 2  ;;  %6854 = vst [vmem:[#allocation24_spill] sm:$0xff] %v4625_v30  ;;  %v250_v24 = vsel %vm151_vm1, %v4304_v58, %v249_v37  ;;  %v442_v15 = vrot.slane %v4354_v32, 2  ;;  %v4634_v39 = vunpack.c.l.s4 %v3794_v52  ;;  %v6858_v52 = vld [vmem:[#allocation19_spill] sm:$0xff] }
  0xd5   :  { %v230_v53 = vsel %vm170_vm2, %v228_v51, %v229_v34  ;;  %v171_v27 = vsel %vm170_vm2, %v168_v23, %v169_v42  ;;  %v244_v51 = vadd.f32 %v242_v56, %v4442_v50  ;;  %v302_v6 = vadd.f32 %v300_v40, %v4440_v21  ;;  %v6857_v40 = vld [vmem:[#allocation20_spill] sm:$0xff] }
  0xd6   :  { %v4614_v12 = vadd.f32 %v230_v53, %v224_v28  ;;  %v4617_v45 = vpop.permute.xlu1 %337  ;;  %v4622_v2 = vadd.f32 %v171_v27, %v163_v26  ;;  %v280_v17 = vpop.permute.xlu0 %279  ;;  %v437_v55 = vadd.f32 %v4459_v11, %v435_v48  ;;  %v265_v50 = vrot.slane %v4390_v54, 2  ;;  %v6855_v26 = vld [vmem:[#allocation17_spill] sm:$0xff] }
  0xd7   :  { %v252_v23 = vadd.f32 %v250_v24, %v244_v51  ;;  %v489_v7 = vadd.f32 %v487_v1, %v4451_v13  ;;  %v258_v37 = vsel %vm151_vm1, %v4344_v25, %v257_v3  ;;  %v494_v10 = vrot.slane %v4368_v41, 2 }
  0xd8   :  { %1064 = vrot.lane.b32.xlu1 %v4491_v18, %s3793_s11  ;;  %v233_v58 = vmax.f32 %v4622_v2, %v4614_v12  ;;  %1006 = vrot.lane.b32.xlu0 %v4494_v47, %s3792_s5  ;;  %v545_v18 = vsel %vm126_vm0, %v4334_v14, %v544_v19  ;;  %v310_v47 = vadd.f32 %v308_v44, %v302_v6  ;;  %v450_v14 = vrot.slane %v4398_v57, 2  ;;  %v6856_v19 = vld [vmem:[#allocation15_spill] sm:$0xff]  ;;  %v6859_v6 = vld [vmem:[#allocation21_spill] sm:$0xff] }
  0xd9   :  { %v443_v21 = vsel %vm126_vm0, %v4354_v32, %v442_v15  ;;  %v273_v11 = vrot.slane %v4478_v4, 2  ;;  %v4660_v42 = vadd.f32 %v545_v18, %v4455_v20  ;;  %v316_v13 = vsel %vm151_vm1, %v4356_v33, %v315_v35 }
  0xda   :  { %v465_v34 = vpop.permute.xlu1 %464  ;;  %v405_v28 = vpop.permute.xlu0 %404  ;;  %v552_v25 = vrot.slane %v4366_v38, 2  ;;  %v388_v56 = vrot.slane %v4400_v59, 2  ;;  %v260_v32 = vadd.f32 %v258_v37, %v252_v23  ;;  %v266_v5 = vsel %vm170_vm2, %v4390_v54, %v265_v50 }
  0xdb   :  { %v502_v53 = vrot.slane %v6855_v26, 2  ;;  %v445_v20 = vadd.f32 %v443_v21, %v437_v55  ;;  %v495_v33 = vsel %vm151_vm1, %v4368_v41, %v494_v10  ;;  %v323_v27 = vrot.slane %v6856_v19, 2 }
  0xdc   :  { %835 = vrot.lane.b32.xlu1 %v4500_v43, %s3793_s11  ;;  %777 = vrot.lane.b32.xlu0 %v4503_v62, %s3793_s11  ;;  %v281_v43 = vrot.slane %v280_v17, 2  ;;  %v458_v3 = vrot.slane %v6857_v40, 2  ;;  %v318_v1 = vadd.f32 %v316_v13, %v310_v47  ;;  %v451_v62 = vsel %vm126_vm0, %v4398_v57, %v450_v14  ;;  %v6860_v47 = vld [vmem:[#allocation13_spill] sm:$0xff]  ;;  %v6861_v14 = vld [vmem:[#allocation16_spill] sm:$0xff] }
  0xdd   :  { %v274_v54 = vsel %vm151_vm1, %v4478_v4, %v273_v11  ;;  %v397_v15 = vrot.slane %v4527_v16, 2  ;;  %v553_v41 = vsel %vm126_vm0, %v4366_v38, %v552_v25  ;;  %v268_v51 = vadd.f32 %v266_v5, %v260_v32  ;;  %v6862_v5 = vld [vmem:[#allocation18_spill] sm:$0xff] }
  0xde   :  { %v4671_v48 = vpop.permute.xlu1 %574  ;;  %v517_v24 = vpop.permute.xlu0 %516  ;;  %v389_v44 = vsel %vm126_vm0, %v4400_v59, %v388_v56  ;;  %v466_v35 = vrot.slane %v465_v34, 2  ;;  %v497_v57 = vadd.f32 %v495_v33, %v489_v7  ;;  %v503_v4 = vsel %vm151_vm1, %v6855_v26, %v502_v53 }
  0xdf   :  { %v282_v18 = vsel %vm151_vm1, %v280_v17, %v281_v43  ;;  %v406_v55 = vrot.slane %v405_v28, 2  ;;  %v324_v23 = vsel %vm170_vm2, %v6856_v19, %v323_v27  ;;  %v453_v38 = vadd.f32 %v451_v62, %v445_v20 }
  0xe0   :  { %962 = vrot.lane.b32.xlu1 %v6858_v52, %s3793_s11  ;;  %903 = vrot.lane.b32.xlu0 %v6859_v6, %s3793_s11  ;;  %v276_v37 = vadd.f32 %v274_v54, %v268_v51  ;;  %v459_v59 = vsel %vm151_vm1, %v6857_v40, %v458_v3  ;;  %v391_v21 = vadd.f32 %v389_v44, %v6860_v47  ;;  %v560_v7 = vrot.slane %v6861_v14, 2  ;;  %v6863_v51 = vld [vmem:[#allocation22_spill] sm:$0xff] }
  0xe1   :  { %v398_v11 = vsel %vm151_vm1, %v4527_v16, %v397_v15  ;;  %v505_v17 = vadd.f32 %v503_v4, %v497_v57  ;;  %v510_v25 = vrot.slane %v4563_v31, 2  ;;  %v467_v32 = vsel %vm170_vm2, %v465_v34, %v466_v35 }
  0xe2   :  { %v346_v50 = vpop.permute.xlu1 %345  ;;  %v288_v10 = vpop.permute.xlu0 %287  ;;  %v284_v56 = vadd.f32 %v282_v18, %v276_v37  ;;  %v331_v26 = vrot.slane %v6862_v5, 2  ;;  %v461_v53 = vadd.f32 %v459_v59, %v453_v38  ;;  %v407_v43 = vsel %vm151_vm1, %v405_v28, %v406_v55 }
  0xe3   :  { %v289_v13 = vrot.slane %v288_v10, 2  ;;  %v400_v33 = vadd.f32 %v398_v11, %v391_v21  ;;  %v518_v19 = vrot.slane %v517_v24, 2  ;;  %v568_v3 = vrot.slane %v4553_v63, 2 }
  0xe4   :  { %1072 = vrot.lane.b32.xlu1 %v4521_v22, %s3792_s5  ;;  %1014 = vrot.lane.b32.xlu0 %v4530_v49, %s3792_s5  ;;  %v339_v34 = vrot.slane %v4617_v45, 2  ;;  %v469_v62 = vadd.f32 %v467_v32, %v461_v53  ;;  %v511_v49 = vsel %vm170_vm2, %v4563_v31, %v510_v25  ;;  %v332_v44 = vsel %vm170_vm2, %v6862_v5, %v331_v26 }
  0xe5   :  { %v290_v16 = vsel %vm170_vm2, %v288_v10, %v289_v13  ;;  %v409_v28 = vadd.f32 %v407_v43, %v400_v33  ;;  %v347_v35 = vrot.slane %v346_v50, 2  ;;  %v326_v31 = vadd.f32 %v324_v23, %v318_v1 }
  0xe6   :  { %v473_v20 = vpop.permute.xlu1 %472  ;;  %v292_v22 = vadd.f32 %v290_v16, %v284_v56  ;;  %v414_v40 = vpop.permute.xlu0 %413  ;;  %v561_v12 = vsel %vm151_vm1, %v6861_v14, %v560_v7  ;;  %v519_v2 = vsel %vm151_vm1, %v517_v24, %v518_v19  ;;  %v513_v18 = vadd.f32 %v511_v49, %v505_v17 }
  0xe7   :  { %v474_v27 = vrot.slane %v473_v20, 2  ;;  %v415_v54 = vrot.slane %v414_v40, 2  ;;  %v340_v55 = vsel %vm151_vm1, %v4617_v45, %v339_v34  ;;  %v576_v38 = vrot.slane %v4671_v48, 2 }
  0xe8   :  { %1022 = vrot.lane.b32.xlu1 %v4535_v8, %s3793_s11  ;;  %v4719_v15 = vmax.f32 %v233_v58, %v292_v22  ;;  %843 = vrot.lane.b32.xlu0 %v6863_v51, %s3793_s11  ;;  %v555_v59 = vadd.f32 %v553_v41, %v4660_v42  ;;  %v334_v1 = vadd.f32 %v332_v44, %v326_v31  ;;  %v2082_v11 = vlaneseq }
  0xe9   :  { %v475_v52 = vsel %vm170_vm2, %v473_v20, %v474_v27  ;;  %v416_v8 = vsel %vm170_vm2, %v414_v40, %v415_v54  ;;  %v569_v23 = vsel %vm170_vm2, %v4553_v63, %v568_v3  ;;  %v521_v24 = vadd.f32 %v519_v2, %v513_v18  ;;  %v4776_v3 = vld [vmem:[%s6779_s0 + $0xc] sm:$0x3f] }
  0xea   :  { %v477_v6 = vadd.f32 %v475_v52, %v469_v62  ;;  %v583_v57 = vpop.permute.xlu1 %582  ;;  %v418_v58 = vadd.f32 %v416_v8, %v409_v28  ;;  %v525_v4 = vpop.permute.xlu0 %524  ;;  %v348_v45 = vsel %vm170_vm2, %v346_v50, %v347_v35  ;;  %v342_v7 = vadd.f32 %v340_v55, %v334_v1  ;;  %v2230_v55 = vld [vmem:[%s6781_s2 + $0x200] sm:$0xff] }
  0xeb   :  { %v526_v37 = vrot.slane %v525_v4, 2  ;;  %v584_v47 = vrot.slane %v583_v57, 2  ;;  %v577_v63 = vsel %vm170_vm2, %v4671_v48, %v576_v38  ;;  %v1400_v50 = vmul.f32 %v4591_v46, %v4625_v30  ;;  %v4758_v48 = vld [vmem:[%s6779_s0 + $0x6] sm:$0x3f] }
  0xec   :  { %1088 = vrot.lane.b32.xlu1 %v4545_v29, %s3793_s11  ;;  %v478_v10 = vmax.f32 %v418_v58, %v477_v6  ;;  %1080 = vrot.lane.b32.xlu0 %v4566_v60, %s3793_s11  ;;  %v563_v29 = vadd.f32 %v561_v12, %v555_v59  ;;  %v350_v25 = vadd.f32 %v348_v45, %v342_v7  ;;  %v360_v43 = vstv %s4727_s27  ;;  %v2231_v38 = vld [vmem:[%s6781_s2 + $0x208] sm:$0xff]  ;;  %s5021_s27 = sld [smem:[#allocation2 + $0x32]] }
  0xed   :  { %v527_v21 = vsel %vm151_vm1, %v525_v4, %v526_v37  ;;  %v1163_v32 = vmul.f32 %v4758_v48, %v4548_v61  ;;  %v2081_v33 = vunpack.c.0.s8 %v4634_v39  ;;  %v2083_v19 = vshrl.u32 %v2082_v11, 7  ;;  %v2232_v11 = vld [vmem:[%s6781_s2 + $0x210] sm:$0xff] }
  0xee   :  { %v533_v14 = vpop.permute.xlu1 %532  ;;  %v354_v41 = vpop.permute.xlu0 %353  ;;  %v529_v13 = vadd.f32 %v527_v21, %v521_v24  ;;  %v571_v17 = vadd.f32 %v569_v23, %v563_v29  ;;  %v1275_v34 = vmul.f32 %v4776_v3, %v4556_v0  ;;  %v1217_v39 = vmul.f32 %v4776_v3, %v4548_v61  ;;  %v2248_v23 = vld [vmem:[%s6781_s2 + $0x290] sm:$0xff] }
  0xef   :  { %v534_v42 = vrot.slane %v533_v14, 2  ;;  %v355_v60 = vrot.slane %v354_v41, 2  ;;  %v4784_v54 = vstv %s4742_s22  ;;  %v4792_v6 = vsub.s32 %v2081_v33, %v2083_v19  ;;  %v2234_v19 = vld [vmem:[%s6781_s2 + $0x220] sm:$0xff]  ;;  %s5952_s22 = sld [smem:[#allocation2 + $0x46]] }
  0xf0   :  { %1106 = vrot.lane.b32.xlu1 %v4581_v9, %s3791_s24  ;;  %1157 = vrot.lane.b32.xlu0 %v4595_v36, %s3791_s24  ;;  %v585_v9 = vsel %vm151_vm1, %v583_v57, %v584_v47  ;;  %v579_v36 = vadd.f32 %v577_v63, %v571_v17  ;;  %v1408_v57 = vmul.f32 %v4758_v48, %v4784_v54  ;;  %v4802_v2 = vstv %s4762_s14  ;;  %v2233_v63 = vld [vmem:[%s6781_s2 + $0x218] sm:$0xff] }
  0xf1   :  { %v535_v56 = vsel %vm170_vm2, %v533_v14, %v534_v42  ;;  %v356_v26 = vsel %vm170_vm2, %v354_v41, %v355_v60  ;;  %6864 = vst [vmem:[#allocation17_spill] sm:$0xff] %v4792_v6  ;;  %v1349_v31 = vmul.f32 %v4591_v46, %v4784_v54  ;;  %6865 = vst [vmem:[#allocation15_spill] sm:$0xff] %v4802_v2  ;;  %v4809_v4 = vstv %s4767_s4  ;;  %v2250_v17 = vld [vmem:[%s6781_s2 + $0x2a0] sm:$0xff] }
  0xf2   :  { %v537_v5 = vadd.f32 %v535_v56, %v529_v13  ;;  %v599_v53 = vpop.permute.xlu1 %598  ;;  %v358_v16 = vadd.f32 %v356_v26, %v350_v25  ;;  %v591_v20 = vpop.permute.xlu0 %590  ;;  %v587_v62 = vadd.f32 %v585_v9, %v579_v36  ;;  %6866 = vst [vmem:[#allocation20_spill] sm:$0xff] %v4809_v4  ;;  %v605_v18 = vstv %s4769_s6  ;;  %v2262_v13 = vld [vmem:[%s6781_s2 + $0x300] sm:$0xff]  ;;  %v2251_v25 = vld [vmem:[%s6781_s2 + $0x2a8] sm:$0xff]  ;;  %v4862_v56 = vld [vmem:[%s6779_s0 + $0x12] sm:$0x3f] }
  0xf3   :  { %v600_v27 = vrot.slane %v599_v53, 2  ;;  %v592_v40 = vrot.slane %v591_v20, 2  ;;  %v1225_v24 = vmul.f32 %v4591_v46, %v4802_v2  ;;  %v1173_v47 = vmul.f32 %v4776_v3, %v4809_v4  ;;  %v2280_v26 = vld [vmem:[%s6781_s2 + $0x390] sm:$0xff] }
  0xf4   :  { %v538_v22 = vmax.f32 %v478_v10, %v537_v5  ;;  %1402 = vrot.lane.b32.xlu1 %v1400_v50, %s3791_s24  ;;  %1165 = vrot.lane.b32.xlu0 %v1163_v32, %s3791_s24  ;;  %v359_v49 = vmax.f32 %v4719_v15, %v358_v16  ;;  %v2249_v10 = vld [vmem:[%s6781_s2 + $0x298] sm:$0xff]  ;;  %v3535_v14 = vpack.c.bf16 %v2231_v38, %v2230_v55  ;;  %v2263_v50 = vld [vmem:[%s6781_s2 + $0x308] sm:$0xff] }
  0xf5   :  { %v593_v28 = vsel %vm170_vm2, %v591_v20, %v592_v40  ;;  %v601_v8 = vsel %vm170_vm2, %v599_v53, %v600_v27  ;;  %v3537_v7 = vpack.c.bf16 %v2249_v10, %v2248_v23  ;;  %v1462_v60 = vmul.f32 %v4776_v3, %v4784_v54  ;;  %v2281_v53 = vld [vmem:[%s6781_s2 + $0x398] sm:$0xff]  ;;  %v2264_v27 = vld [vmem:[%s6781_s2 + $0x310] sm:$0xff]  ;;  %v2266_v38 = vld [vmem:[%s6781_s2 + $0x320] sm:$0xff] }
  0xf6   :  { %v4788_v52 = vpop.permute.xlu1 %616  ;;  %v595_v51 = vadd.f32 %v593_v28, %v587_v62  ;;  %v4790_v44 = vpop.permute.xlu0 %667  ;;  %v361_v35 = vadd.f32 %v360_v43, %v359_v49  ;;  %v1283_v32 = vmul.f32 %v4862_v56, %v4548_v61  ;;  %v4868_v5 = vstv %s4804_s10  ;;  %v2265_v62 = vld [vmem:[%s6781_s2 + $0x318] sm:$0xff]  ;;  %v2267_v23 = vld [vmem:[%s6781_s2 + $0x328] sm:$0xff]  ;;  %v2254_v10 = vld [vmem:[%s6781_s2 + $0x2c0] sm:$0xff]  ;;  %s5561_s10 = sld [smem:[#allocation2 + $0x4b]] }
  0xf7   :  { %v3539_v36 = vpack.c.bf16 %v2233_v63, %v2232_v11  ;;  %v3567_v20 = vpack.c.bf16 %v2263_v50, %v2262_v13  ;;  %v3541_v33 = vpack.c.bf16 %v2251_v25, %v2250_v17  ;;  %v1119_v40 = vmul.f32 %v4776_v3, %v4868_v5  ;;  %v2253_v49 = vld [vmem:[%s6781_s2 + $0x2b8] sm:$0xff]  ;;  %v2239_v50 = vld [vmem:[%s6781_s2 + $0x248] sm:$0xff]  ;;  %v2268_v17 = vld [vmem:[%s6781_s2 + $0x330] sm:$0xff] }
  0xf8   :  { %1277 = vrot.lane.b32.xlu1 %v1275_v34, %s3791_s24  ;;  %v603_v15 = vadd.f32 %v601_v8, %v595_v51  ;;  %1219 = vrot.lane.b32.xlu0 %v1217_v39, %s3791_s24  ;;  %v362_v12 = vmax.f32 %v361_v35, 0.0  ;;  %v3569_v34 = vpack.c.bf16 %v2281_v53, %v2280_v26  ;;  %v2252_v39 = vld [vmem:[%s6781_s2 + $0x2b0] sm:$0xff]  ;;  %v1520_v28 = vmul.f32 %v4776_v3, %v4625_v30  ;;  %v2282_v51 = vld [vmem:[%s6781_s2 + $0x3a0] sm:$0xff] }
  0xf9   :  { %v2283_v35 = vld [vmem:[%s6781_s2 + $0x3a8] sm:$0xff]  ;;  %v2237_v55 = vld [vmem:[%s6781_s2 + $0x238] sm:$0xff]  ;;  %v3575_v63 = vpack.c.bf16 %v2267_v23, %v2266_v38  ;;  %v2256_v26 = vld [vmem:[%s6781_s2 + $0x2d0] sm:$0xff] }
  0xfa   :  { %v4806_v58 = vpop.permute.xlu1 %912  ;;  %v4818_v37 = vpop.permute.xlu0 %675  ;;  %v2085_v59 = vrot.slane %v362_v12, %v4792_v6  ;;  %v604_v1 = vmax.f32 %v538_v22, %v603_v15  ;;  %v2235_v22 = vld [vmem:[%s6781_s2 + $0x228] sm:$0xff]  ;;  %v3545_v12 = vpack.c.bf16 %v2253_v49, %v2252_v39  ;;  %v2257_v53 = vld [vmem:[%s6781_s2 + $0x2d8] sm:$0xff]  ;;  %v2270_v49 = vld [vmem:[%s6781_s2 + $0x340] sm:$0xff] }
  0xfb   :  { %v2241_v39 = vld [vmem:[%s6781_s2 + $0x258] sm:$0xff] }
  0xfc   :  { %1410 = vrot.lane.b32.xlu1 %v1408_v57, %s3791_s24  ;;  %1351 = vrot.lane.b32.xlu0 %v1349_v31, %s3791_s24  ;;  %v2086_v45 = vcombine.high %v2085_v59, %v2085_v59  ;;  %v606_v21 = vadd.f32 %v605_v18, %v604_v1  ;;  %v3543_v57 = vpack.c.bf16 %v2235_v22, %v2234_v19  ;;  %v2236_v18 = vld [vmem:[%s6781_s2 + $0x230] sm:$0xff]  ;;  %v4990_v19 = vstv %s4914_s29  ;;  %s5149_s29 = sld [smem:[#allocation2 + $0x35]] }
  0xfd   :  { %v3571_v31 = vpack.c.bf16 %v2265_v62, %v2264_v27  ;;  %v3573_v1 = vpack.c.bf16 %v2283_v35, %v2282_v51  ;;  %6868 = vst [vmem:[#allocation21_spill] sm:$0xff] %v4990_v19  ;;  %v2240_v62 = vld [vmem:[%s6781_s2 + $0x250] sm:$0xff]  ;;  %v2271_v35 = vld [vmem:[%s6781_s2 + $0x348] sm:$0xff] }
  0xfe   :  { %v4833_v29 = vpop.permute.xlu1 %787  ;;  %v4835_v42 = vpop.permute.xlu0 %729  ;;  %2496 = vmatprep.mubr.f32.mxu0 %v2086_v45  ;;  %v607_v41 = vmax.f32 %v606_v21, 0.0  ;;  %v1181_v45 = vmul.f32 %v4862_v56, %v4868_v5  ;;  %v2284_v21 = vld [vmem:[%s6781_s2 + $0x3b0] sm:$0xff]  ;;  %v3583_v23 = vpack.c.bf16 %v2271_v35, %v2270_v49  ;;  %v5086_v49 = vstv %s5021_s27  ;;  %s5559_s27 = sld [smem:[#allocation2 + $0x3a]] }
  0xff   :  { %2497 = vmatmul.mubr.f32.vlgmr.msra.gmra.mrb[0].mxu0 %v2085_v59  ;;  %v1233_v59 = vmul.f32 %v4758_v48, %v4809_v4 }
 0x100   :  { %1227 = vrot.lane.b32.xlu1 %v1225_v24, %s3792_s5  ;;  %1175 = vrot.lane.b32.xlu0 %v1173_v47, %s3791_s24  ;;  %v2096_v9 = vrot.slane %v607_v41, %v4792_v6  ;;  %v2255_v24 = vld [vmem:[%s6781_s2 + $0x2c8] sm:$0xff]  ;;  %v4943_v47 = vstv %s4870_s7  ;;  %v3547_v41 = vpack.c.bf16 %v2237_v55, %v2236_v18  ;;  %v669_v6 = vrot.slane %v4790_v44, 2  ;;  %s5246_s7 = sld [smem:[#allocation2 + $0x40]] }
 0x101   :  { %3536 = vmatpush3.bf16.msra.mxu0 %v3535_v14  ;;  %6867 = vst [vmem:[#allocation19_spill] sm:$0xff] %v4943_v47  ;;  %v2285_v14 = vld [vmem:[%s6781_s2 + $0x3b8] sm:$0xff]  ;;  %v3549_v13 = vpack.c.bf16 %v2255_v24, %v2254_v10  ;;  %v1418_v25 = vmul.f32 %v4776_v3, %v4943_v47  ;;  %v2288_v18 = vld [vmem:[%s6781_s2 + $0x3d0] sm:$0xff]  ;;  %v2242_v24 = vld [vmem:[%s6781_s2 + $0x260] sm:$0xff]  ;;  %v1544_v0 = vmul.f32 %v4591_v46, %v4943_v47 }
 0x102   :  { %v4878_v43 = vpop.permute.xlu1 %920  ;;  %3538 = vmatprep.subr.bf16.mxu0 %v3537_v7  ;;  %v4880_v61 = vpop.permute.xlu0 %861  ;;  %v2097_v16 = vcombine.high %v2096_v9, %v2096_v9  ;;  %v2289_v55 = vld [vmem:[%s6781_s2 + $0x3d8] sm:$0xff] }
 0x104   :  { %1464 = vrot.lane.b32.xlu1 %v1462_v60, %s3791_s24  ;;  %1285 = vrot.lane.b32.xlu0 %v1283_v32, %s3791_s24  ;;  %v2238_v60 = vld [vmem:[%s6781_s2 + $0x240] sm:$0xff]  ;;  %v3577_v32 = vpack.c.bf16 %v2285_v14, %v2284_v21  ;;  %v2272_v21 = vld [vmem:[%s6781_s2 + $0x350] sm:$0xff] }
 0x105   :  { %2566 = vmatprep.mubr.f32.mxu1 %v2097_v16  ;;  %3540 = vmatpush3.bf16.msra.mxu0 %v3539_v36  ;;  %v1291_v36 = vmul.f32 %v4758_v48, %v4802_v2  ;;  %v2286_v16 = vld [vmem:[%s6781_s2 + $0x3c0] sm:$0xff]  ;;  %v3551_v22 = vpack.c.bf16 %v2239_v50, %v2238_v60  ;;  %v2261_v60 = vld [vmem:[%s6781_s2 + $0x2f8] sm:$0xff] }
 0x106   :  { %2567 = vmatmul.mubr.f32.vlgmr.msra.gmra.mrb[0].mxu1 %v2096_v9  ;;  %v4912_v8 = vpop.permute.xlu1 %737  ;;  %v4916_v15 = vpop.permute.xlu0 %685  ;;  %3542 = vmatprep.subr.bf16.mxu0 %v3541_v33  ;;  %v2269_v9 = vld [vmem:[%s6781_s2 + $0x338] sm:$0xff] }
 0x107   :  { %3568 = vmatpush3.bf16.msra.mxu1 %v3567_v20  ;;  %v2287_v20 = vld [vmem:[%s6781_s2 + $0x3c8] sm:$0xff] }
 0x108   :  { %1121 = vrot.lane.b32.xlu1 %v1119_v40, %s3791_s24  ;;  %3570 = vmatprep.subr.bf16.mxu1 %v3569_v34  ;;  %v3579_v40 = vpack.c.bf16 %v2269_v9, %v2268_v17  ;;  %v3553_v34 = vpack.c.bf16 %v2257_v53, %v2256_v26  ;;  %v3581_v51 = vpack.c.bf16 %v2287_v20, %v2286_v16  ;;  %v2290_v17 = vld [vmem:[%s6781_s2 + $0x3e0] sm:$0xff]  ;;  %v2244_v16 = vld [vmem:[%s6781_s2 + $0x270] sm:$0xff]  ;;  %v2245_v20 = vld [vmem:[%s6781_s2 + $0x278] sm:$0xff] }
 0x109   :  { %1522 = vrot.lane.b32.xlu0 %v1520_v28, %s3791_s24  ;;  %3544 = vmatpush3.bf16.msra.mxu0 %v3543_v57  ;;  %v1528_v28 = vmul.f32 %v4862_v56, %v4784_v54  ;;  %v2258_v57 = vld [vmem:[%s6781_s2 + $0x2e0] sm:$0xff]  ;;  %v5019_v54 = vstv %s4945_s20  ;;  %s3130_s20 = sld [smem:[#allocation2 + $0x2b]] }
 0x10a   :  { %v4953_v7 = vpop.permute.xlu1 %974  ;;  %v4955_v11 = vpop.permute.xlu0 %795  ;;  %3546 = vmatprep.subr.bf16.mxu0 %v3545_v12  ;;  %v1470_v12 = vmul.f32 %v4591_v46, %v4990_v19  ;;  %v1189_v14 = vmul.f32 %v4758_v48, %v5019_v54  ;;  %v1128_v50 = vmul.f32 %v4591_v46, %v5019_v54 }
 0x10b   :  { %3572 = vmatpush3.bf16.msra.mxu1 %v3571_v31  ;;  %v2259_v31 = vld [vmem:[%s6781_s2 + $0x2e8] sm:$0xff] }
 0x10c   :  { %1235 = vrot.lane.b32.xlu1 %v1233_v59, %s3792_s5  ;;  %3574 = vmatprep.subr.bf16.mxu1 %v3573_v1  ;;  %v3555_v59 = vpack.c.bf16 %v2241_v39, %v2240_v62  ;;  %v3557_v10 = vpack.c.bf16 %v2259_v31, %v2258_v57  ;;  %v2275_v62 = vld [vmem:[%s6781_s2 + $0x368] sm:$0xff]  ;;  %v1241_v39 = vmul.f32 %v4591_v46, %v4868_v5 }
 0x10d   :  { %1183 = vrot.lane.b32.xlu0 %v1181_v45, %s3791_s24  ;;  %3548 = vmatpush3.bf16.msra.mxu0 %v3547_v41  ;;  %v2243_v45 = vld [vmem:[%s6781_s2 + $0x268] sm:$0xff]  ;;  %v3585_v41 = vpack.c.bf16 %v2289_v55, %v2288_v18  ;;  %v3563_v57 = vpack.c.bf16 %v2245_v20, %v2244_v16  ;;  %v1426_v18 = vmul.f32 %v4862_v56, %v5086_v49 }
 0x10e   :  { %v4987_v33 = vpop.permute.xlu1 %631  ;;  %v4992_v27 = vpop.permute.xlu0 %1032  ;;  %3550 = vmatprep.subr.bf16.mxu0 %v3549_v13  ;;  %v2260_v13 = vld [vmem:[%s6781_s2 + $0x2f0] sm:$0xff]  ;;  %v3559_v9 = vpack.c.bf16 %v2243_v45, %v2242_v24 }
 0x10f   :  { %3576 = vmatpush3.bf16.msra.mxu1 %v3575_v63  ;;  %v2273_v63 = vld [vmem:[%s6781_s2 + $0x358] sm:$0xff] }
 0x110   :  { %1420 = vrot.lane.b32.xlu1 %v1418_v25, %s3791_s24  ;;  %3578 = vmatprep.subr.bf16.mxu1 %v3577_v32  ;;  %v2291_v25 = vld [vmem:[%s6781_s2 + $0x3e8] sm:$0xff]  ;;  %v3587_v53 = vpack.c.bf16 %v2273_v63, %v2272_v21  ;;  %v5120_v63 = vstv %s3130_s20 }
 0x111   :  { %1293 = vrot.lane.b32.xlu0 %v1291_v36, %s3792_s5  ;;  %3552 = vmatpush3.bf16.msra.mxu0 %v3551_v22  ;;  %v3561_v36 = vpack.c.bf16 %v2261_v60, %v2260_v13  ;;  %v1299_v22 = vmul.f32 %v4591_v46, %v4809_v4  ;;  %v608_v60 = vstv %s3105_s15  ;;  %s5554_s15 = sld [smem:[#allocation2 + $0x39]] }
 0x112   :  { %v5029_v38 = vpop.permute.xlu1 %745  ;;  %v5031_v1 = vpop.permute.xlu0 %693  ;;  %3554 = vmatprep.subr.bf16.mxu0 %v3553_v34  ;;  %v2274_v34 = vld [vmem:[%s6781_s2 + $0x360] sm:$0xff] }
 0x113   :  { %3580 = vmatpush3.bf16.msra.mxu1 %v3579_v40  ;;  %v3589_v40 = vpack.c.bf16 %v2291_v25, %v2290_v17  ;;  %v1197_v17 = vmul.f32 %v4591_v46, %v5120_v63  ;;  %v1137_v25 = vmul.f32 %v4758_v48, %v5120_v63 }
 0x114   :  { %1530 = vrot.lane.b32.xlu1 %v1528_v28, %s3791_s24  ;;  %3582 = vmatprep.subr.bf16.mxu1 %v3581_v51  ;;  %v2292_v28 = vld [vmem:[%s6781_s2 + $0x3f0] sm:$0xff]  ;;  %v2293_v51 = vld [vmem:[%s6781_s2 + $0x3f8] sm:$0xff] }
 0x115   :  { %1472 = vrot.lane.b32.xlu0 %v1470_v12, %s3792_s5  ;;  %3556 = vmatpush3.bf16.msra.mxu0 %v3555_v59  ;;  %v3591_v12 = vpack.c.bf16 %v2275_v62, %v2274_v34  ;;  %v3593_v55 = vpack.c.bf16 %v2293_v51, %v2292_v28  ;;  %v2276_v59 = vld [vmem:[%s6781_s2 + $0x370] sm:$0xff]  ;;  %v1307_v62 = vmul.f32 %v4758_v48, %v4868_v5 }
 0x116   :  { %v5063_v32 = vpop.permute.xlu1 %930  ;;  %v5065_v26 = vpop.permute.xlu0 %803  ;;  %3558 = vmatprep.subr.bf16.mxu0 %v3557_v10  ;;  %v1364_v10 = vmul.f32 %v4776_v3, %v5086_v49  ;;  %v6874_v28 = vld [vmem:[#allocation9_spill] sm:$0xff] }
 0x117   :  { %3584 = vmatpush3.bf16.msra.mxu1 %v3583_v23  ;;  %v2277_v23 = vld [vmem:[%s6781_s2 + $0x378] sm:$0xff]  ;;  %v856_v51 = vmul.f32 %v4758_v48, %v6874_v28 }
 0x118   :  { %1191 = vrot.lane.b32.xlu1 %v1189_v14, %s3792_s5  ;;  %3586 = vmatprep.subr.bf16.mxu1 %v3585_v41  ;;  %v3595_v21 = vpack.c.bf16 %v2277_v23, %v2276_v59  ;;  %v1536_v14 = vmul.f32 %v4758_v48, %v4990_v19  ;;  %v1478_v41 = vmul.f32 %v4758_v48, %v4943_v47  ;;  %v1145_v19 = vstv %s5132_s30  ;;  %s5599_s30 = sld [smem:[#allocation2 + $0x3b]] }
 0x119   :  { %1130 = vrot.lane.b32.xlu0 %v1128_v50, %s3792_s5  ;;  %3560 = vmatpush3.bf16.msra.mxu0 %v3559_v9  ;;  %v609_v9 = vmul.f32 %v4591_v46, %v608_v60  ;;  %v5166_v23 = vmul.f32 %v4758_v48, %v608_v60  ;;  %v5238_v47 = vmul.f32 %v4862_v56, %v5120_v63 }
 0x11a   :  { %v5094_v35 = vpop.permute.xlu1 %1040  ;;  %v5096_v31 = vpop.permute.xlu0 %982  ;;  %3562 = vmatprep.subr.bf16.mxu0 %v3561_v36 }
 0x11b   :  { %3588 = vmatpush3.bf16.msra.mxu1 %v3587_v53  ;;  %v6871_v53 = vld [vmem:[#allocation8_spill] sm:$0xff] }
 0x11c   :  { %1301 = vrot.lane.b32.xlu1 %v1299_v22, %s3793_s11  ;;  %3590 = vmatprep.subr.bf16.mxu1 %v3589_v40  ;;  %v611_v36 = vmul.f32 %v4758_v48, %v6871_v53  ;;  %v853_v22 = vstv %s3114_s18  ;;  %v724_v40 = vmul.f32 %v4776_v3, %v608_v60  ;;  %v725_v34 = vmul.f32 %v4862_v56, %v6871_v53  ;;  %s5665_s18 = sld [smem:[#allocation2 + $0x43]] }
 0x11d   :  { %1243 = vrot.lane.b32.xlu0 %v1241_v39, %s3793_s11  ;;  %3564 = vmatpush3.bf16.msra.mxu0 %v3563_v57  ;;  %v854_v39 = vmul.f32 %v4591_v46, %v853_v22  ;;  %v1249_v57 = vmul.f32 %v4776_v3, %v5019_v54  ;;  %v5216_v2 = vmul.f32 %v4862_v56, %v853_v22 }
 0x11e   :  { %v5110_v24 = vpop.permute.xlu1 %701  ;;  %v5112_v45 = vpop.permute.xlu0 %640  ;;  %v5189_v4 = vadd.f32 %v725_v34, %v724_v40  ;;  %v6880_v40 = vld [vmem:[#allocation12_spill] sm:$0xff] }
 0x11f   :  { %3592 = vmatpush3.bf16.msra.mxu1 %v3591_v12  ;;  %v1372_v12 = vstv %s3138_s19  ;;  %v5208_v34 = vmul.f32 %v4862_v56, %v6880_v40  ;;  %v1205_v40 = vmul.f32 %v4758_v48, %v1145_v19 }
 0x120   :  { %1428 = vrot.lane.b32.xlu1 %v1426_v18, %s3791_s24  ;;  %3594 = vmatprep.subr.bf16.mxu1 %v3593_v55  ;;  %v5157_v18 = vadd.f32 %v611_v36, %v609_v9  ;;  %v6875_v55 = vld [vmem:[#allocation10_spill] sm:$0xff]  ;;  %v6878_v9 = vld [vmem:[#allocation11_spill] sm:$0xff]  ;;  %v1434_v36 = vmul.f32 %v4758_v48, %v1372_v12 }
 0x121   :  { %1366 = vrot.lane.b32.xlu0 %v1364_v10, %s3791_s24  ;;  %v5161_v59 = vmul.f32 %v4776_v3, %v6875_v55  ;;  %v5169_v10 = vmul.f32 %v4758_v48, %v853_v22  ;;  %v5185_v53 = vmul.f32 %v4862_v56, %v6878_v9  ;;  %6882 = vst [vmem:[#allocation11_spill] sm:$0xff] %v5216_v2 }
 0x122   :  { %v5122_v13 = vpop.permute.xlu1 %811  ;;  %v5124_v50 = vpop.permute.xlu0 %753 }
 0x123   :  { %6869 = vst [vmem:[#allocation13_spill] sm:$0xff] %v5122_v13  ;;  %6870 = vst [vmem:[#allocation16_spill] sm:$0xff] %v5124_v50  ;;  %3596 = vmatpush3.bf16.msra.mxu1 %v3595_v21  ;;  %v969_v21 = vmul.f32 %v4776_v3, %v853_v22  ;;  %v5231_v22 = vmul.f32 %v4862_v56, %v5019_v54  ;;  %v618_v54 = vrot.slane %v4788_v52, 2 }
 0x124   :  { %1538 = vrot.lane.b32.xlu1 %v1536_v14, %s3792_s5  ;;  %v970_v14 = vmul.f32 %v4862_v56, %v6874_v28  ;;  %v5191_v28 = vadd.f32 %v856_v51, %v854_v39  ;;  %v1381_v51 = vstv %s5139_s8 }
 0x125   :  { %1480 = vrot.lane.b32.xlu0 %v1478_v41, %s3792_s5 }
 0x126   :  { %v5137_v16 = vpop.permute.xlu1 %938  ;;  %v5141_v20 = vpop.permute.xlu0 %876 }
 0x127   :  { %6872 = vst [vmem:[#allocation18_spill] sm:$0xff] %v5137_v16  ;;  %6873 = vst [vmem:[#allocation22_spill] sm:$0xff] %v5141_v20  ;;  %v677_v20 = vrot.slane %v4818_v37, 2  ;;  %v863_v16 = vrot.slane %v4880_v61, 2 }
 0x128   :  { %1199 = vrot.lane.b32.xlu1 %v1197_v17, %s3793_s11  ;;  %v5177_v17 = vmul.f32 %v4862_v56, %v608_v60  ;;  %v1373_v60 = vmul.f32 %v4591_v46, %v1372_v12 }
 0x129   :  { %1139 = vrot.lane.b32.xlu0 %v1137_v25, %s3792_s5  ;;  %v5181_v25 = vmul.f32 %v4862_v56, %v6875_v55  ;;  %v6879_v55 = vld [vmem:[#allocation14_spill] sm:$0xff] }
 0x12a   :  { %v5163_v5 = vpop.permute.xlu1 %1048  ;;  %v5174_v41 = vpop.permute.xlu0 %990  ;;  %v5200_v9 = vmul.f32 %v4776_v3, %v6879_v55 }
 0x12b   :  { %6876 = vst [vmem:[#allocation8_spill] sm:$0xff] %v5163_v5  ;;  %6877 = vst [vmem:[#allocation9_spill] sm:$0xff] %v5174_v41  ;;  %v5253_v41 = vmul.f32 %v4758_v48, %v5086_v49  ;;  %v5260_v5 = vmul.f32 %v4776_v3, %v5120_v63  ;;  %v5277_v63 = vmul.f32 %v4862_v56, %v1372_v12 }
 0x12c   :  { %1309 = vrot.lane.b32.xlu1 %v1307_v62, %s3793_s11  ;;  %v5204_v62 = vmul.f32 %v4862_v56, %v6879_v55  ;;  %v1486_v55 = vmul.f32 %v4591_v46, %v5086_v49 }
 0x12d   :  { %1251 = vrot.lane.b32.xlu0 %v1249_v57, %s3792_s5  ;;  %v5213_v57 = vadd.f32 %v970_v14, %v969_v21  ;;  %v1146_v21 = vmul.f32 %v4591_v46, %v1145_v19  ;;  %v1390_v14 = vstv %s5149_s29  ;;  %6886 = vst [vmem:[#allocation26_spill] sm:$0xff] %v5260_v5  ;;  %6891 = vst [vmem:[#allocation31_spill] sm:$0xff] %v5277_v63  ;;  %v922_v63 = vrot.slane %v4878_v43, 2 }
 0x12e   :  { %v5210_v39 = vpop.permute.xlu1 %709  ;;  %v5218_v30 = vpop.permute.xlu0 %649  ;;  %v5270_v49 = vmul.f32 %v4758_v48, %v1390_v14  ;;  %v5274_v50 = vmul.f32 %v4591_v46, %v1390_v14  ;;  %v5280_v5 = vmul.f32 %v4862_v56, %v1381_v51  ;;  %v5283_v13 = vmul.f32 %v4776_v3, %v1390_v14 }
 0x12f   :  { %6881 = vst [vmem:[#allocation10_spill] sm:$0xff] %v5210_v39  ;;  %6883 = vst [vmem:[#allocation14_spill] sm:$0xff] %v5218_v30  ;;  %v5241_v30 = vmul.f32 %v4591_v46, %v1381_v51 }
 0x130   :  { %1436 = vrot.lane.b32.xlu1 %v1434_v36, %s3792_s5  ;;  %v5244_v36 = vmul.f32 %v4758_v48, %v1381_v51  ;;  %6889 = vst [vmem:[#allocation29_spill] sm:$0xff] %v5270_v49  ;;  %6890 = vst [vmem:[#allocation30_spill] sm:$0xff] %v5274_v50  ;;  %v914_v49 = vrot.slane %v4806_v58, 2  ;;  %v5293_v50 = vstv %s5196_s21 }
 0x131   :  { %1375 = vrot.lane.b32.xlu0 %v1373_v60, %s3792_s5  ;;  %v5256_v60 = vmul.f32 %v4776_v3, %v1372_v12  ;;  %6892 = vst [vmem:[#allocation32_spill] sm:$0xff] %v5280_v5  ;;  %6893 = vst [vmem:[#allocation33_spill] sm:$0xff] %v5283_v13  ;;  %v2310_v12 = vld [vmem:[%s6781_s2 + $0x480] sm:$0xff]  ;;  %v2311_v13 = vld [vmem:[%s6781_s2 + $0x488] sm:$0xff] }
 0x132   :  { %v5249_v39 = vpop.permute.xlu1 %819  ;;  %v5264_v2 = vpop.permute.xlu0 %761 }
 0x133   :  { %6884 = vst [vmem:[#allocation12_spill] sm:$0xff] %v5249_v39  ;;  %6885 = vst [vmem:[#allocation25_spill] sm:$0xff] %v5256_v60  ;;  %v5267_v39 = vmul.f32 %v4776_v3, %v1145_v19 }
 0x134   :  { %6887 = vst [vmem:[#allocation27_spill] sm:$0xff] %v5264_v2  ;;  %1546 = vrot.lane.b32.xlu1 %v1544_v0, %s3793_s11  ;;  %v670_v2 = vsel %vm126_vm0, %v4790_v44, %v669_v6  ;;  %v5290_v0 = vmul.f32 %v4862_v56, %v1145_v19  ;;  %v619_v44 = vsel %vm126_vm0, %v4788_v52, %v618_v54  ;;  %v731_v6 = vrot.slane %v4835_v42, 2 }
 0x135   :  { %6888 = vst [vmem:[#allocation28_spill] sm:$0xff] %v5267_v39  ;;  %1488 = vrot.lane.b32.xlu0 %v1486_v55, %s3793_s11  ;;  %v5307_v19 = vmul.f32 %v4862_v56, %v1390_v14  ;;  %v3597_v55 = vpack.c.bf16 %v2311_v13, %v2310_v12  ;;  %v864_v39 = vsel %vm126_vm0, %v4880_v61, %v863_v16  ;;  %v5317_v52 = vstv %s5224_s1  ;;  %v2342_v14 = vld [vmem:[%s6781_s2 + $0x580] sm:$0xff] }
 0x136   :  { %6894 = vst [vmem:[#allocation34_spill] sm:$0xff] %v5290_v0  ;;  %v5304_v5 = vpop.permute.xlu1 %946  ;;  %v678_v0 = vsel %vm126_vm0, %v4818_v37, %v677_v20  ;;  %v5314_v60 = vpop.permute.xlu0 %885  ;;  %6895 = vst [vmem:[#allocation35_spill] sm:$0xff] %v5317_v52  ;;  %v672_v54 = vadd.f32 %v670_v2, %v5166_v23  ;;  %v5322_v56 = vmul.f32 %v4776_v3, %v1381_v51  ;;  %v789_v16 = vrot.slane %v4833_v29, 2 }
 0x137   :  { %v5326_v13 = vmul.f32 %v4591_v46, %v5293_v50  ;;  %3598 = vmatprep.subr.bf16.mxu0 %v3597_v55  ;;  %v621_v37 = vadd.f32 %v619_v44, %v5157_v18  ;;  %v915_v61 = vsel %vm126_vm0, %v4806_v58, %v914_v49  ;;  %v5334_v2 = vstv %s5246_s7  ;;  %v5344_v18 = vld [vmem:[%s6779_s0] sm:$0x3f]  ;;  %v2343_v49 = vld [vmem:[%s6781_s2 + $0x588] sm:$0xff]  ;;  %s3123_s7 = sld [smem:[#allocation2 + $0x24]] }
 0x138   :  { %1207 = vrot.lane.b32.xlu1 %v1205_v40, %s3793_s11  ;;  %6896 = vst [vmem:[#allocation36_spill] sm:$0xff] %v5334_v2  ;;  %v680_v20 = vadd.f32 %v678_v0, %v672_v54  ;;  %v732_v23 = vsel %vm126_vm0, %v4835_v42, %v731_v6  ;;  %v866_v51 = vadd.f32 %v864_v39, %v5191_v28  ;;  %v687_v42 = vrot.slane %v4916_v15, 2 }
 0x139   :  { %1148 = vrot.lane.b32.xlu0 %v1146_v21, %s3793_s11  ;;  %v5348_v58 = vmul.f32 %v5344_v18, %v5317_v52  ;;  %v923_v40 = vsel %vm126_vm0, %v4878_v43, %v922_v63  ;;  %v739_v21 = vrot.slane %v4912_v8, 2  ;;  %v976_v28 = vrot.slane %v4953_v7, 2 }
 0x13a   :  { %v5339_v46 = vpop.permute.xlu1 %1056  ;;  %v5355_v39 = vpop.permute.xlu0 %998  ;;  %v917_v0 = vadd.f32 %v915_v61, %v5169_v10  ;;  %v797_v43 = vrot.slane %v4955_v11, 2  ;;  %v5369_v63 = vmul.f32 %v5344_v18, %v5334_v2  ;;  %v3629_v12 = vpack.c.bf16 %v2343_v49, %v2342_v14 }
 0x13b   :  { %v624_v44 = vadd.f32 %v5161_v59, %v621_v37  ;;  %v790_v6 = vsel %vm126_vm0, %v4833_v29, %v789_v16  ;;  %v5378_v10 = vmul.f32 %v4758_v48, %v5293_v50  ;;  %v734_v55 = vadd.f32 %v732_v23, %v5189_v4 }
 0x13c   :  { %1317 = vrot.lane.b32.xlu1 %v5231_v22, %s3792_s5  ;;  %v5382_v22 = vmul.f32 %v4776_v3, %v5317_v52  ;;  %v925_v54 = vadd.f32 %v923_v40, %v917_v0  ;;  %v869_v61 = vadd.f32 %v5200_v9, %v866_v51  ;;  %v682_v59 = vadd.f32 %v5181_v25, %v680_v20 }
 0x13d   :  { %1259 = vrot.lane.b32.xlu0 %v5238_v47, %s3792_s5  ;;  %3630 = vmatprep.subr.bf16.mxu1 %v3629_v12  ;;  %v740_v29 = vsel %vm151_vm1, %v4912_v8, %v739_v21  ;;  %v688_v48 = vsel %vm126_vm0, %v4916_v15, %v687_v42  ;;  %v977_v3 = vsel %vm126_vm0, %v4953_v7, %v976_v28  ;;  %v633_v47 = vrot.slane %v4987_v33, 2  ;;  %v6898_v12 = vld [vmem:[#allocation13_spill] sm:$0xff] }
 0x13e   :  { %v5387_v37 = vpop.permute.xlu1 %717  ;;  %v5396_v4 = vpop.permute.xlu0 %658  ;;  %v798_v9 = vsel %vm126_vm0, %v4955_v11, %v797_v43  ;;  %v1034_v25 = vrot.slane %v4992_v27, 2  ;;  %v747_v16 = vrot.slane %v5029_v38, 2  ;;  %v695_v20 = vrot.slane %v5031_v1, 2 }
 0x13f   :  { %v792_v8 = vadd.f32 %v790_v6, %v5177_v17  ;;  %v627_v15 = vadd.f32 %v5185_v53, %v624_v44  ;;  %v932_v7 = vrot.slane %v5063_v32, 2  ;;  %v805_v23 = vrot.slane %v5065_v26, 2 }
 0x140   :  { %1444 = vrot.lane.b32.xlu1 %v5241_v30, %s3793_s11  ;;  %v742_v11 = vadd.f32 %v740_v29, %v734_v55  ;;  %v690_v51 = vadd.f32 %v688_v48, %v682_v59  ;;  %v927_v40 = vadd.f32 %v5204_v62, %v925_v54  ;;  %v1042_v21 = vrot.slane %v5094_v35, 2  ;;  %v6901_v59 = vld [vmem:[#allocation18_spill] sm:$0xff] }
 0x141   :  { %1384 = vrot.lane.b32.xlu0 %v5244_v36, %s3792_s5  ;;  %v979_v30 = vadd.f32 %v977_v3, %v5213_v57  ;;  %v800_v17 = vadd.f32 %v798_v9, %v792_v8  ;;  %v634_v53 = vsel %vm126_vm0, %v4987_v33, %v633_v47  ;;  %v872_v28 = vadd.f32 %v5208_v34, %v869_v61 }
 0x142   :  { %v5413_v42 = vpop.permute.xlu1 %827  ;;  %v5419_v14 = vpop.permute.xlu0 %769  ;;  %v1035_v36 = vsel %vm126_vm0, %v4992_v27, %v1034_v25  ;;  %v748_v62 = vsel %vm151_vm1, %v5029_v38, %v747_v16  ;;  %v696_v49 = vsel %vm126_vm0, %v5031_v1, %v695_v20  ;;  %v984_v0 = vrot.slane %v5096_v31, 2  ;;  %v6897_v38 = vld [vmem:[#allocation25_spill] sm:$0xff]  ;;  %v6903_v16 = vld [vmem:[#allocation26_spill] sm:$0xff] }
 0x143   :  { %v933_v33 = vsel %vm126_vm0, %v5063_v32, %v932_v7  ;;  %v806_v34 = vsel %vm151_vm1, %v5065_v26, %v805_v23  ;;  %v703_v57 = vrot.slane %v5110_v24, 2  ;;  %v642_v27 = vrot.slane %v5112_v45, 2  ;;  %v6900_v32 = vld [vmem:[#allocation11_spill] sm:$0xff]  ;;  %v6904_v7 = vld [vmem:[#allocation8_spill] sm:$0xff] }
 0x144   :  { %1554 = vrot.lane.b32.xlu1 %v5253_v41, %s3793_s11  ;;  %v636_v43 = vadd.f32 %v634_v53, %v627_v15  ;;  %v1043_v1 = vsel %vm126_vm0, %v5094_v35, %v1042_v21  ;;  %v813_v44 = vrot.slane %v6898_v12, 2  ;;  %v6899_v41 = vld [vmem:[#allocation16_spill] sm:$0xff]  ;;  %v1037_v54 = vadd.f32 %v1035_v36, %v6900_v32  ;;  %v6902_v35 = vld [vmem:[#allocation22_spill] sm:$0xff] }
 0x145   :  { %1496 = vrot.lane.b32.xlu0 %v6897_v38, %s3792_s5  ;;  %v755_v6 = vrot.slane %v6899_v41, 2  ;;  %v750_v26 = vadd.f32 %v748_v62, %v742_v11  ;;  %v698_v61 = vadd.f32 %v696_v49, %v690_v51  ;;  %v940_v29 = vrot.slane %v6901_v59, 2  ;;  %v6905_v11 = vld [vmem:[#allocation28_spill] sm:$0xff]  ;;  %v6908_v62 = vld [vmem:[#allocation14_spill] sm:$0xff] }
 0x146   :  { %v5442_v55 = vpop.permute.xlu1 %954  ;;  %v5446_v48 = vpop.permute.xlu0 %894  ;;  %v935_v3 = vadd.f32 %v933_v33, %v927_v40  ;;  %v808_v47 = vadd.f32 %v806_v34, %v800_v17  ;;  %v985_v9 = vsel %vm151_vm1, %v5096_v31, %v984_v0  ;;  %v878_v25 = vrot.slane %v6902_v35, 2  ;;  %v6906_v40 = vld [vmem:[#allocation9_spill] sm:$0xff]  ;;  %v6907_v17 = vld [vmem:[#allocation10_spill] sm:$0xff]  ;;  %v6909_v0 = vld [vmem:[#allocation12_spill] sm:$0xff] }
 0x147   :  { %v1045_v20 = vadd.f32 %v1043_v1, %v1037_v54  ;;  %v704_v8 = vsel %vm151_vm1, %v5110_v24, %v703_v57  ;;  %v643_v15 = vsel %vm151_vm1, %v5112_v45, %v642_v27  ;;  %v1050_v23 = vrot.slane %v6904_v7, 2  ;;  %v6910_v1 = vld [vmem:[#allocation27_spill] sm:$0xff]  ;;  %v6912_v54 = vld [vmem:[#allocation30_spill] sm:$0xff] }
 0x148   :  { %1325 = vrot.lane.b32.xlu1 %v6903_v16, %s3793_s11  ;;  %v814_v31 = vsel %vm170_vm2, %v6898_v12, %v813_v44  ;;  %v756_v51 = vsel %vm170_vm2, %v6899_v41, %v755_v6  ;;  %v992_v21 = vrot.slane %v6906_v40, 2  ;;  %v711_v53 = vrot.slane %v6907_v17, 2  ;;  %v6911_v44 = vld [vmem:[#allocation29_spill] sm:$0xff] }
 0x149   :  { %1267 = vrot.lane.b32.xlu0 %v6905_v11, %s3793_s11  ;;  %v987_v24 = vadd.f32 %v985_v9, %v979_v30  ;;  %v941_v45 = vsel %vm126_vm0, %v6901_v59, %v940_v29  ;;  %v651_v49 = vrot.slane %v6908_v62, 2  ;;  %v821_v33 = vrot.slane %v6909_v0, 2 }
 0x14a   :  { %v5466_v36 = vpop.permute.xlu1 %1064  ;;  %v5472_v34 = vpop.permute.xlu0 %1006  ;;  %v706_v57 = vadd.f32 %v704_v8, %v698_v61  ;;  %v645_v27 = vadd.f32 %v643_v15, %v636_v43  ;;  %v879_v38 = vsel %vm126_vm0, %v6902_v35, %v878_v25  ;;  %v763_v12 = vrot.slane %v6910_v1, 2 }
 0x14b   :  { %v816_v30 = vadd.f32 %v814_v31, %v808_v47  ;;  %v758_v41 = vadd.f32 %v756_v51, %v750_v26  ;;  %v1051_v6 = vsel %vm151_vm1, %v6904_v7, %v1050_v23  ;;  %v948_v32 = vrot.slane %v5304_v5, 2  ;;  %v6913_v23 = vld [vmem:[#allocation31_spill] sm:$0xff] }
 0x14c   :  { %1452 = vrot.lane.b32.xlu1 %v6911_v44, %s3793_s11  ;;  %v943_v61 = vadd.f32 %v941_v45, %v935_v3  ;;  %v993_v43 = vsel %vm151_vm1, %v6906_v40, %v992_v21  ;;  %v712_v59 = vsel %vm170_vm2, %v6907_v17, %v711_v53  ;;  %v887_v29 = vrot.slane %v5314_v60, 2  ;;  %v6914_v40 = vld [vmem:[#allocation32_spill] sm:$0xff] }
 0x14d   :  { %1393 = vrot.lane.b32.xlu0 %v6912_v54, %s3793_s11  ;;  %v881_v47 = vadd.f32 %v879_v38, %v872_v28  ;;  %v652_v26 = vsel %vm151_vm1, %v6908_v62, %v651_v49  ;;  %v822_v35 = vsel %vm170_vm2, %v6909_v0, %v821_v33  ;;  %v719_v25 = vrot.slane %v5387_v37, 2  ;;  %v6915_v38 = vld [vmem:[#allocation33_spill] sm:$0xff] }
 0x14e   :  { %v836_v9 = vpop.permute.xlu1 %835  ;;  %v778_v16 = vpop.permute.xlu0 %777  ;;  %v1053_v3 = vadd.f32 %v1051_v6, %v1045_v20  ;;  %v764_v8 = vsel %vm151_vm1, %v6910_v1, %v763_v12  ;;  %v660_v15 = vrot.slane %v5396_v4, 2  ;;  %v771_v7 = vrot.slane %v5419_v14, 2 }
 0x14f   :  { %v995_v28 = vadd.f32 %v993_v43, %v987_v24  ;;  %v714_v11 = vadd.f32 %v712_v59, %v706_v57  ;;  %v949_v31 = vsel %vm151_vm1, %v5304_v5, %v948_v32  ;;  %v1058_v51 = vrot.slane %v5339_v46, 2 }
 0x150   :  { %1562 = vrot.lane.b32.xlu1 %v6913_v23, %s3792_s5  ;;  %v654_v20 = vadd.f32 %v652_v26, %v645_v27  ;;  %v824_v21 = vadd.f32 %v822_v35, %v816_v30  ;;  %v888_v17 = vsel %vm151_vm1, %v5314_v60, %v887_v29  ;;  %v1000_v53 = vrot.slane %v5355_v39, 2  ;;  %v6916_v30 = vld [vmem:[#allocation34_spill] sm:$0xff] }
 0x151   :  { %1504 = vrot.lane.b32.xlu0 %v6914_v40, %s3792_s5  ;;  %v766_v62 = vadd.f32 %v764_v8, %v758_v41  ;;  %v720_v24 = vsel %vm170_vm2, %v5387_v37, %v719_v25  ;;  %v829_v49 = vrot.slane %v5413_v42, 2  ;;  %v779_v5 = vrot.slane %v778_v16, 2 }
 0x152   :  { %v963_v45 = vpop.permute.xlu1 %962  ;;  %v904_v0 = vpop.permute.xlu0 %903  ;;  %v951_v33 = vadd.f32 %v949_v31, %v943_v61  ;;  %v661_v57 = vsel %vm170_vm2, %v5396_v4, %v660_v15  ;;  %v772_v27 = vsel %vm151_vm1, %v5419_v14, %v771_v7  ;;  %v956_v60 = vrot.slane %v5442_v55, 2 }
 0x153   :  { %v890_v1 = vadd.f32 %v888_v17, %v881_v47  ;;  %v1059_v37 = vsel %vm170_vm2, %v5339_v46, %v1058_v51  ;;  %v896_v12 = vrot.slane %v5446_v48, 2  ;;  %v1066_v44 = vrot.slane %v5466_v36, 2 }
 0x154   :  { %1512 = vrot.lane.b32.xlu1 %v6915_v38, %s3793_s11  ;;  %v1001_v4 = vsel %vm170_vm2, %v5355_v39, %v1000_v53  ;;  %v722_v14 = vadd.f32 %v720_v24, %v714_v11  ;;  %v1008_v41 = vrot.slane %v5472_v34, 2  ;;  %v837_v6 = vrot.slane %v836_v9, 2 }
 0x155   :  { %1333 = vrot.lane.b32.xlu0 %v6916_v30, %s3793_s11  ;;  %v663_v54 = vadd.f32 %v661_v57, %v654_v20  ;;  %v830_v61 = vsel %vm151_vm1, %v5413_v42, %v829_v49  ;;  %v774_v46 = vadd.f32 %v772_v27, %v766_v62  ;;  %v780_v43 = vsel %vm170_vm2, %v778_v16, %v779_v5  ;;  %v5568_v57 = vld [vmem:[%s6779_s0 + $0xc] sm:$0x3f] }
 0x156   :  { %v1073_v32 = vpop.permute.xlu1 %1072  ;;  %v1015_v59 = vpop.permute.xlu0 %1014  ;;  %v957_v29 = vsel %vm170_vm2, %v5442_v55, %v956_v60  ;;  %v964_v47 = vrot.slane %v963_v45, 2  ;;  %v905_v26 = vrot.slane %v904_v0, 2  ;;  %v1061_v39 = vadd.f32 %v1059_v37, %v1053_v3 }
 0x157   :  { %v1016_v35 = vrot.slane %v1015_v59, 2  ;;  %v1003_v25 = vadd.f32 %v1001_v4, %v995_v28  ;;  %v897_v42 = vsel %vm151_vm1, %v5446_v48, %v896_v12  ;;  %v1067_v16 = vsel %vm170_vm2, %v5466_v36, %v1066_v44 }
 0x158   :  { %1578 = vrot.lane.b32.xlu1 %v5307_v19, %s3793_s11  ;;  %v1009_v55 = vsel %vm151_vm1, %v5472_v34, %v1008_v41  ;;  %v838_v19 = vsel %vm170_vm2, %v836_v9, %v837_v6  ;;  %v782_v8 = vadd.f32 %v780_v43, %v774_v46  ;;  %v1074_v15 = vrot.slane %v1073_v32, 2 }
 0x159   :  { %1570 = vrot.lane.b32.xlu0 %v5322_v56, %s3793_s11  ;;  %v723_v7 = vmax.f32 %v663_v54, %v722_v14  ;;  %v832_v23 = vadd.f32 %v830_v61, %v824_v21  ;;  %v959_v28 = vadd.f32 %v957_v29, %v951_v33  ;;  %v965_v36 = vsel %vm170_vm2, %v963_v45, %v964_v47 }
 0x15a   :  { %v1023_v3 = vpop.permute.xlu1 %1022  ;;  %v844_v11 = vpop.permute.xlu0 %843  ;;  %v906_v31 = vsel %vm170_vm2, %v904_v0, %v905_v26  ;;  %v1017_v56 = vsel %vm151_vm1, %v1015_v59, %v1016_v35  ;;  %v899_v34 = vadd.f32 %v897_v42, %v890_v1  ;;  %v1069_v9 = vadd.f32 %v1067_v16, %v1061_v39  ;;  %v2294_v26 = vld [vmem:[%s6781_s2 + $0x400] sm:$0xff]  ;;  %v2295_v35 = vld [vmem:[%s6781_s2 + $0x408] sm:$0xff] }
 0x15b   :  { %v1024_v48 = vrot.slane %v1023_v3, 2  ;;  %v845_v51 = vrot.slane %v844_v11, 2  ;;  %v1011_v40 = vadd.f32 %v1009_v55, %v1003_v25  ;;  %v840_v20 = vadd.f32 %v838_v19, %v832_v23  ;;  %v6919_v42 = vld [vmem:[#allocation17_spill] sm:$0xff]  ;;  %v2313_v19 = vld [vmem:[%s6781_s2 + $0x498] sm:$0xff] }
 0x15c   :  { %1596 = vrot.lane.b32.xlu1 %v5326_v13, %s3791_s24  ;;  %v783_v21 = vmax.f32 %v723_v7, %v782_v8  ;;  %v1075_v17 = vsel %vm151_vm1, %v1073_v32, %v1074_v15  ;;  %v967_v13 = vadd.f32 %v965_v36, %v959_v28  ;;  %v908_v24 = vadd.f32 %v906_v31, %v899_v34  ;;  %v2312_v55 = vld [vmem:[%s6781_s2 + $0x490] sm:$0xff] }
 0x15d   :  { %1647 = vrot.lane.b32.xlu0 %v5348_v58, %s3791_s24  ;;  %v1025_v53 = vsel %vm170_vm2, %v1023_v3, %v1024_v48  ;;  %v846_v45 = vsel %vm170_vm2, %v844_v11, %v845_v51  ;;  %v1019_v49 = vadd.f32 %v1017_v56, %v1011_v40  ;;  %v1707_v27 = vmul.f32 %v5568_v57, %v5293_v50  ;;  %v2296_v31 = vld [vmem:[%s6781_s2 + $0x410] sm:$0xff]  ;;  %v2297_v56 = vld [vmem:[%s6781_s2 + $0x418] sm:$0xff]  ;;  %v2326_v51 = vld [vmem:[%s6781_s2 + $0x500] sm:$0xff] }
 0x15e   :  { %v1089_v62 = vpop.permute.xlu1 %1088  ;;  %v848_v58 = vadd.f32 %v846_v45, %v840_v20  ;;  %v1081_v5 = vpop.permute.xlu0 %1080  ;;  %v850_v60 = vstv %s5534_s12  ;;  %v1077_v38 = vadd.f32 %v1075_v17, %v1069_v9  ;;  %v5576_v12 = vstv %s5542_s13  ;;  %v2327_v9 = vld [vmem:[%s6781_s2 + $0x508] sm:$0xff]  ;;  %v2314_v40 = vld [vmem:[%s6781_s2 + $0x4a0] sm:$0xff]  ;;  %s5816_s12 = sld [smem:[#allocation2 + $0x44]] }
 0x15f   :  { %v1090_v0 = vrot.slane %v1089_v62, 2  ;;  %v1082_v33 = vrot.slane %v1081_v5, 2  ;;  %v1027_v1 = vadd.f32 %v1025_v53, %v1019_v49  ;;  %v968_v30 = vmax.f32 %v908_v24, %v967_v13  ;;  %v2315_v20 = vld [vmem:[%s6781_s2 + $0x4a8] sm:$0xff]  ;;  %v2345_v13 = vld [vmem:[%s6781_s2 + $0x598] sm:$0xff] }
 0x160   :  { %1892 = vrot.lane.b32.xlu1 %v5369_v63, %s3791_s24  ;;  %v849_v37 = vmax.f32 %v783_v21, %v848_v58  ;;  %v1839_v54 = vmul.f32 %v5344_v18, %v5576_v12  ;;  %v5597_v59 = vstv %s5554_s15  ;;  %v5604_v29 = vstv %s5559_s27  ;;  %v5657_v21 = vld [vmem:[%s6779_s0 + $0x12] sm:$0x3f]  ;;  %s5709_s27 = sld [smem:[#allocation2 + $0x42]] }
 0x161   :  { %1655 = vrot.lane.b32.xlu0 %v5378_v10, %s3791_s24  ;;  %v1083_v63 = vsel %vm170_vm2, %v1081_v5, %v1082_v33  ;;  %v1091_v6 = vsel %vm170_vm2, %v1089_v62, %v1090_v0  ;;  %v5589_v10 = vld [vmem:[%s6779_s0 + $0x6] sm:$0x3f]  ;;  %v1028_v61 = vmax.f32 %v968_v30, %v1027_v1  ;;  %6917 = vst [vmem:[#allocation25_spill] sm:$0xff] %v5597_v59  ;;  %6918 = vst [vmem:[#allocation13_spill] sm:$0xff] %v5604_v29  ;;  %v2344_v62 = vld [vmem:[%s6781_s2 + $0x590] sm:$0xff] }
 0x162   :  { %v5579_v44 = vpop.permute.xlu1 %1106  ;;  %v1085_v4 = vadd.f32 %v1083_v63, %v1077_v38  ;;  %v5581_v14 = vpop.permute.xlu0 %1157  ;;  %v851_v41 = vadd.f32 %v850_v60, %v849_v37  ;;  %v1898_v32 = vmul.f32 %v5589_v10, %v5576_v12  ;;  %v1095_v47 = vstv %s5561_s10  ;;  %v2298_v33 = vld [vmem:[%s6781_s2 + $0x420] sm:$0xff]  ;;  %v2328_v60 = vld [vmem:[%s6781_s2 + $0x510] sm:$0xff]  ;;  %v2329_v37 = vld [vmem:[%s6781_s2 + $0x518] sm:$0xff] }
 0x163   :  { %v1715_v8 = vmul.f32 %v5344_v18, %v5597_v59  ;;  %v1663_v3 = vmul.f32 %v5568_v57, %v5604_v29  ;;  %v3599_v23 = vpack.c.bf16 %v2295_v35, %v2294_v26  ;;  %v3601_v48 = vpack.c.bf16 %v2313_v19, %v2312_v55  ;;  %v2316_v63 = vld [vmem:[%s6781_s2 + $0x4b0] sm:$0xff]  ;;  %v2317_v30 = vld [vmem:[%s6781_s2 + $0x4b8] sm:$0xff]  ;;  %v2330_v35 = vld [vmem:[%s6781_s2 + $0x520] sm:$0xff] }
 0x164   :  { %1767 = vrot.lane.b32.xlu1 %v5382_v22, %s3791_s24  ;;  %v1093_v46 = vadd.f32 %v1091_v6, %v1085_v4  ;;  %v852_v43 = vmax.f32 %v851_v41, 0.0  ;;  %v1952_v34 = vmul.f32 %v5568_v57, %v5576_v12  ;;  %v1773_v17 = vmul.f32 %v5657_v21, %v5293_v50  ;;  %v2346_v41 = vld [vmem:[%s6781_s2 + $0x5a0] sm:$0xff]  ;;  %v2347_v6 = vld [vmem:[%s6781_s2 + $0x5a8] sm:$0xff]  ;;  %v2301_v26 = vld [vmem:[%s6781_s2 + $0x438] sm:$0xff] }
 0x165   :  { %1709 = vrot.lane.b32.xlu0 %v1707_v27, %s3791_s24  ;;  %v5663_v45 = vstv %s5599_s30  ;;  %v3603_v49 = vpack.c.bf16 %v2297_v56, %v2296_v31  ;;  %v3631_v5 = vpack.c.bf16 %v2327_v9, %v2326_v51  ;;  %v3605_v0 = vpack.c.bf16 %v2315_v20, %v2314_v40  ;;  %v2299_v27 = vld [vmem:[%s6781_s2 + $0x428] sm:$0xff]  ;;  %v2318_v19 = vld [vmem:[%s6781_s2 + $0x4c0] sm:$0xff] }
 0x166   :  { %v5601_v22 = vpop.permute.xlu1 %1402  ;;  %v1094_v39 = vmax.f32 %v1028_v61, %v1093_v46  ;;  %v5613_v25 = vpop.permute.xlu0 %1165  ;;  %v2107_v16 = vrot.slane %v852_v43, %v6919_v42  ;;  %v1609_v38 = vmul.f32 %v5568_v57, %v5663_v45  ;;  %v3633_v1 = vpack.c.bf16 %v2345_v13, %v2344_v62  ;;  %v2331_v55 = vld [vmem:[%s6781_s2 + $0x528] sm:$0xff]  ;;  %v2332_v40 = vld [vmem:[%s6781_s2 + $0x530] sm:$0xff]  ;;  %v2321_v13 = vld [vmem:[%s6781_s2 + $0x4d8] sm:$0xff] }
 0x167   :  { %v2010_v4 = vmul.f32 %v5568_v57, %v5334_v2  ;;  %v3635_v46 = vpack.c.bf16 %v2329_v37, %v2328_v60  ;;  %v3609_v43 = vpack.c.bf16 %v2317_v30, %v2316_v63  ;;  %v3639_v56 = vpack.c.bf16 %v2331_v55, %v2330_v35  ;;  %v2303_v9 = vld [vmem:[%s6781_s2 + $0x448] sm:$0xff]  ;;  %v2320_v62 = vld [vmem:[%s6781_s2 + $0x4d0] sm:$0xff]  ;;  %v2305_v63 = vld [vmem:[%s6781_s2 + $0x458] sm:$0xff] }
 0x168   :  { %1900 = vrot.lane.b32.xlu1 %v1898_v32, %s3791_s24  ;;  %v2108_v15 = vcombine.high %v2107_v16, %v2107_v16  ;;  %v1096_v7 = vadd.f32 %v1095_v47, %v1094_v39  ;;  %v2300_v47 = vld [vmem:[%s6781_s2 + $0x430] sm:$0xff]  ;;  %v1723_v39 = vmul.f32 %v5589_v10, %v5604_v29  ;;  %v2334_v30 = vld [vmem:[%s6781_s2 + $0x540] sm:$0xff] }
 0x169   :  { %1841 = vrot.lane.b32.xlu0 %v1839_v54, %s3791_s24  ;;  %v3607_v54 = vpack.c.bf16 %v2299_v27, %v2298_v33  ;;  %v5785_v33 = vstv %s5709_s27  ;;  %v2304_v37 = vld [vmem:[%s6781_s2 + $0x450] sm:$0xff] }
 0x16a   :  { %v5628_v28 = vpop.permute.xlu1 %1277  ;;  %v5630_v11 = vpop.permute.xlu0 %1219  ;;  %2636 = vmatprep.mubr.f32.mxu0 %v2108_v15  ;;  %v1097_v36 = vmax.f32 %v1096_v7, 0.0  ;;  %v1671_v15 = vmul.f32 %v5657_v21, %v5663_v45  ;;  %v2348_v7 = vld [vmem:[%s6781_s2 + $0x5b0] sm:$0xff]  ;;  %6921 = vst [vmem:[#allocation11_spill] sm:$0xff] %v5785_v33 }
 0x16b   :  { %2637 = vmatmul.mubr.f32.vlgmr.msra.gmra.mrb[2].mxu0 %v2107_v16  ;;  %v3637_v16 = vpack.c.bf16 %v2347_v6, %v2346_v41  ;;  %v2335_v6 = vld [vmem:[%s6781_s2 + $0x548] sm:$0xff] }
 0x16c   :  { %1717 = vrot.lane.b32.xlu1 %v1715_v8, %s3792_s5  ;;  %v2118_v53 = vrot.slane %v1097_v36, %v6919_v42  ;;  %3600 = vmatpush3.bf16.msra.mxu0 %v3599_v23  ;;  %v2319_v8 = vld [vmem:[%s6781_s2 + $0x4c8] sm:$0xff]  ;;  %v2349_v23 = vld [vmem:[%s6781_s2 + $0x5b8] sm:$0xff]  ;;  %v3611_v36 = vpack.c.bf16 %v2301_v26, %v2300_v47  ;;  %v2352_v47 = vld [vmem:[%s6781_s2 + $0x5d0] sm:$0xff]  ;;  %v3647_v55 = vpack.c.bf16 %v2335_v6, %v2334_v30 }
 0x16d   :  { %1665 = vrot.lane.b32.xlu0 %v1663_v3, %s3791_s24  ;;  %3602 = vmatprep.subr.bf16.mxu0 %v3601_v48  ;;  %v5738_v3 = vstv %s5665_s18  ;;  %v3613_v51 = vpack.c.bf16 %v2319_v8, %v2318_v19  ;;  %v2353_v26 = vld [vmem:[%s6781_s2 + $0x5d8] sm:$0xff]  ;;  %v2306_v8 = vld [vmem:[%s6781_s2 + $0x460] sm:$0xff] }
 0x16e   :  { %v5673_v24 = vpop.permute.xlu1 %1410  ;;  %v5675_v50 = vpop.permute.xlu0 %1351  ;;  %v2119_v58 = vcombine.high %v2118_v53, %v2118_v53  ;;  %6920 = vst [vmem:[#allocation16_spill] sm:$0xff] %v5738_v3  ;;  %v1908_v20 = vmul.f32 %v5568_v57, %v5738_v3  ;;  %v5881_v30 = vstv %s5816_s12 }
 0x170   :  { %1954 = vrot.lane.b32.xlu1 %v1952_v34, %s3791_s24  ;;  %2706 = vmatprep.mubr.f32.mxu1 %v2119_v58  ;;  %v2302_v34 = vld [vmem:[%s6781_s2 + $0x440] sm:$0xff] }
 0x171   :  { %1775 = vrot.lane.b32.xlu0 %v1773_v17, %s3791_s24  ;;  %2707 = vmatmul.mubr.f32.vlgmr.msra.gmra.mrb[2].mxu1 %v2118_v53  ;;  %v3641_v17 = vpack.c.bf16 %v2349_v23, %v2348_v7  ;;  %v2333_v53 = vld [vmem:[%s6781_s2 + $0x538] sm:$0xff]  ;;  %v2350_v58 = vld [vmem:[%s6781_s2 + $0x5c0] sm:$0xff]  ;;  %v3615_v27 = vpack.c.bf16 %v2303_v9, %v2302_v34  ;;  %v2336_v7 = vld [vmem:[%s6781_s2 + $0x550] sm:$0xff] }
 0x172   :  { %v5707_v32 = vpop.permute.xlu1 %1227  ;;  %3604 = vmatpush3.bf16.msra.mxu0 %v3603_v49  ;;  %v5711_v61 = vpop.permute.xlu0 %1175  ;;  %3632 = vmatpush3.bf16.msra.mxu1 %v3631_v5  ;;  %v1781_v49 = vmul.f32 %v5589_v10, %v5597_v59  ;;  %v2351_v5 = vld [vmem:[%s6781_s2 + $0x5c8] sm:$0xff]  ;;  %v2325_v34 = vld [vmem:[%s6781_s2 + $0x4f8] sm:$0xff] }
 0x173   :  { %3606 = vmatprep.subr.bf16.mxu0 %v3605_v0  ;;  %3634 = vmatprep.subr.bf16.mxu1 %v3633_v1  ;;  %v3617_v1 = vpack.c.bf16 %v2321_v13, %v2320_v62  ;;  %v3645_v41 = vpack.c.bf16 %v2351_v5, %v2350_v58  ;;  %v2308_v58 = vld [vmem:[%s6781_s2 + $0x470] sm:$0xff]  ;;  %v2309_v5 = vld [vmem:[%s6781_s2 + $0x478] sm:$0xff] }
 0x174   :  { %1611 = vrot.lane.b32.xlu1 %v1609_v38, %s3791_s24  ;;  %v3643_v38 = vpack.c.bf16 %v2333_v53, %v2332_v40  ;;  %v2354_v40 = vld [vmem:[%s6781_s2 + $0x5e0] sm:$0xff] }
 0x175   :  { %2012 = vrot.lane.b32.xlu0 %v2010_v4, %s3791_s24  ;;  %v2018_v4 = vmul.f32 %v5657_v21, %v5576_v12  ;;  %v5814_v12 = vstv %s5740_s26  ;;  %s3148_s26 = sld [smem:[#allocation2 + $0x3d]] }
 0x176   :  { %v5748_v48 = vpop.permute.xlu1 %1464  ;;  %3608 = vmatpush3.bf16.msra.mxu0 %v3607_v54  ;;  %v5750_v31 = vpop.permute.xlu0 %1285  ;;  %3636 = vmatpush3.bf16.msra.mxu1 %v3635_v46  ;;  %v2322_v54 = vld [vmem:[%s6781_s2 + $0x4e0] sm:$0xff]  ;;  %v2323_v46 = vld [vmem:[%s6781_s2 + $0x4e8] sm:$0xff]  ;;  %v1679_v23 = vmul.f32 %v5589_v10, %v5814_v12  ;;  %v1618_v9 = vmul.f32 %v5344_v18, %v5814_v12 }
 0x177   :  { %3610 = vmatprep.subr.bf16.mxu0 %v3609_v43  ;;  %3638 = vmatprep.subr.bf16.mxu1 %v3637_v16  ;;  %v1960_v43 = vmul.f32 %v5344_v18, %v5785_v33  ;;  %v3621_v19 = vpack.c.bf16 %v2323_v46, %v2322_v54  ;;  %v3627_v54 = vpack.c.bf16 %v2309_v5, %v2308_v58  ;;  %v5937_v5 = vstv %s3156_s23 }
 0x178   :  { %1725 = vrot.lane.b32.xlu1 %v1723_v39, %s3792_s5  ;;  %v3619_v39 = vpack.c.bf16 %v2305_v63, %v2304_v37  ;;  %v2339_v37 = vld [vmem:[%s6781_s2 + $0x568] sm:$0xff]  ;;  %v1731_v63 = vmul.f32 %v5344_v18, %v5663_v45  ;;  %v1739_v58 = vmul.f32 %v5568_v57, %v5814_v12 }
 0x179   :  { %1673 = vrot.lane.b32.xlu0 %v1671_v15, %s3791_s24  ;;  %v2307_v15 = vld [vmem:[%s6781_s2 + $0x468] sm:$0xff] }
 0x17a   :  { %v5782_v0 = vpop.permute.xlu1 %1121  ;;  %3612 = vmatpush3.bf16.msra.mxu0 %v3611_v36  ;;  %3640 = vmatpush3.bf16.msra.mxu1 %v3639_v56  ;;  %v3649_v36 = vpack.c.bf16 %v2353_v26, %v2352_v47  ;;  %v2337_v56 = vld [vmem:[%s6781_s2 + $0x558] sm:$0xff]  ;;  %v3623_v53 = vpack.c.bf16 %v2307_v15, %v2306_v8  ;;  %v1916_v47 = vmul.f32 %v5657_v21, %v5881_v30 }
 0x17b   :  { %v5787_v60 = vpop.permute.xlu0 %1522  ;;  %3614 = vmatprep.subr.bf16.mxu0 %v3613_v51  ;;  %3642 = vmatprep.subr.bf16.mxu1 %v3641_v17  ;;  %v2324_v51 = vld [vmem:[%s6781_s2 + $0x4f0] sm:$0xff]  ;;  %v3651_v13 = vpack.c.bf16 %v2337_v56, %v2336_v7  ;;  %v5915_v56 = vstv %s3148_s26  ;;  %s6314_s26 = sld [smem:[#allocation2 + $0x3f]] }
 0x17c   :  { %1910 = vrot.lane.b32.xlu1 %v1908_v20, %s3791_s24  ;;  %v2355_v20 = vld [vmem:[%s6781_s2 + $0x5e8] sm:$0xff] }
 0x17d   :  { %1783 = vrot.lane.b32.xlu0 %v1781_v49, %s3792_s5  ;;  %v3625_v49 = vpack.c.bf16 %v2325_v34, %v2324_v51 }
 0x17e   :  { %v5824_v35 = vpop.permute.xlu1 %1235  ;;  %3616 = vmatpush3.bf16.msra.mxu0 %v3615_v27  ;;  %3644 = vmatpush3.bf16.msra.mxu1 %v3643_v38  ;;  %v1789_v27 = vmul.f32 %v5344_v18, %v5604_v29  ;;  %v3653_v38 = vpack.c.bf16 %v2355_v20, %v2354_v40  ;;  %v1627_v40 = vmul.f32 %v5589_v10, %v5915_v56 }
 0x17f   :  { %v5826_v16 = vpop.permute.xlu0 %1183  ;;  %3618 = vmatprep.subr.bf16.mxu0 %v3617_v1  ;;  %3646 = vmatprep.subr.bf16.mxu1 %v3645_v41  ;;  %v2338_v1 = vld [vmem:[%s6781_s2 + $0x560] sm:$0xff]  ;;  %v2357_v41 = vld [vmem:[%s6781_s2 + $0x5f8] sm:$0xff] }
 0x180   :  { %2020 = vrot.lane.b32.xlu1 %v2018_v4, %s3791_s24  ;;  %v2356_v4 = vld [vmem:[%s6781_s2 + $0x5f0] sm:$0xff] }
 0x181   :  { %1962 = vrot.lane.b32.xlu0 %v1960_v43, %s3792_s5  ;;  %v3655_v43 = vpack.c.bf16 %v2339_v37, %v2338_v1  ;;  %v3657_v26 = vpack.c.bf16 %v2357_v41, %v2356_v4  ;;  %v1343_v4 = vstv %s3132_s25 }
 0x182   :  { %v5858_v17 = vpop.permute.xlu1 %1420  ;;  %3620 = vmatpush3.bf16.msra.mxu0 %v3619_v39  ;;  %3648 = vmatpush3.bf16.msra.mxu1 %v3647_v55  ;;  %v2340_v39 = vld [vmem:[%s6781_s2 + $0x570] sm:$0xff]  ;;  %v2341_v55 = vld [vmem:[%s6781_s2 + $0x578] sm:$0xff]  ;;  %v1459_v59 = vmul.f32 %v5568_v57, %v1343_v4 }
 0x183   :  { %v5860_v62 = vpop.permute.xlu0 %1293  ;;  %3622 = vmatprep.subr.bf16.mxu0 %v3621_v19  ;;  %3650 = vmatprep.subr.bf16.mxu1 %v3649_v36  ;;  %v1854_v19 = vmul.f32 %v5568_v57, %v5881_v30  ;;  %v3659_v7 = vpack.c.bf16 %v2341_v55, %v2340_v39  ;;  %v1968_v36 = vmul.f32 %v5589_v10, %v5738_v3  ;;  %v6925_v55 = vld [vmem:[#allocation24_spill] sm:$0xff] }
 0x184   :  { %1681 = vrot.lane.b32.xlu1 %v1679_v23, %s3792_s5  ;;  %v2026_v23 = vmul.f32 %v5589_v10, %v5785_v33  ;;  %v1344_v39 = vmul.f32 %v5344_v18, %v1343_v4  ;;  %v1460_v42 = vmul.f32 %v5657_v21, %v6925_v55 }
 0x185   :  { %1620 = vrot.lane.b32.xlu0 %v1618_v9, %s3792_s5  ;;  %v1687_v9 = vmul.f32 %v5344_v18, %v5915_v56 }
 0x186   :  { %v5889_v6 = vpop.permute.xlu1 %1530  ;;  %3624 = vmatpush3.bf16.msra.mxu0 %v3623_v53  ;;  %3652 = vmatpush3.bf16.msra.mxu1 %v3651_v13  ;;  %v1098_v53 = vstv %s3123_s7 }
 0x187   :  { %v5891_v46 = vpop.permute.xlu0 %1472  ;;  %3626 = vmatprep.subr.bf16.mxu0 %v3625_v49  ;;  %3654 = vmatprep.subr.bf16.mxu1 %v3653_v38  ;;  %v1797_v49 = vmul.f32 %v5589_v10, %v5663_v45  ;;  %v6922_v38 = vld [vmem:[#allocation23_spill] sm:$0xff]  ;;  %v1214_v45 = vmul.f32 %v5568_v57, %v1098_v53 }
 0x188   :  { %1791 = vrot.lane.b32.xlu1 %v1789_v27, %s3793_s11  ;;  %v1099_v27 = vmul.f32 %v5344_v18, %v1098_v53  ;;  %v1101_v1 = vmul.f32 %v5589_v10, %v6922_v38  ;;  %v1215_v41 = vmul.f32 %v5657_v21, %v6922_v38 }
 0x189   :  { %1733 = vrot.lane.b32.xlu0 %v1731_v63, %s3793_s11  ;;  %v1159_v63 = vrot.slane %v5581_v14, 2 }
 0x18a   :  { %v5905_v8 = vpop.permute.xlu1 %1191  ;;  %3628 = vmatpush3.bf16.msra.mxu0 %v3627_v54  ;;  %3656 = vmatpush3.bf16.msra.mxu1 %v3655_v43  ;;  %v1108_v43 = vrot.slane %v5579_v44, 2  ;;  %v5978_v2 = vadd.f32 %v1215_v41, %v1214_v45 }
 0x18b   :  { %v5907_v15 = vpop.permute.xlu0 %1130  ;;  %3658 = vmatprep.subr.bf16.mxu1 %v3657_v26  ;;  %v1167_v26 = vrot.slane %v5613_v25, 2  ;;  %v1160_v33 = vsel %vm126_vm0, %v5581_v14, %v1159_v63  ;;  %v2034_v14 = vmul.f32 %v5344_v18, %v5738_v3 }
 0x18c   :  { %1918 = vrot.lane.b32.xlu1 %v1916_v47, %s3791_s24  ;;  %v1924_v47 = vmul.f32 %v5589_v10, %v5937_v5  ;;  %v1109_v29 = vsel %vm126_vm0, %v5579_v44, %v1108_v43  ;;  %v1976_v44 = vmul.f32 %v5344_v18, %v5881_v30  ;;  %v6927_v43 = vld [vmem:[#allocation21_spill] sm:$0xff] }
 0x18d   :  { %1856 = vrot.lane.b32.xlu0 %v1854_v19, %s3791_s24  ;;  %s5939_s24 = sld [smem:[#allocation2 + $0x3e]]  ;;  %v1346_v19 = vmul.f32 %v5589_v10, %v6925_v55  ;;  %v6928_v55 = vld [vmem:[#allocation20_spill] sm:$0xff] }
 0x18e   :  { %v5917_v51 = vpop.permute.xlu1 %1301  ;;  %3660 = vmatpush3.bf16.msra.mxu1 %v3659_v7  ;;  %v1863_v7 = vmul.f32 %v5344_v18, %v5937_v5 }
 0x18f   :  { %v5919_v34 = vpop.permute.xlu0 %1243  ;;  %v5996_v63 = vadd.f32 %v1346_v19, %v1344_v39  ;;  %v1177_v19 = vrot.slane %v5711_v61, 2 }
 0x190   :  { %2028 = vrot.lane.b32.xlu1 %v2026_v23, %s3792_s5  ;;  %v1102_v23 = vadd.f32 %v1101_v1, %v1099_v27 }
 0x191   :  { %1970 = vrot.lane.b32.xlu0 %v1968_v36, %s3792_s5  ;;  %v6926_v36 = vld [vmem:[#allocation15_spill] sm:$0xff] }
 0x192   :  { %v5927_v20 = vpop.permute.xlu1 %1428  ;;  %v1171_v27 = vmul.f32 %v5657_v21, %v6926_v36  ;;  %v1111_v39 = vadd.f32 %v1109_v29, %v1102_v23  ;;  %v1185_v23 = vrot.slane %v5826_v16, 2 }
 0x193   :  { %v5929_v13 = vpop.permute.xlu0 %1366  ;;  %v6002_v45 = vstv %s5939_s24 }
 0x194   :  { %1689 = vrot.lane.b32.xlu1 %v1687_v9, %s3793_s11  ;;  %v1113_v9 = vmul.f32 %v5568_v57, %v6926_v36  ;;  %v1116_v36 = vmul.f32 %v5657_v21, %v6928_v55  ;;  %v6029_v55 = vmul.f32 %v5657_v21, %v1343_v4  ;;  %v1695_v29 = vmul.f32 %v5589_v10, %v6002_v45 }
 0x195   :  { %1629 = vrot.lane.b32.xlu0 %v1627_v40, %s3792_s5  ;;  %v1154_v40 = vmul.f32 %v5589_v10, %v1098_v53 }
 0x196   :  { %v5944_v37 = vpop.permute.xlu1 %1538  ;;  %6934 = vst [vmem:[#allocation10_spill] sm:$0xff] %v6029_v55  ;;  %v6062_v55 = vmul.f32 %v5589_v10, %v5881_v30  ;;  %v6076_v30 = vmul.f32 %v5568_v57, %v5937_v5 }
 0x197   :  { %6923 = vst [vmem:[#allocation18_spill] sm:$0xff] %v5944_v37  ;;  %v5950_v54 = vpop.permute.xlu0 %1480  ;;  %v1162_v41 = vadd.f32 %v1160_v33, %v1154_v40  ;;  %v6024_v40 = vstv %s5952_s22  ;;  %s6734_s22 = sld [smem:[#allocation2 + $0x4e]] }
 0x198   :  { %6924 = vst [vmem:[#allocation22_spill] sm:$0xff] %v5950_v54  ;;  %1799 = vrot.lane.b32.xlu1 %v1797_v49, %s3793_s11  ;;  %v5969_v49 = vmul.f32 %v5589_v10, %v1343_v4  ;;  %v6026_v54 = vadd.f32 %v1460_v42, %v1459_v59  ;;  %v1747_v59 = vmul.f32 %v5657_v21, %v5915_v56  ;;  %v2374_v42 = vld [vmem:[%s6781_s2 + $0x680] sm:$0xff]  ;;  %v2375_v4 = vld [vmem:[%s6781_s2 + $0x688] sm:$0xff] }
 0x199   :  { %1741 = vrot.lane.b32.xlu0 %v1739_v58, %s3792_s5  ;;  %v5976_v58 = vmul.f32 %v5657_v21, %v1098_v53  ;;  %v1168_v53 = vsel %vm126_vm0, %v5613_v25, %v1167_v26  ;;  %v6012_v25 = vmul.f32 %v5657_v21, %v6927_v43 }
 0x19a   :  { %v5971_v38 = vpop.permute.xlu1 %1199  ;;  %v1170_v52 = vadd.f32 %v1168_v53, %v1162_v41  ;;  %6933 = vst [vmem:[#allocation9_spill] sm:$0xff] %v6026_v54  ;;  %v1805_v53 = vmul.f32 %v5657_v21, %v5814_v12  ;;  %v1932_v41 = vmul.f32 %v5344_v18, %v6024_v40  ;;  %v1872_v12 = vmul.f32 %v5589_v10, %v6024_v40 }
 0x19b   :  { %v5982_v1 = vpop.permute.xlu0 %1139 }
 0x19c   :  { %1926 = vrot.lane.b32.xlu1 %v1924_v47, %s3792_s5  ;;  %v6006_v47 = vmul.f32 %v5568_v57, %v6927_v43  ;;  %v1636_v43 = vmul.f32 %v5344_v18, %v6002_v45  ;;  %v1172_v54 = vadd.f32 %v1171_v27, %v1170_v52  ;;  %v1132_v18 = vrot.slane %v5907_v15, 2 }
 0x19d   :  { %1865 = vrot.lane.b32.xlu0 %v1863_v7, %s3792_s5  ;;  %v6930_v7 = vld [vmem:[#allocation19_spill] sm:$0xff]  ;;  %v6080_v52 = vmul.f32 %v5568_v57, %v5915_v56 }
 0x19e   :  { %v6014_v26 = vpop.permute.xlu1 %1309  ;;  %v6019_v3 = vmul.f32 %v5657_v21, %v6930_v7  ;;  %v3661_v7 = vpack.c.bf16 %v2375_v4, %v2374_v42  ;;  %v6068_v42 = vstv %s5992_s28  ;;  %s3166_s28 = sld [smem:[#allocation2 + $0x4f]] }
 0x19f   :  { %6929 = vst [vmem:[#allocation26_spill] sm:$0xff] %v6014_v26  ;;  %v6021_v33 = vpop.permute.xlu0 %1251  ;;  %v1193_v26 = vrot.slane %v5905_v8, 2 }
 0x1a0   :  { %6931 = vst [vmem:[#allocation8_spill] sm:$0xff] %v6019_v3  ;;  %6932 = vst [vmem:[#allocation28_spill] sm:$0xff] %v6021_v33  ;;  %2036 = vrot.lane.b32.xlu1 %v2034_v14, %s3793_s11  ;;  %v1123_v14 = vrot.slane %v5782_v0, 2  ;;  %v1114_v3 = vadd.f32 %v1113_v9, %v1111_v39  ;;  %v1178_v33 = vsel %vm126_vm0, %v5711_v61, %v1177_v19  ;;  %3662 = vmatprep.subr.bf16.mxu0 %v3661_v7 }
 0x1a1   :  { %1978 = vrot.lane.b32.xlu0 %v1976_v44, %s3793_s11  ;;  %v1186_v61 = vsel %vm126_vm0, %v5826_v16, %v1185_v23  ;;  %v1201_v9 = vrot.slane %v5971_v38, 2  ;;  %v1180_v27 = vadd.f32 %v1178_v33, %v1172_v54  ;;  %v1141_v19 = vrot.slane %v5982_v1, 2  ;;  %v2407_v33 = vld [vmem:[%s6781_s2 + $0x788] sm:$0xff] }
 0x1a2   :  { %v6049_v44 = vpop.permute.xlu1 %1436  ;;  %v1124_v39 = vsel %vm126_vm0, %v5782_v0, %v1123_v14  ;;  %v6089_v16 = vmul.f32 %v5568_v57, %v6002_v45  ;;  %v1412_v23 = vrot.slane %v5673_v24, 2  ;;  %v1194_v4 = vsel %vm151_vm1, %v5905_v8, %v1193_v26  ;;  %v2406_v0 = vld [vmem:[%s6781_s2 + $0x780] sm:$0xff] }
 0x1a3   :  { %6935 = vst [vmem:[#allocation14_spill] sm:$0xff] %v6049_v44  ;;  %v6058_v37 = vpop.permute.xlu0 %1375  ;;  %v1404_v44 = vrot.slane %v5601_v22, 2  ;;  %v6098_v54 = vmul.f32 %v5589_v10, %v6068_v42  ;;  %v1133_v8 = vsel %vm151_vm1, %v5907_v15, %v1132_v18  ;;  %v3693_v26 = vpack.c.bf16 %v2407_v33, %v2406_v0  ;;  %v6121_v15 = vld [vmem:[%s6779_s0] sm:$0x3f] }
 0x1a4   :  { %1697 = vrot.lane.b32.xlu1 %v1695_v29, %s3793_s11  ;;  %v1279_v10 = vrot.slane %v5628_v28, 2  ;;  %v1221_v14 = vrot.slane %v5630_v11, 2  ;;  %v6129_v18 = vmul.f32 %v5657_v21, %v5937_v5  ;;  %v1466_v33 = vrot.slane %v5748_v48, 2 }
 0x1a5   :  { %1638 = vrot.lane.b32.xlu0 %v1636_v43, %s3793_s11  ;;  %v1117_v43 = vadd.f32 %v1116_v36, %v1114_v3  ;;  %v1405_v3 = vsel %vm126_vm0, %v5601_v22, %v1404_v44  ;;  %v1188_v36 = vadd.f32 %v1186_v61, %v1180_v27  ;;  %v1142_v22 = vsel %vm151_vm1, %v5982_v1, %v1141_v19 }
 0x1a6   :  { %v6085_v29 = vpop.permute.xlu1 %1546  ;;  %3694 = vmatprep.subr.bf16.mxu1 %v3693_v26  ;;  %v1353_v1 = vrot.slane %v5675_v50, 2  ;;  %v1407_v27 = vadd.f32 %v1405_v3, %v5969_v49  ;;  %v1280_v5 = vsel %vm126_vm0, %v5628_v28, %v1279_v10  ;;  %v6166_v26 = vmul.f32 %v5568_v57, %v6068_v42 }
 0x1a7   :  { %6936 = vst [vmem:[#allocation12_spill] sm:$0xff] %v6085_v29  ;;  %v6094_v56 = vpop.permute.xlu0 %1488  ;;  %v1126_v7 = vadd.f32 %v1124_v39, %v1117_v43  ;;  %v1196_v29 = vadd.f32 %v1194_v4, %v1188_v36  ;;  %v6138_v43 = vmul.f32 %v5657_v21, %v6024_v40  ;;  %v1295_v10 = vrot.slane %v5860_v62, 2 }
 0x1a8   :  { %6937 = vst [vmem:[#allocation27_spill] sm:$0xff] %v6094_v56  ;;  %1807 = vrot.lane.b32.xlu1 %v1805_v53, %s3792_s5  ;;  %v1202_v56 = vsel %vm170_vm2, %v5971_v38, %v1201_v9  ;;  %v6125_v53 = vmul.f32 %v6121_v15, %v6068_v42  ;;  %v1413_v38 = vsel %vm126_vm0, %v5673_v24, %v1412_v23 }
 0x1a9   :  { %1749 = vrot.lane.b32.xlu0 %v1747_v59, %s3792_s5  ;;  %v1135_v59 = vadd.f32 %v1133_v8, %v1126_v7  ;;  %v1204_v39 = vadd.f32 %v1202_v56, %v1196_v29  ;;  %v1222_v24 = vsel %vm126_vm0, %v5630_v11, %v1221_v14  ;;  %v1415_v49 = vadd.f32 %v1413_v38, %v1407_v27 }
 0x1aa   :  { %v1208_v44 = vpop.permute.xlu1 %1207  ;;  %v1229_v29 = vrot.slane %v5707_v32, 2  ;;  %v1354_v28 = vsel %vm126_vm0, %v5675_v50, %v1353_v1  ;;  %v1287_v11 = vrot.slane %v5750_v31, 2  ;;  %v1237_v8 = vrot.slane %v5824_v35, 2 }
 0x1ab   :  { %v1209_v61 = vrot.slane %v1208_v44, 2  ;;  %v1149_v9 = vpop.permute.xlu0 %1148  ;;  %v1144_v23 = vadd.f32 %v1142_v22, %v1135_v59  ;;  %v6170_v50 = vmul.f32 %v5657_v21, %v6002_v45  ;;  %v6179_v7 = vmul.f32 %v5657_v21, %v6068_v42 }
 0x1ac   :  { %v1150_v19 = vrot.slane %v1149_v9, 2  ;;  %1934 = vrot.lane.b32.xlu1 %v1932_v41, %s3793_s11  ;;  %v1282_v22 = vadd.f32 %v1280_v5, %v5976_v58  ;;  %v1224_v45 = vadd.f32 %v1222_v24, %v5978_v2  ;;  %v1230_v38 = vsel %vm151_vm1, %v5707_v32, %v1229_v29  ;;  %v6939_v5 = vld [vmem:[#allocation10_spill] sm:$0xff] }
 0x1ad   :  { %v1210_v4 = vsel %vm170_vm2, %v1208_v44, %v1209_v61  ;;  %1874 = vrot.lane.b32.xlu0 %v1872_v12, %s3792_s5  ;;  %v1524_v12 = vrot.slane %v5787_v60, 2  ;;  %v1356_v44 = vadd.f32 %v1354_v28, %v5996_v63  ;;  %v1288_v42 = vsel %vm126_vm0, %v5750_v31, %v1287_v11  ;;  %v6940_v29 = vld [vmem:[#allocation18_spill] sm:$0xff] }
 0x1ae   :  { %v6147_v56 = vadd.f32 %v1210_v4, %v1204_v39  ;;  %v1151_v41 = vsel %vm170_vm2, %v1149_v9, %v1150_v19  ;;  %v6150_v0 = vpop.permute.xlu1 %1317  ;;  %v1238_v32 = vsel %vm151_vm1, %v5824_v35, %v1237_v8  ;;  %v1532_v63 = vrot.slane %v5889_v6, 2 }
 0x1af   :  { %v6156_v3 = vadd.f32 %v1151_v41, %v1144_v23  ;;  %v6158_v36 = vpop.permute.xlu0 %1259  ;;  %v1525_v2 = vsel %vm126_vm0, %v5787_v60, %v1524_v12  ;;  %v1474_v59 = vrot.slane %v5891_v46, 2  ;;  %v1296_v31 = vsel %vm151_vm1, %v5860_v62, %v1295_v10  ;;  %v6942_v12 = vld [vmem:[#allocation26_spill] sm:$0xff] }
 0x1b0   :  { %2044 = vrot.lane.b32.xlu1 %v6062_v55, %s3793_s11  ;;  %v6183_v55 = vmul.f32 %v5568_v57, %v6024_v40  ;;  %v1417_v57 = vadd.f32 %v6012_v25, %v1415_v49  ;;  %v1422_v40 = vrot.slane %v5858_v17, 2  ;;  %v1303_v25 = vrot.slane %v5917_v51, 2 }
 0x1b1   :  { %v1213_v14 = vmax.f32 %v6156_v3, %v6147_v56  ;;  %1986 = vrot.lane.b32.xlu0 %v6076_v30, %s3792_s5  ;;  %v1467_v30 = vsel %vm126_vm0, %v5748_v48, %v1466_v33  ;;  %v1232_v48 = vadd.f32 %v1230_v38, %v1224_v45  ;;  %v1245_v61 = vrot.slane %v5919_v34, 2  ;;  %v6941_v33 = vld [vmem:[#allocation22_spill] sm:$0xff] }
 0x1b2   :  { %v6190_v1 = vpop.permute.xlu1 %1444  ;;  %v1359_v60 = vadd.f32 %v6006_v47, %v1356_v44  ;;  %v1290_v35 = vadd.f32 %v1288_v42, %v1282_v22  ;;  %v1430_v9 = vrot.slane %v5927_v20, 2  ;;  %v1368_v27 = vrot.slane %v5929_v13, 2  ;;  %v6944_v22 = vld [vmem:[#allocation14_spill] sm:$0xff] }
 0x1b3   :  { %v6198_v58 = vpop.permute.xlu0 %1384  ;;  %v1527_v62 = vadd.f32 %v1525_v2, %v6939_v5  ;;  %v1240_v24 = vadd.f32 %v1238_v32, %v1232_v48  ;;  %v1423_v23 = vsel %vm126_vm0, %v5858_v17, %v1422_v40  ;;  %v1533_v47 = vsel %vm126_vm0, %v5889_v6, %v1532_v63 }
 0x1b4   :  { %1815 = vrot.lane.b32.xlu1 %v6080_v52, %s3793_s11  ;;  %v6938_v52 = vld [vmem:[#allocation9_spill] sm:$0xff]  ;;  %v1475_v49 = vsel %vm151_vm1, %v5891_v46, %v1474_v59  ;;  %v1540_v41 = vrot.slane %v6940_v29, 2  ;;  %v1304_v28 = vsel %vm170_vm2, %v5917_v51, %v1303_v25  ;;  %v1246_v17 = vsel %vm170_vm2, %v5919_v34, %v1245_v61 }
 0x1b5   :  { %1757 = vrot.lane.b32.xlu0 %v6089_v16, %s3793_s11  ;;  %v1469_v19 = vadd.f32 %v1467_v30, %v6938_v52  ;;  %v1298_v16 = vadd.f32 %v1296_v31, %v1290_v35  ;;  %v1482_v11 = vrot.slane %v6941_v33, 2  ;;  %v1311_v8 = vrot.slane %v6942_v12, 2  ;;  %v6945_v30 = vld [vmem:[#allocation8_spill] sm:$0xff] }
 0x1b6   :  { %v6217_v39 = vpop.permute.xlu1 %1554  ;;  %v1431_v6 = vsel %vm126_vm0, %v5927_v20, %v1430_v9  ;;  %v1369_v46 = vsel %vm126_vm0, %v5929_v13, %v1368_v27  ;;  %v1438_v51 = vrot.slane %v6944_v22, 2  ;;  %v1425_v44 = vadd.f32 %v1423_v23, %v1417_v57  ;;  %v6947_v9 = vld [vmem:[#allocation27_spill] sm:$0xff] }
 0x1b7   :  { %v6223_v4 = vpop.permute.xlu0 %1496  ;;  %v1535_v34 = vadd.f32 %v1533_v47, %v1527_v62  ;;  %v1477_v38 = vadd.f32 %v1475_v49, %v1469_v19  ;;  %v1362_v42 = vadd.f32 %v6945_v30, %v1359_v60  ;;  %v1306_v2 = vadd.f32 %v1304_v28, %v1298_v16 }
 0x1b8   :  { %1942 = vrot.lane.b32.xlu1 %v6098_v54, %s3793_s11  ;;  %v6943_v54 = vld [vmem:[#allocation28_spill] sm:$0xff]  ;;  %v1248_v32 = vadd.f32 %v1246_v17, %v1240_v24  ;;  %v1261_v20 = vrot.slane %v6158_v36, 2  ;;  %v1433_v13 = vadd.f32 %v1431_v6, %v1425_v44  ;;  %v1483_v57 = vsel %vm151_vm1, %v6941_v33, %v1482_v11 }
 0x1b9   :  { %1883 = vrot.lane.b32.xlu0 %v6125_v53, %s3793_s11  ;;  %v1253_v10 = vrot.slane %v6943_v54, 2  ;;  %v1541_v53 = vsel %vm151_vm1, %v6940_v29, %v1540_v41  ;;  %v1371_v63 = vadd.f32 %v1369_v46, %v1362_v42  ;;  %v1312_v59 = vsel %vm170_vm2, %v6942_v12, %v1311_v8 }
 0x1ba   :  { %v1326_v45 = vpop.permute.xlu1 %1325  ;;  %v1439_v31 = vsel %vm151_vm1, %v6944_v22, %v1438_v51  ;;  %v1377_v25 = vrot.slane %v6058_v37, 2  ;;  %v1543_v35 = vadd.f32 %v1541_v53, %v1535_v34  ;;  %v1490_v27 = vrot.slane %v6947_v9, 2 }
 0x1bb   :  { %v1268_v40 = vpop.permute.xlu0 %1267  ;;  %v1254_v48 = vsel %vm151_vm1, %v6943_v54, %v1253_v10  ;;  %v1319_v52 = vrot.slane %v6150_v0, 2  ;;  %v1485_v62 = vadd.f32 %v1483_v57, %v1477_v38  ;;  %v1262_v24 = vsel %vm151_vm1, %v6158_v36, %v1261_v20 }
 0x1bc   :  { %2052 = vrot.lane.b32.xlu1 %v6129_v18, %s3792_s5  ;;  %v6946_v18 = vld [vmem:[#allocation12_spill] sm:$0xff]  ;;  %v1269_v19 = vrot.slane %v1268_v40, 2  ;;  %v1446_v23 = vrot.slane %v6190_v1, 2  ;;  %v1256_v16 = vadd.f32 %v1254_v48, %v1248_v32  ;;  %v1441_v47 = vadd.f32 %v1439_v31, %v1433_v13 }
 0x1bd   :  { %1994 = vrot.lane.b32.xlu0 %v6138_v43, %s3792_s5  ;;  %v1548_v61 = vrot.slane %v6946_v18, 2  ;;  %v1314_v43 = vadd.f32 %v1312_v59, %v1306_v2  ;;  %v1386_v49 = vrot.slane %v6198_v58, 2  ;;  %v1556_v29 = vrot.slane %v6217_v39, 2  ;;  %s6289_s5 = sld [smem:[#allocation2 + $0x4c]] }
 0x1be   :  { %v1453_v60 = vpop.permute.xlu1 %1452  ;;  %v1378_v41 = vsel %vm151_vm1, %v6058_v37, %v1377_v25  ;;  %v1498_v28 = vrot.slane %v6223_v4, 2  ;;  %v1327_v17 = vrot.slane %v1326_v45, 2  ;;  %v1320_v11 = vsel %vm151_vm1, %v6150_v0, %v1319_v52 }
 0x1bf   :  { %v1394_v5 = vpop.permute.xlu0 %1393  ;;  %v1549_v36 = vsel %vm170_vm2, %v6946_v18, %v1548_v61  ;;  %v1264_v12 = vadd.f32 %v1262_v24, %v1256_v16  ;;  %v1270_v8 = vsel %vm170_vm2, %v1268_v40, %v1269_v19  ;;  %v1447_v37 = vsel %vm170_vm2, %v6190_v1, %v1446_v23 }
 0x1c0   :  { %2002 = vrot.lane.b32.xlu1 %v6166_v26, %s3793_s11  ;;  %v1491_v26 = vsel %vm170_vm2, %v6947_v9, %v1490_v27  ;;  %v1454_v6 = vrot.slane %v1453_v60, 2  ;;  %v1395_v46 = vrot.slane %v1394_v5, 2  ;;  %v1380_v10 = vadd.f32 %v1378_v41, %v1371_v63 }
 0x1c1   :  { %1823 = vrot.lane.b32.xlu0 %v6170_v50, %s3793_s11  ;;  %v1551_v22 = vadd.f32 %v1549_v36, %v1543_v35  ;;  %v1387_v0 = vsel %vm151_vm1, %v6198_v58, %v1386_v49  ;;  %v1557_v51 = vsel %vm170_vm2, %v6217_v39, %v1556_v29  ;;  %v1499_v1 = vsel %vm151_vm1, %v6223_v4, %v1498_v28  ;;  %v6326_v49 = vld [vmem:[%s6779_s0 + $0x6] sm:$0x3f] }
 0x1c2   :  { %v1563_v33 = vpop.permute.xlu1 %1562  ;;  %v1328_v44 = vsel %vm170_vm2, %v1326_v45, %v1327_v17  ;;  %v1272_v34 = vadd.f32 %v1270_v8, %v1264_v12  ;;  %v1493_v30 = vadd.f32 %v1491_v26, %v1485_v62  ;;  %v1322_v42 = vadd.f32 %v1320_v11, %v1314_v43  ;;  %v2359_v26 = vld [vmem:[%s6781_s2 + $0x608] sm:$0xff] }
 0x1c3   :  { %v1505_v50 = vpop.permute.xlu0 %1504  ;;  %v1449_v40 = vadd.f32 %v1447_v37, %v1441_v47  ;;  %v1455_v58 = vsel %vm170_vm2, %v1453_v60, %v1454_v6  ;;  %v1396_v39 = vsel %vm170_vm2, %v1394_v5, %v1395_v46  ;;  %v1389_v4 = vadd.f32 %v1387_v0, %v1380_v10  ;;  %v6948_v6 = vld [vmem:[#allocation35_spill] sm:$0xff] }
 0x1c4   :  { %v1506_v54 = vrot.slane %v1505_v50, 2  ;;  %2068 = vrot.lane.b32.xlu1 %v6179_v7, %s3793_s11  ;;  %v1564_v7 = vrot.slane %v1563_v33, 2  ;;  %v1559_v45 = vadd.f32 %v1557_v51, %v1551_v22  ;;  %v1501_v20 = vadd.f32 %v1499_v1, %v1493_v30  ;;  %v6949_v22 = vld [vmem:[#allocation17_spill] sm:$0xff]  ;;  %v2377_v1 = vld [vmem:[%s6781_s2 + $0x698] sm:$0xff] }
 0x1c5   :  { %2060 = vrot.lane.b32.xlu0 %v6183_v55, %s3793_s11  ;;  %v1330_v13 = vadd.f32 %v1328_v44, %v1322_v42  ;;  %v1273_v63 = vmax.f32 %v1213_v14, %v1272_v34  ;;  %s6311_s11 = sld [smem:[#allocation2 + $0x4d]]  ;;  %v1457_v25 = vadd.f32 %v1455_v58, %v1449_v40  ;;  %v1398_v18 = vadd.f32 %v1396_v39, %v1389_v4  ;;  %v2376_v51 = vld [vmem:[%s6781_s2 + $0x690] sm:$0xff] }
 0x1c6   :  { %v1513_v38 = vpop.permute.xlu1 %1512  ;;  %v1507_v55 = vsel %vm151_vm1, %v1505_v50, %v1506_v54  ;;  %v1565_v57 = vsel %vm151_vm1, %v1563_v33, %v1564_v7  ;;  %v1340_v9 = vstv %s6289_s5  ;;  %v6320_v23 = vstv %s6300_s16  ;;  %v2358_v33 = vld [vmem:[%s6781_s2 + $0x600] sm:$0xff]  ;;  %s3798_s5 = smov [#allocation5]  }
 0x1c7   :  { %v1514_v2 = vrot.slane %v1513_v38, 2  ;;  %v1334_v32 = vpop.permute.xlu0 %1333  ;;  %v1509_v61 = vadd.f32 %v1507_v55, %v1501_v20  ;;  %v1567_v56 = vadd.f32 %v1565_v57, %v1559_v45  ;;  %v1458_v62 = vmax.f32 %v1398_v18, %v1457_v25  ;;  %v6358_v55 = vld [vmem:[%s6779_s0 + $0xc] sm:$0x3f]  ;;  %s3079_s16 = sshll.u32 %s3798_s5, 4  ;;  %s3080_s16 = int_to_ptr.vmem [resolvable:$true] %s3079_s16 }
 0x1c8   :  { %v1335_v53 = vrot.slane %v1334_v32, 2  ;;  %v1644_v29 = vmul.f32 %v6326_v49, %v6320_v23  ;;  %v1589_v37 = vmul.f32 %v6121_v15, %v6320_v23  ;;  %v1591_v46 = vmul.f32 %v6326_v49, %v6948_v6  ;;  %v2360_v20 = vld [vmem:[%s6781_s2 + $0x610] sm:$0xff]  ;;  %v2379_v25 = vld [vmem:[%s6781_s2 + $0x6a8] sm:$0xff]  ;;  %p3769_p6 = scmp.lt.s32.totalorder %s3080_s16, %s3080_s16 }
 0x1c9   :  { %v1515_v59 = vsel %vm170_vm2, %v1513_v38, %v1514_v2  ;;  %v6350_v34 = vstv %s6314_s26  ;;  %v3663_v30 = vpack.c.bf16 %v2359_v26, %v2358_v33  ;;  %v1705_v4 = vmul.f32 %v5657_v21, %v6948_v6  ;;  %v2391_v21 = vld [vmem:[%s6781_s2 + $0x708] sm:$0xff] }
 0x1ca   :  { %v1336_v48 = vsel %vm170_vm2, %v1334_v32, %v1335_v53  ;;  %v1579_v31 = vpop.permute.xlu1 %1578  ;;  %v1517_v3 = vadd.f32 %v1515_v59, %v1509_v61  ;;  %v1704_v53 = vmul.f32 %v6358_v55, %v6320_v23  ;;  %v3665_v45 = vpack.c.bf16 %v2377_v1, %v2376_v51  ;;  %v2393_v51 = vld [vmem:[%s6781_s2 + $0x718] sm:$0xff] }
 0x1cb   :  { %v1338_v60 = vadd.f32 %v1336_v48, %v1330_v13  ;;  %v1571_v35 = vpop.permute.xlu0 %1570  ;;  %v1580_v27 = vrot.slane %v1579_v31, 2  ;;  %v1585_v8 = vstv %s6311_s11  ;;  %v2361_v13 = vld [vmem:[%s6781_s2 + $0x618] sm:$0xff]  ;;  %v1592_v18 = vadd.f32 %v1591_v46, %v1589_v37  ;;  %s3764_s11 = scalar_lea.vmem %s3080_s16, 32 }
 0x1cc   :  { %v1572_v52 = vrot.slane %v1571_v35, 2  ;;  %v1518_v36 = vmax.f32 %v1458_v62, %v1517_v3  ;;  %v2408_v62 = vld [vmem:[%s6781_s2 + $0x790] sm:$0xff]  ;;  %v2381_v37 = vld [vmem:[%s6781_s2 + $0x6b8] sm:$0xff]  ;;  %p3765_p5 = scmp.ne.s32.totalorder %s3080_s16, %s3764_s11  ;;  %p3770_p7 = scmp.lt.s32.totalorder %s3764_s11, %s3764_s11 }
 0x1cd   :  { %v1339_v14 = vmax.f32 %v1273_v63, %v1338_v60  ;;  %v1581_v47 = vsel %vm170_vm2, %v1579_v31, %v1580_v27  ;;  %v2390_v63 = vld [vmem:[%s6781_s2 + $0x700] sm:$0xff]  ;;  %v1889_v60 = vmul.f32 %v6326_v49, %v6350_v34 }
 0x1ce   :  { %v1573_v19 = vsel %vm170_vm2, %v1571_v35, %v1572_v52  ;;  %v6317_v5 = vpop.permute.xlu1 %1596  ;;  %v2378_v31 = vld [vmem:[%s6781_s2 + $0x6a0] sm:$0xff]  ;;  %p3771_p8 = por %p3770_p7, %p3769_p6 }
 0x1cf   :  { %v1341_v43 = vadd.f32 %v1340_v9, %v1339_v14  ;;  %v1575_v24 = vadd.f32 %v1573_v19, %v1567_v56  ;;  %v1648_v16 = vpop.permute.xlu0 %1647  ;;  %v1598_v61 = vrot.slane %v6317_v5, 2  ;;  %v3170_v35 = vld [vmem:[%s6781_s2 + $0x800] ss:$0 sm:$0xff]  ;;  %v3667_v14 = vpack.c.bf16 %v2361_v13, %v2360_v20  ;;  %v2363_v19 = vld [vmem:[%s6781_s2 + $0x628] sm:$0xff] }
 0x1d0   :  { %v1649_v41 = vrot.slane %v1648_v16, 2  ;;  %v6393_v9 = vld [vmem:[%s6781_s2 + $0x620] sm:$0xff]  ;;  %p3772_p9 = pnand %p3771_p8, %p3765_p5 }
 0x1d1   :  { %v1342_v28 = vmax.f32 %v1341_v43, 0.0  ;;  %v1583_v17 = vadd.f32 %v1581_v47, %v1575_v24  ;;  %v2409_v43 = vld [vmem:[%s6781_s2 + $0x798] sm:$0xff]  ;;  %v1706_v24 = vadd.f32 %v1705_v4, %v1704_v53  ;;  %v1599_v6 = vsel %vm126_vm0, %v6317_v5, %v1598_v61  ;;  %v2410_v5 = vld [vmem:[%s6781_s2 + $0x7a0] sm:$0xff]  ;;  %v2395_v61 = vld [vmem:[%s6781_s2 + $0x728] sm:$0xff] }
 0x1d2   :  { %v1650_v11 = vsel %vm126_vm0, %v1648_v16, %v1649_v41  ;;  %v1893_v12 = vpop.permute.xlu1 %1892  ;;  %v3205_v10 = vpop.f32.mrb[0].mxu0  ;;  %v6950_v41 = vld [vmem:[#allocation25_spill] sm:$0xff]  ;;  %v2382_v13 = vld [vmem:[%s6781_s2 + $0x6c0] sm:$0xff] }
 0x1d3   :  { %v1584_v50 = vmax.f32 %v1518_v36, %v1583_v17  ;;  %v1656_v54 = vpop.permute.xlu0 %1655  ;;  %v2129_v0 = vrot.slane %v1342_v28, %v6949_v22  ;;  %v1652_v44 = vadd.f32 %v1650_v11, %v1644_v29  ;;  %v3206_v38 = vpop.f32.mrb[1].mxu0  ;;  %v1894_v42 = vrot.slane %v1893_v12, 2  ;;  %v6409_v29 = vld [vmem:[%s6779_s0 + $0x12] sm:$0x3f] }
 0x1d4   :  { %v1657_v7 = vrot.slane %v1656_v54, 2  ;;  %v3207_v40 = vadd.f32 %v3206_v38, %v3205_v10  ;;  %v1661_v36 = vmul.f32 %v6409_v29, %v6950_v41  ;;  %v3695_v28 = vpack.c.bf16 %v2391_v21, %v2390_v63  ;;  %v2411_v38 = vld [vmem:[%s6781_s2 + $0x7a8] sm:$0xff] }
 0x1d5   :  { %v2130_v2 = vcombine.high %v2129_v0, %v2129_v0  ;;  %v1586_v32 = vadd.f32 %v1585_v8, %v1584_v50  ;;  %v1895_v27 = vsel %vm126_vm0, %v1893_v12, %v1894_v42  ;;  %v3669_v17 = vpack.c.bf16 %v2379_v25, %v2378_v31  ;;  %v2380_v50 = vld [vmem:[%s6781_s2 + $0x6b0] sm:$0xff]  ;;  %v2383_v63 = vld [vmem:[%s6781_s2 + $0x6c8] sm:$0xff]  ;;  %v2394_v25 = vld [vmem:[%s6781_s2 + $0x720] sm:$0xff] }
 0x1d6   :  { %v1658_v58 = vsel %vm126_vm0, %v1656_v54, %v1657_v7  ;;  %v6353_v39 = vpop.permute.xlu1 %1767  ;;  %v2499_v33 = vadd.f32 %v3207_v40, %v3170_v35  ;;  %v1897_v46 = vadd.f32 %v1895_v27, %v1889_v60  ;;  %v3671_v54 = vpack.c.bf16 %v2363_v19, %v6393_v9  ;;  %v2412_v27 = vld [vmem:[%s6781_s2 + $0x7b0] sm:$0xff]  ;;  %v2366_v19 = vld [vmem:[%s6781_s2 + $0x640] sm:$0xff] }
 0x1d7   :  { %v6373_v57 = vadd.f32 %v1658_v58, %v1652_v44  ;;  %v1710_v59 = vpop.permute.xlu0 %1709  ;;  %2776 = vmatprep.mubr.f32.mxu0 %v2130_v2  ;;  %v1587_v48 = vmax.f32 %v1586_v32, 0.0  ;;  %v3697_v10 = vpack.c.bf16 %v2409_v43, %v2408_v62  ;;  %v3673_v2 = vpack.c.bf16 %v2381_v37, %v2380_v50  ;;  %v2364_v32 = vld [vmem:[%s6781_s2 + $0x630] sm:$0xff]  ;;  %v2365_v58 = vld [vmem:[%s6781_s2 + $0x638] sm:$0xff]  ;;  %v2367_v62 = vld [vmem:[%s6781_s2 + $0x648] sm:$0xff] }
 0x1d8   :  { %2777 = vmatmul.mubr.f32.vlgmr.msra.gmra.mrb[4].mxu0 %v2129_v0  ;;  %v1711_v52 = vrot.slane %v1710_v59, 2  ;;  %v2392_v0 = vld [vmem:[%s6781_s2 + $0x710] sm:$0xff]  ;;  %v1603_v53 = vmul.f32 %v6358_v55, %v6950_v41  ;;  %v3701_v31 = vpack.c.bf16 %v2411_v38, %v2410_v5  ;;  %v1764_v60 = vmul.f32 %v6409_v29, %v6320_v23  ;;  %v2414_v37 = vld [vmem:[%s6781_s2 + $0x7c0] sm:$0xff] }
 0x1d9   :  { %v3240_v56 = vpop.f32.mrb[0].mxu1  ;;  %v2140_v3 = vrot.slane %v1587_v48, %v6949_v22  ;;  %3664 = vmatpush3.bf16.msra.mxu0 %v3663_v30  ;;  %v1769_v30 = vrot.slane %v6353_v39, 2  ;;  %v3699_v20 = vpack.c.bf16 %v2393_v51, %v2392_v0  ;;  %v1662_v9 = vadd.f32 %v1661_v36, %v6373_v57  ;;  %v2368_v0 = vld [vmem:[%s6781_s2 + $0x650] sm:$0xff]  ;;  %v2369_v51 = vld [vmem:[%s6781_s2 + $0x658] sm:$0xff] }
 0x1da   :  { %v3241_v16 = vpop.f32.mrb[1].mxu1  ;;  %v1901_v47 = vpop.permute.xlu1 %1900  ;;  %3666 = vmatprep.subr.bf16.mxu0 %v3665_v45  ;;  %v1712_v1 = vsel %vm126_vm0, %v1710_v59, %v1711_v52  ;;  %v1601_v59 = vadd.f32 %v1599_v6, %v1592_v18  ;;  %v3675_v18 = vpack.c.bf16 %v2365_v58, %v2364_v32  ;;  %v2413_v52 = vld [vmem:[%s6781_s2 + $0x7b8] sm:$0xff]  ;;  %v3677_v57 = vpack.c.bf16 %v2383_v63, %v2382_v13  ;;  %v2415_v6 = vld [vmem:[%s6781_s2 + $0x7c8] sm:$0xff]  ;;  %v2398_v58 = vld [vmem:[%s6781_s2 + $0x740] sm:$0xff] }
 0x1db   :  { %v3242_v26 = vadd.f32 %v3241_v16, %v3240_v56  ;;  %v1902_v11 = vrot.slane %v1901_v47, 2  ;;  %v6413_v12 = vpop.permute.xlu0 %1841  ;;  %v2141_v8 = vcombine.high %v2140_v3, %v2140_v3  ;;  %v1714_v48 = vadd.f32 %v1712_v1, %v1706_v24  ;;  %v2384_v16 = vld [vmem:[%s6781_s2 + $0x6d0] sm:$0xff]  ;;  %v2417_v13 = vld [vmem:[%s6781_s2 + $0x7d8] sm:$0xff] }
 0x1dc   :  { %v1770_v56 = vsel %vm126_vm0, %v6353_v39, %v1769_v30  ;;  %v3703_v39 = vpack.c.bf16 %v2395_v61, %v2394_v25  ;;  %v1604_v41 = vadd.f32 %v1603_v53, %v1601_v59  ;;  %v3679_v50 = vpack.c.bf16 %v2367_v62, %v2366_v19  ;;  %v2386_v30 = vld [vmem:[%s6781_s2 + $0x6e0] sm:$0xff]  ;;  %v2399_v53 = vld [vmem:[%s6781_s2 + $0x748] sm:$0xff] }
 0x1dd   :  { %v6431_v44 = vadd.f32 %v3242_v26, %v2499_v33  ;;  %v1903_v7 = vsel %vm126_vm0, %v1901_v47, %v1902_v11  ;;  %2846 = vmatprep.mubr.f32.mxu1 %v2141_v8  ;;  %3668 = vmatpush3.bf16.msra.mxu0 %v3667_v14  ;;  %v2385_v47 = vld [vmem:[%s6781_s2 + $0x6d8] sm:$0xff]  ;;  %v3705_v33 = vpack.c.bf16 %v2413_v52, %v2412_v27  ;;  %v2396_v26 = vld [vmem:[%s6781_s2 + $0x730] sm:$0xff] }
 0x1de   :  { %v6441_v42 = vadd.f32 %v1903_v7, %v1897_v46  ;;  %2847 = vmatmul.mubr.f32.vlgmr.msra.gmra.mrb[4].mxu1 %v2140_v3  ;;  %v1718_v40 = vpop.permute.xlu1 %1717  ;;  %3670 = vmatprep.subr.bf16.mxu0 %v3669_v17  ;;  %v2397_v11 = vld [vmem:[%s6781_s2 + $0x738] sm:$0xff]  ;;  %v1772_v8 = vadd.f32 %v1770_v56, %v1764_v60  ;;  %v3709_v32 = vpack.c.bf16 %v2415_v6, %v2414_v37  ;;  %v2388_v60 = vld [vmem:[%s6781_s2 + $0x6f0] sm:$0xff] }
 0x1df   :  { %v1719_v4 = vrot.slane %v1718_v40, 2  ;;  %v1666_v45 = vpop.permute.xlu0 %1665  ;;  %3696 = vmatpush3.bf16.msra.mxu1 %v3695_v28  ;;  %v6951_v28 = vld [vmem:[#allocation13_spill] sm:$0xff]  ;;  %v3707_v38 = vpack.c.bf16 %v2397_v11, %v2396_v26  ;;  %v3711_v61 = vpack.c.bf16 %v2399_v53, %v2398_v58  ;;  %v2401_v52 = vld [vmem:[%s6781_s2 + $0x758] sm:$0xff] }
 0x1e0   :  { %v1667_v21 = vrot.slane %v1666_v45, 2  ;;  %3698 = vmatprep.subr.bf16.mxu1 %v3697_v10  ;;  %v1606_v17 = vmul.f32 %v6409_v29, %v6951_v28  ;;  %v3681_v10 = vpack.c.bf16 %v2385_v47, %v2384_v16  ;;  %v2400_v27 = vld [vmem:[%s6781_s2 + $0x750] sm:$0xff]  ;;  %v2373_v16 = vld [vmem:[%s6781_s2 + $0x678] sm:$0xff] }
 0x1e1   :  { %v1720_v35 = vsel %vm151_vm1, %v1718_v40, %v1719_v4  ;;  %3672 = vmatpush3.bf16.msra.mxu0 %v3671_v54  ;;  %v2387_v40 = vld [vmem:[%s6781_s2 + $0x6e8] sm:$0xff]  ;;  %v2421_v11 = vld [vmem:[%s6781_s2 + $0x7f8] sm:$0xff] }
 0x1e2   :  { %v6475_v3 = vadd.f32 %v1720_v35, %v1714_v48  ;;  %v1668_v23 = vsel %vm126_vm0, %v1666_v45, %v1667_v21  ;;  %v6478_v14 = vpop.permute.xlu1 %1954  ;;  %3674 = vmatprep.subr.bf16.mxu0 %v3673_v2  ;;  %v1607_v2 = vadd.f32 %v1606_v17, %v1604_v41  ;;  %v3683_v45 = vpack.c.bf16 %v2369_v51, %v2368_v0  ;;  %v2370_v21 = vld [vmem:[%s6781_s2 + $0x660] sm:$0xff]  ;;  %v2389_v35 = vld [vmem:[%s6781_s2 + $0x6f8] sm:$0xff] }
 0x1e3   :  { %v6486_v43 = vadd.f32 %v1668_v23, %v1662_v9  ;;  %v1776_v24 = vpop.permute.xlu0 %1775  ;;  %3700 = vmatpush3.bf16.msra.mxu1 %v3699_v20  ;;  %v2416_v20 = vld [vmem:[%s6781_s2 + $0x7d0] sm:$0xff]  ;;  %v3685_v48 = vpack.c.bf16 %v2387_v40, %v2386_v30  ;;  %v2418_v23 = vld [vmem:[%s6781_s2 + $0x7e0] sm:$0xff] }
 0x1e4   :  { %v1777_v36 = vrot.slane %v1776_v24, 2  ;;  %3702 = vmatprep.subr.bf16.mxu1 %v3701_v31  ;;  %v2371_v31 = vld [vmem:[%s6781_s2 + $0x668] sm:$0xff]  ;;  %v2402_v17 = vld [vmem:[%s6781_s2 + $0x760] sm:$0xff] }
 0x1e5   :  { %3676 = vmatpush3.bf16.msra.mxu0 %v3675_v18  ;;  %v3713_v18 = vpack.c.bf16 %v2417_v13, %v2416_v20  ;;  %v3687_v56 = vpack.c.bf16 %v2371_v31, %v2370_v21  ;;  %v1834_v13 = vmul.f32 %v6121_v15, %v6350_v34 }
 0x1e6   :  { %v1778_v46 = vsel %vm126_vm0, %v1776_v24, %v1777_v36  ;;  %v1612_v54 = vpop.permute.xlu1 %1611  ;;  %3678 = vmatprep.subr.bf16.mxu0 %v3677_v57  ;;  %v2419_v57 = vld [vmem:[%s6781_s2 + $0x7e8] sm:$0xff]  ;;  %v3689_v24 = vpack.c.bf16 %v2389_v35, %v2388_v60  ;;  %v3715_v36 = vpack.c.bf16 %v2401_v52, %v2400_v27 }
 0x1e7   :  { %v6515_v1 = vadd.f32 %v1778_v46, %v1772_v8  ;;  %v1613_v7 = vrot.slane %v1612_v54, 2  ;;  %v6517_v5 = vpop.permute.xlu0 %2012  ;;  %3704 = vmatpush3.bf16.msra.mxu1 %v3703_v39  ;;  %v2372_v39 = vld [vmem:[%s6781_s2 + $0x670] sm:$0xff]  ;;  %v3717_v28 = vpack.c.bf16 %v2419_v57, %v2418_v23 }
 0x1e8   :  { %3706 = vmatprep.subr.bf16.mxu1 %v3705_v33  ;;  %v2403_v33 = vld [vmem:[%s6781_s2 + $0x768] sm:$0xff]  ;;  %v3691_v26 = vpack.c.bf16 %v2373_v16, %v2372_v39  ;;  %v2404_v46 = vld [vmem:[%s6781_s2 + $0x770] sm:$0xff]  ;;  %v6953_v39 = vld [vmem:[#allocation11_spill] sm:$0xff] }
 0x1e9   :  { %v1614_v4 = vsel %vm126_vm0, %v1612_v54, %v1613_v7  ;;  %3680 = vmatpush3.bf16.msra.mxu0 %v3679_v50  ;;  %v3719_v37 = vpack.c.bf16 %v2403_v33, %v2402_v17  ;;  %v2405_v54 = vld [vmem:[%s6781_s2 + $0x778] sm:$0xff]  ;;  %v1848_v16 = vmul.f32 %v6358_v55, %v6953_v39 }
 0x1ea   :  { %v6538_v63 = vadd.f32 %v1614_v4, %v1607_v2  ;;  %v6540_v59 = vpop.permute.xlu1 %1725  ;;  %3682 = vmatprep.subr.bf16.mxu0 %v3681_v10  ;;  %v3723_v51 = vpack.c.bf16 %v2405_v54, %v2404_v46  ;;  %v2014_v46 = vrot.slane %v6517_v5, 2 }
 0x1eb   :  { %v1674_v25 = vpop.permute.xlu0 %1673  ;;  %3708 = vmatpush3.bf16.msra.mxu1 %v3707_v38 }
 0x1ec   :  { %v1675_v9 = vrot.slane %v1674_v25, 2  ;;  %3710 = vmatprep.subr.bf16.mxu1 %v3709_v32 }
 0x1ed   :  { %3684 = vmatpush3.bf16.msra.mxu0 %v3683_v45 }
 0x1ee   :  { %v1676_v19 = vsel %vm126_vm0, %v1674_v25, %v1675_v9  ;;  %v6567_v62 = vpop.permute.xlu1 %1910  ;;  %3686 = vmatprep.subr.bf16.mxu0 %v3685_v48  ;;  %v6952_v48 = vld [vmem:[#allocation36_spill] sm:$0xff] }
 0x1ef   :  { %v1678_v47 = vadd.f32 %v1676_v19, %v6486_v43  ;;  %v6576_v41 = vpop.permute.xlu0 %1783  ;;  %3712 = vmatpush3.bf16.msra.mxu1 %v3711_v61  ;;  %v2420_v43 = vld [vmem:[%s6781_s2 + $0x7f0] sm:$0xff]  ;;  %v1836_v21 = vmul.f32 %v6326_v49, %v6952_v48  ;;  %v1843_v61 = vrot.slane %v6413_v12, 2 }
 0x1f0   :  { %3714 = vmatprep.subr.bf16.mxu1 %v3713_v18  ;;  %v3721_v6 = vpack.c.bf16 %v2421_v11, %v2420_v43 }
 0x1f1   :  { %3688 = vmatpush3.bf16.msra.mxu0 %v3687_v56  ;;  %v1837_v27 = vadd.f32 %v1836_v21, %v1834_v13  ;;  %v1844_v15 = vsel %vm126_vm0, %v6413_v12, %v1843_v61  ;;  %v1950_v12 = vmul.f32 %v6409_v29, %v6952_v48 }
 0x1f2   :  { %v6590_v8 = vpop.permute.xlu1 %2020  ;;  %3690 = vmatprep.subr.bf16.mxu0 %v3689_v24 }
 0x1f3   :  { %v6592_v50 = vpop.permute.xlu0 %1962  ;;  %3716 = vmatpush3.bf16.msra.mxu1 %v3715_v36  ;;  %v1846_v36 = vadd.f32 %v1844_v15, %v1837_v27  ;;  %v2015_v27 = vsel %vm126_vm0, %v6517_v5, %v2014_v46 }
 0x1f4   :  { %3718 = vmatprep.subr.bf16.mxu1 %v3717_v28 }
 0x1f5   :  { %3692 = vmatpush3.bf16.msra.mxu0 %v3691_v26  ;;  %v1949_v26 = vmul.f32 %v6358_v55, %v6350_v34 }
 0x1f6   :  { %v1682_v10 = vpop.permute.xlu1 %1681 }
 0x1f7   :  { %v1621_v0 = vpop.permute.xlu0 %1620  ;;  %3720 = vmatpush3.bf16.msra.mxu1 %v3719_v37  ;;  %v1683_v31 = vrot.slane %v1682_v10, 2  ;;  %v1951_v21 = vadd.f32 %v1950_v12, %v1949_v26 }
 0x1f8   :  { %3722 = vmatprep.subr.bf16.mxu1 %v3721_v6  ;;  %v1622_v60 = vrot.slane %v1621_v0, 2 }
 0x1f9   :  { %v1684_v52 = vsel %vm151_vm1, %v1682_v10, %v1683_v31  ;;  %v1912_v31 = vrot.slane %v6567_v62, 2 }
 0x1fa   :  { %v6600_v7 = vpop.permute.xlu1 %1791  ;;  %v1623_v49 = vsel %vm151_vm1, %v1621_v0, %v1622_v60  ;;  %v1686_v57 = vadd.f32 %v1684_v52, %v1678_v47  ;;  %v1956_v47 = vrot.slane %v6478_v14, 2  ;;  %v1849_v0 = vadd.f32 %v1848_v16, %v1846_v36 }
 0x1fb   :  { %v6602_v38 = vpop.permute.xlu0 %1733  ;;  %3724 = vmatpush3.bf16.msra.mxu1 %v3723_v51  ;;  %v1625_v28 = vadd.f32 %v1623_v49, %v6538_v63  ;;  %v1906_v63 = vmul.f32 %v6409_v29, %v6953_v39  ;;  %v1727_v51 = vrot.slane %v6540_v59, 2  ;;  %v2009_v60 = vmul.f32 %v6409_v29, %v6350_v34 }
 0x1fc   :  { %v1957_v61 = vsel %vm126_vm0, %v6478_v14, %v1956_v47  ;;  %v1735_v52 = vrot.slane %v6602_v38, 2  ;;  %v1964_v14 = vrot.slane %v6592_v50, 2 }
 0x1fd   :  { %v1728_v49 = vsel %vm151_vm1, %v6540_v59, %v1727_v51  ;;  %v6676_v39 = vadd.f32 %v2015_v27, %v2009_v60  ;;  %v2022_v59 = vrot.slane %v6590_v8, 2 }
 0x1fe   :  { %v6604_v30 = vpop.permute.xlu1 %1918  ;;  %v1730_v36 = vadd.f32 %v1728_v49, %v6475_v3  ;;  %v1965_v12 = vsel %vm151_vm1, %v6592_v50, %v1964_v14 }
 0x1ff   :  { %v6606_v40 = vpop.permute.xlu0 %1856 }
 0x202   :  { %v6608_v2 = vpop.permute.xlu1 %2028 }
 0x203   :  { %v6610_v32 = vpop.permute.xlu0 %1970 }
 0x206   :  { %v1690_v58 = vpop.permute.xlu1 %1689 }
 0x207   :  { %v1630_v53 = vpop.permute.xlu0 %1629  ;;  %v1691_v35 = vrot.slane %v1690_v58, 2 }
 0x208   :  { %v1631_v9 = vrot.slane %v1630_v53, 2 }
 0x209   :  { %v1692_v23 = vsel %vm170_vm2, %v1690_v58, %v1691_v35  ;;  %v6954_v58 = vld [vmem:[#allocation16_spill] sm:$0xff]  ;;  %v1785_v35 = vrot.slane %v6576_v41, 2 }
 0x20a   :  { %v6612_v4 = vpop.permute.xlu1 %1799  ;;  %v1632_v19 = vsel %vm151_vm1, %v1630_v53, %v1631_v9  ;;  %v1694_v43 = vadd.f32 %v1692_v23, %v1686_v57  ;;  %v1851_v53 = vmul.f32 %v6409_v29, %v6954_v58  ;;  %v1907_v23 = vadd.f32 %v1906_v63, %v6441_v42 }
 0x20b   :  { %v6614_v45 = vpop.permute.xlu0 %1741  ;;  %v1634_v37 = vadd.f32 %v1632_v19, %v1625_v28  ;;  %v1959_v29 = vadd.f32 %v1957_v61, %v1951_v21  ;;  %v1913_v19 = vsel %vm126_vm0, %v6567_v62, %v1912_v31  ;;  %v1786_v16 = vsel %vm151_vm1, %v6576_v41, %v1785_v35 }
 0x20c   :  { %v1852_v57 = vadd.f32 %v1851_v53, %v1849_v0  ;;  %v1743_v5 = vrot.slane %v6614_v45, 2  ;;  %v1858_v42 = vrot.slane %v6606_v40, 2  ;;  %v1736_v28 = vsel %vm170_vm2, %v6602_v38, %v1735_v52 }
 0x20d   :  { %v1972_v62 = vrot.slane %v6610_v32, 2  ;;  %v1915_v26 = vadd.f32 %v1913_v19, %v1907_v23  ;;  %v1793_v41 = vrot.slane %v6600_v7, 2  ;;  %v1788_v47 = vadd.f32 %v1786_v16, %v6515_v1 }
 0x20e   :  { %v6616_v20 = vpop.permute.xlu1 %1926  ;;  %v1744_v38 = vsel %vm151_vm1, %v6614_v45, %v1743_v5  ;;  %v1738_v46 = vadd.f32 %v1736_v28, %v1730_v36  ;;  %v1859_v50 = vsel %vm126_vm0, %v6606_v40, %v1858_v42  ;;  %v2030_v40 = vrot.slane %v6608_v2, 2 }
 0x20f   :  { %v6622_v25 = vpop.permute.xlu0 %1865  ;;  %v1973_v1 = vsel %vm151_vm1, %v6610_v32, %v1972_v62  ;;  %v1794_v45 = vsel %vm170_vm2, %v6600_v7, %v1793_v41  ;;  %v1861_v31 = vadd.f32 %v1859_v50, %v1852_v57  ;;  %v1801_v7 = vrot.slane %v6612_v4, 2 }
 0x210   :  { %v1746_v53 = vadd.f32 %v1744_v38, %v1738_v46  ;;  %v1796_v41 = vadd.f32 %v1794_v45, %v1788_v47 }
 0x211   :  { %v1802_v28 = vsel %vm170_vm2, %v6612_v4, %v1801_v7 }
 0x212   :  { %v6625_v18 = vpop.permute.xlu1 %2036  ;;  %v1804_v46 = vadd.f32 %v1802_v28, %v1796_v41 }
 0x213   :  { %v6628_v56 = vpop.permute.xlu0 %1978 }
 0x216   :  { %v1698_v24 = vpop.permute.xlu1 %1697 }
 0x217   :  { %v1699_v17 = vrot.slane %v1698_v24, 2  ;;  %v1639_v33 = vpop.permute.xlu0 %1638 }
 0x218   :  { %v1640_v11 = vrot.slane %v1639_v33, 2 }
 0x219   :  { %v1700_v6 = vsel %vm170_vm2, %v1698_v24, %v1699_v17  ;;  %v1920_v24 = vrot.slane %v6604_v30, 2 }
 0x21a   :  { %v6647_v54 = vadd.f32 %v1700_v6, %v1694_v43  ;;  %v1641_v10 = vsel %vm170_vm2, %v1639_v33, %v1640_v11  ;;  %v6650_v55 = vpop.permute.xlu1 %1807  ;;  %v1928_v43 = vrot.slane %v6616_v20, 2  ;;  %v2023_v6 = vsel %vm126_vm0, %v6590_v8, %v2022_v59 }
 0x21b   :  { %v6655_v13 = vadd.f32 %v1641_v10, %v1634_v37  ;;  %v1750_v48 = vpop.permute.xlu0 %1749  ;;  %v1921_v3 = vsel %vm126_vm0, %v6604_v30, %v1920_v24  ;;  %v1867_v37 = vrot.slane %v6622_v25, 2  ;;  %v1967_v10 = vadd.f32 %v1965_v12, %v1959_v29 }
 0x21c   :  { %v1751_v17 = vrot.slane %v1750_v48, 2  ;;  %v1923_v58 = vadd.f32 %v1921_v3, %v1915_v26  ;;  %v1929_v8 = vsel %vm151_vm1, %v6616_v20, %v1928_v43  ;;  %v2038_v24 = vrot.slane %v6625_v18, 2 }
 0x21d   :  { %v1703_v9 = vmax.f32 %v6655_v13, %v6647_v54  ;;  %v1868_v61 = vsel %vm151_vm1, %v6622_v25, %v1867_v37  ;;  %v1975_v60 = vadd.f32 %v1973_v1, %v1967_v10  ;;  %v1809_v5 = vrot.slane %v6650_v55, 2 }
 0x21e   :  { %v1935_v15 = vpop.permute.xlu1 %1934  ;;  %v1752_v0 = vsel %vm151_vm1, %v1750_v48, %v1751_v17  ;;  %v1980_v48 = vrot.slane %v6628_v56, 2  ;;  %v1931_v52 = vadd.f32 %v1929_v8, %v1923_v58  ;;  %v1870_v14 = vadd.f32 %v1868_v61, %v1861_v31 }
 0x21f   :  { %v1875_v34 = vpop.permute.xlu0 %1874  ;;  %v1936_v63 = vrot.slane %v1935_v15, 2  ;;  %v1754_v35 = vadd.f32 %v1752_v0, %v1746_v53  ;;  %v2031_v43 = vsel %vm151_vm1, %v6608_v2, %v2030_v40  ;;  %v1810_v13 = vsel %vm151_vm1, %v6650_v55, %v1809_v5 }
 0x220   :  { %v1876_v30 = vrot.slane %v1875_v34, 2  ;;  %v2025_v37 = vadd.f32 %v2023_v6, %v6676_v39  ;;  %v2039_v47 = vsel %vm170_vm2, %v6625_v18, %v2038_v24  ;;  %v1812_v0 = vadd.f32 %v1810_v13, %v1804_v46 }
 0x221   :  { %v1937_v27 = vsel %vm170_vm2, %v1935_v15, %v1936_v63  ;;  %v1981_v15 = vsel %vm170_vm2, %v6628_v56, %v1980_v48  ;;  %v3797_v13 = vmov 0.0  }
 0x222   :  { %v6686_v33 = vpop.permute.xlu1 %2044  ;;  %v1877_v49 = vsel %vm151_vm1, %v1875_v34, %v1876_v30  ;;  %v1939_v16 = vadd.f32 %v1937_v27, %v1931_v52  ;;  %v1983_v54 = vadd.f32 %v1981_v15, %v1975_v60  ;;  %v2033_v55 = vadd.f32 %v2031_v43, %v2025_v37  ;;  %v2423_v43 = vld [vmem:[%s6781_s2 + $0x808] sm:$0xff] }
 0x223   :  { %v1987_v11 = vpop.permute.xlu0 %1986  ;;  %v1879_v42 = vadd.f32 %v1877_v49, %v1870_v14 }
 0x224   :  { %v1988_v57 = vrot.slane %v1987_v11, 2  ;;  %v2041_v53 = vadd.f32 %v2039_v47, %v2033_v55 }
 0x226   :  { %v1816_v51 = vpop.permute.xlu1 %1815  ;;  %v1989_v56 = vsel %vm151_vm1, %v1987_v11, %v1988_v57 }
 0x227   :  { %v1758_v21 = vpop.permute.xlu0 %1757  ;;  %v1817_v62 = vrot.slane %v1816_v51, 2  ;;  %v1991_v50 = vadd.f32 %v1989_v56, %v1983_v54 }
 0x228   :  { %v1759_v32 = vrot.slane %v1758_v21, 2 }
 0x229   :  { %v1818_v11 = vsel %vm170_vm2, %v1816_v51, %v1817_v62 }
 0x22a   :  { %v1760_v20 = vsel %vm170_vm2, %v1758_v21, %v1759_v32  ;;  %v1943_v23 = vpop.permute.xlu1 %1942  ;;  %v1820_v18 = vadd.f32 %v1818_v11, %v1812_v0 }
 0x22b   :  { %v1762_v29 = vadd.f32 %v1760_v20, %v1754_v35  ;;  %v1944_v19 = vrot.slane %v1943_v23, 2  ;;  %v1884_v25 = vpop.permute.xlu0 %1883  ;;  %v1830_v35 = vstv %s6734_s22 }
 0x22c   :  { %v1885_v59 = vrot.slane %v1884_v25, 2 }
 0x22d   :  { %v1763_v34 = vmax.f32 %v1703_v9, %v1762_v29  ;;  %v1945_v36 = vsel %vm170_vm2, %v1943_v23, %v1944_v19  ;;  %v2046_v9 = vrot.slane %v6686_v33, 2  ;;  %v2075_v19 = vstv %s3166_s28 }
 0x22e   :  { %v1947_v17 = vadd.f32 %v1945_v36, %v1939_v16  ;;  %v1886_v26 = vsel %vm170_vm2, %v1884_v25, %v1885_v59  ;;  %v2053_v12 = vpop.permute.xlu1 %2052 }
 0x22f   :  { %v1888_v3 = vadd.f32 %v1886_v26, %v1879_v42  ;;  %v1995_v38 = vpop.permute.xlu0 %1994  ;;  %v2054_v63 = vrot.slane %v2053_v12, 2  ;;  %v2047_v39 = vsel %vm170_vm2, %v6686_v33, %v2046_v9 }
 0x230   :  { %v1996_v4 = vrot.slane %v1995_v38, 2  ;;  %v2049_v61 = vadd.f32 %v2047_v39, %v2041_v53 }
 0x231   :  { %v1948_v2 = vmax.f32 %v1888_v3, %v1947_v17  ;;  %v2055_v51 = vsel %vm151_vm1, %v2053_v12, %v2054_v63  ;;  %v3795_v3 = vmov 0.0|0.0  }
 0x232   :  { %v1997_v10 = vsel %vm151_vm1, %v1995_v38, %v1996_v4  ;;  %v2003_v1 = vpop.permute.xlu1 %2002  ;;  %v2057_v7 = vadd.f32 %v2055_v51, %v2049_v61  ;;  %3725 = vmatprep.subr.bf16.mxu0 %v3795_v3  ;;  %v2426_v38 = vld [vmem:[%s6781_s2 + $0x820] sm:$0xff] }
 0x233   :  { %v2004_v30 = vrot.slane %v2003_v1, 2  ;;  %v1824_v45 = vpop.permute.xlu0 %1823  ;;  %v1999_v6 = vadd.f32 %v1997_v10, %v1991_v50 }
 0x234   :  { %v1825_v58 = vrot.slane %v1824_v45, 2 }
 0x235   :  { %v2005_v8 = vsel %vm170_vm2, %v2003_v1, %v2004_v30 }
 0x236   :  { %v2007_v21 = vadd.f32 %v2005_v8, %v1999_v6  ;;  %v1826_v31 = vsel %vm170_vm2, %v1824_v45, %v1825_v58  ;;  %v2069_v40 = vpop.permute.xlu1 %2068  ;;  %v3171_v58 = vld [vmem:[%s6781_s2 + $0x828] ss:$0 sm:$0xff] }
 0x237   :  { %v1828_v32 = vadd.f32 %v1826_v31, %v1820_v18  ;;  %v2061_v60 = vpop.permute.xlu0 %2060  ;;  %v2070_v27 = vrot.slane %v2069_v40, 2 }
 0x238   :  { %v2008_v48 = vmax.f32 %v1948_v2, %v2007_v21  ;;  %v2062_v33 = vrot.slane %v2061_v60, 2 }
 0x239   :  { %v1829_v52 = vmax.f32 %v1763_v34, %v1828_v32  ;;  %v2071_v14 = vsel %vm170_vm2, %v2069_v40, %v2070_v27 }
 0x23a   :  { %v2063_v49 = vsel %vm170_vm2, %v2061_v60, %v2062_v33 }
 0x23b   :  { %v1831_v20 = vadd.f32 %v1830_v35, %v1829_v52  ;;  %v2065_v23 = vadd.f32 %v2063_v49, %v2057_v7 }
 0x23d   :  { %v1832_v57 = vmax.f32 %v1831_v20, 0.0  ;;  %v2073_v29 = vadd.f32 %v2071_v14, %v2065_v23 }
 0x23e   :  { %v3275_v24 = vpop.f32.mrb[2].mxu0 }
 0x23f   :  { %v2074_v25 = vmax.f32 %v2008_v48, %v2073_v29  ;;  %v2151_v5 = vrot.slane %v1832_v57, %v6949_v22  ;;  %v3276_v16 = vpop.f32.mrb[3].mxu0 }
 0x240   :  { %v3277_v59 = vadd.f32 %v3276_v16, %v3275_v24 }
 0x241   :  { %v2152_v15 = vcombine.high %v2151_v5, %v2151_v5  ;;  %v2076_v42 = vadd.f32 %v2075_v19, %v2074_v25 }
 0x242   :  { %v2639_v36 = vadd.f32 %v3277_v59, %v6431_v44  ;;  %v2424_v44 = vld [vmem:[%s6781_s2 + $0x810] sm:$0xff] }
 0x243   :  { %2916 = vmatprep.mubr.f32.mxu0 %v2152_v15  ;;  %v2077_v34 = vmax.f32 %v2076_v42, 0.0  ;;  %v3726_v56 = vpack.c.bf16 %v2424_v44, %v2423_v43 }
 0x244   :  { %2917 = vmatmul.mubr.f32.vlgmr.msra.gmra.mrb[6].mxu0 %v2151_v5  ;;  %v3310_v28 = vpop.f32.mrb[2].mxu1 }
 0x245   :  { %v2162_v62 = vrot.slane %v2077_v34, %v6949_v22  ;;  %v3311_v17 = vpop.f32.mrb[3].mxu1  ;;  %3727 = vmatpush3.bf16.msra.mxu0 %v3726_v56  ;;  %v2425_v22 = vld [vmem:[%s6781_s2 + $0x818] sm:$0xff]  ;;  %3466 = vmatprep.mubr.msk.f32.mxu0 %vm3796_vm3, %v3797_v13 }
 0x246   :  { %v3312_v26 = vadd.f32 %v3311_v17, %v3310_v28  ;;  %3728 = vmatprep.subr.bf16.mxu0 %v3795_v3  ;;  %v3729_v54 = vpack.c.bf16 %v2426_v38, %v2425_v22 }
 0x247   :  { %v2163_v12 = vcombine.high %v2162_v62, %v2162_v62 }
 0x248   :  { %v2709_v41 = vadd.f32 %v3312_v26, %v2639_v36 }
 0x249   :  { %2986 = vmatprep.mubr.f32.mxu1 %v2163_v12  ;;  %3730 = vmatpush3.bf16.msra.mxu0 %v3729_v54 }
 0x24a   :  { %2987 = vmatmul.mubr.f32.vlgmr.msra.gmra.mrb[6].mxu1 %v2162_v62 }
 0x2ab   :  { %v3345_v9 = vpop.f32.mrb[4].mxu0 }
 0x2ac   :  { %v3346_v4 = vpop.f32.mrb[5].mxu0 }
 0x2ad   :  { %v3347_v37 = vadd.f32 %v3346_v4, %v3345_v9 }
 0x2af   :  { %v2779_v46 = vadd.f32 %v3347_v37, %v2709_v41 }
 0x2b1   :  { %v3380_v47 = vpop.f32.mrb[4].mxu1 }
 0x2b2   :  { %v3381_v2 = vpop.f32.mrb[5].mxu1 }
 0x2b3   :  { %v3382_v50 = vadd.f32 %v3381_v2, %v3380_v47 }
 0x2b5   :  { %v2849_v11 = vadd.f32 %v3382_v50, %v2779_v46 }
 0x317   :  { %v3415_v63 = vpop.f32.mrb[6].mxu0 }
 0x318   :  { %v3416_v10 = vpop.f32.mrb[7].mxu0 }
 0x319   :  { %v3417_v1 = vadd.f32 %v3416_v10, %v3415_v63 }
 0x31b   :  { %v2919_v55 = vadd.f32 %v3417_v1, %v2849_v11 }
 0x31d   :  { %v3450_v0 = vpop.f32.mrb[6].mxu1 }
 0x31e   :  { %v3451_v30 = vpop.f32.mrb[7].mxu1 }
 0x31f   :  { %v3452_v45 = vadd.f32 %v3451_v30, %v3450_v0 }
 0x321   :  { %v2989_v39 = vadd.f32 %v3452_v45, %v2919_v55 }
 0x323   :  { %v2992_v6 = vmax.f32 %v2989_v39, 0.0 }
 0x325   :  { %3467 = vmatmul.mubr.msk.f32.vlgmr.msra.gmra.mrb[8].mxu0 %vm2997_vm4, %v2992_v6 }
 0x3f8   :  { %v3067_v53 = vpop.f32.mrb[8].mxu0 }
 0x3f9   :  { %v3068_v18 = vadd.f32 %v3171_v58, %v3067_v53  ;;  %v3468_v8 = vpop.f32.mrb[9].mxu0 }
 0x3fb   :  { %3072 = vst.msk [vmem:[#allocation5] sm:$0x3] %vm3071_vm5, %v3068_v18 }
 0x3fc   :  { %3775 = shalt.err (!%p3772_p9)
}
 0x3fd   :  { %s3776_s19 = scalar_lea.hbm %s6782_s3, 32 }
 0x3fe   :  { %p3777_p10 = scmp.ne.s32.totalorder %s6782_s3, %s3776_s19  ;;  %p3780_p11 = scmp.lt.u32.totalorder %s3776_s19, %s6782_s3 }
 0x400   :  { %p3782_p12 = pnand %p3780_p11, %p3777_p10 }
 0x402   :  { %3785 = shalt.err (!%p3782_p12)
}
 0x403   :  { %3082 = dma.vmem_to_hbm [thread:$0]  %s3080_s16, 32, %s6782_s3, [#allocation3]  }
 0x404   :  { %3788 = dma.done.wait [#allocation3], 32  }
 0x405   :  { %3789 = vsyncadd [#allocation3], 4294967264 }
 0x406   :  { %3086 = vsyncpa [#allocation3], 1 }
 0x407   :  { %3087 = vsyncpa [#allocation4], 1 }

</bundles_post_ra>
